<compile_context>
chip_gen: v7x
topology: tpu7x:2x2x1
jax: 0.10.0
libtpu: 0.0.40
codegen_flags: <defaults>
</compile_context>

<pallas_src>
import jax
import jax.numpy as jnp
from jax.experimental import pallas as pl
from jax.experimental.pallas import tpu as pltpu


def _round_up(v, m):
    return (v + m - 1) // m * m


def _simclr_mlp_kernel(
    x_ref,
    w1_ref, b1_ref,
    w2_ref, b2_ref,
    w3_ref, b3_ref,
    w4_ref, b4_ref,      # fc4, lane-padded to nc_pad for the features output
    wp1_ref, bp1_ref,    # projection fc1, row-padded to nc_pad
    wp2_ref, bp2_ref,    # projection fc2, lane-padded to pd_pad
    feat_ref, proj_ref,
):
    """Fused: fc1->relu->fc2->relu->fc3->relu->{fc4 (features), proj MLP}."""
    x = x_ref[...]  # bf16 tile (tile_b, F_pad)

    h = jnp.dot(x, w1_ref[...], preferred_element_type=jnp.float32) + b1_ref[...]
    h = jnp.maximum(h, 0.0).astype(jnp.bfloat16)

    h = jnp.dot(h, w2_ref[...], preferred_element_type=jnp.float32) + b2_ref[...]
    h = jnp.maximum(h, 0.0).astype(jnp.bfloat16)

    h = jnp.dot(h, w3_ref[...], preferred_element_type=jnp.float32) + b3_ref[...]
    h = jnp.maximum(h, 0.0).astype(jnp.bfloat16)

    # Features head (lane-padded): f32 accumulate + bias-add, lane-dense bf16 store.
    feat = jnp.dot(h, w4_ref[...], preferred_element_type=jnp.float32) + b4_ref[...]
    feat_ref[...] = feat.astype(feat_ref.dtype)

    # Projection branch reuses the lane-padded feat against the row-padded
    # wp1.  Exact: padded feat lanes and padded wp1 rows are all zero.
    p = jnp.dot(feat.astype(jnp.bfloat16), wp1_ref[...],
                preferred_element_type=jnp.float32) + bp1_ref[...]
    p = jnp.maximum(p, 0.0).astype(jnp.bfloat16)
    proj = jnp.dot(p, wp2_ref[...], preferred_element_type=jnp.float32) + bp2_ref[...]
    proj_ref[...] = proj.astype(proj_ref.dtype)


def prepare_kernel_params(params, num_features, num_classes, projection_dim,
                          f_pad, nc_pad, pd_pad):
    """Cast weights to bf16 (biases stay f32); zero-pad:
      * w1 rows: num_features -> f_pad
      * fc4 cols / bias: num_classes -> nc_pad
      * wp1 rows: num_classes -> nc_pad
      * wp2 cols / bias: projection_dim -> pd_pad
    All padding is with zeros, so the math is exact."""
    f32, bf16 = jnp.float32, jnp.bfloat16

    w1_pad = jnp.zeros((f_pad, 1024), bf16).at[:num_features].set(
        params["w1"].astype(bf16))
    w4_pad = jnp.zeros((512, nc_pad), bf16).at[:, :num_classes].set(
        params["w4"].astype(bf16))
    b4_pad = jnp.zeros((1, nc_pad), f32).at[:, :num_classes].set(
        params["b4"].astype(f32))
    wp1_pad = jnp.zeros((nc_pad, 512), bf16).at[:num_classes].set(
        params["wp1"].astype(bf16))
    wp2_pad = jnp.zeros((512, pd_pad), bf16).at[:, :projection_dim].set(
        params["wp2"].astype(bf16))
    bp2_pad = jnp.zeros((1, pd_pad), f32).at[:, :projection_dim].set(
        params["bp2"].astype(f32))

    return {
        "w1": w1_pad, "b1": params["b1"].astype(f32),
        "w2": params["w2"].astype(bf16), "b2": params["b2"].astype(f32),
        "w3": params["w3"].astype(bf16), "b3": params["b3"].astype(f32),
        "w4": w4_pad, "b4": b4_pad,
        "wp1": wp1_pad, "bp1": params["bp1"].astype(f32),
        "wp2": wp2_pad, "bp2": bp2_pad,
    }


def _pick_tile_b(batch):
    """Heuristic: big enough to amortize the ~0.35us per-grid-step overhead,
    small enough to keep an even >=2-step parallel grid (v7x megacore)."""
    if batch >= 1024:
        return 512
    if batch >= 512:
        return 256
    return 128


def simclr_mlp_forward(x, params, *, num_classes, projection_dim=128, tile_b=None):
    """SimCLRMLPNet forward in one fused Pallas kernel.

    x: (B, num_features) float32
    params: dict w1,b1,...,w4,b4,wp1,bp1,wp2,bp2; weights (in,out), biases (1,out)
    tile_b: batch rows per grid step (None -> auto).
    returns: (features (B, num_classes) f32, projections (B, projection_dim) f32)

    Note: weights/activations run in bf16 inside the kernel (f32 accumulation),
    so results match an f32 PyTorch model only to ~1e-2 relative tolerance.
    """
    B, F = x.shape
    if tile_b is None:
        tile_b = _pick_tile_b(B)

    f_pad = _round_up(F, 128)
    nc_pad = _round_up(max(num_classes, 128), 128)
    pd_pad = _round_up(max(projection_dim, 128), 128)

    kp = prepare_kernel_params(params, F, num_classes, projection_dim,
                               f_pad, nc_pad, pd_pad)
    param_order = ["w1", "b1", "w2", "b2", "w3", "b3",
                   "w4", "b4", "wp1", "bp1", "wp2", "bp2"]
    plist = [kp[k] for k in param_order]

    # Fused batch-pad + lane-pad + bf16 cast of x (single pass; padded
    # rows/lanes are zero and get sliced off on return).
    b_pad = _round_up(B, tile_b)
    x_p = jnp.zeros((b_pad, f_pad), jnp.bfloat16).at[:B, :F].set(
        x.astype(jnp.bfloat16))

    grid = (b_pad // tile_b,)

    def full_spec(arr):
        # Whole weight / bias tensor resident for every grid step.
        return pl.BlockSpec(arr.shape, lambda i: (0, 0))

    in_specs = [pl.BlockSpec((tile_b, f_pad), lambda i: (i, 0))] + [
        full_spec(a) for a in plist
    ]
    out_specs = (
        pl.BlockSpec((tile_b, nc_pad), lambda i: (i, 0)),
        pl.BlockSpec((tile_b, pd_pad), lambda i: (i, 0)),
    )
    # bf16 outputs: lane-dense stores, half the HBM writeback; upcast outside.
    out_shape = (
        jax.ShapeDtypeStruct((b_pad, nc_pad), jnp.bfloat16),
        jax.ShapeDtypeStruct((b_pad, pd_pad), jnp.bfloat16),
    )

    flops = 2 * b_pad * (
        f_pad * 1024 + 1024 * 512 + 512 * 512
        + 512 * nc_pad + nc_pad * 512 + 512 * pd_pad
    )
    bytes_accessed = (
        x_p.size * x_p.dtype.itemsize
        + sum(int(a.size) * a.dtype.itemsize for a in plist)
        + b_pad * nc_pad * 2
        + b_pad * pd_pad * 2
    )

    cp_kwargs = dict(dimension_semantics=("parallel",))
    if tile_b >= 512:
        # Headroom over v5e's 16 MiB scoped default for large batch tiles.
        cp_kwargs["vmem_limit_bytes"] = 48 * 1024 * 1024

    fn = pl.pallas_call(
        _simclr_mlp_kernel,
        out_shape=out_shape,
        grid_spec=pltpu.PrefetchScalarGridSpec(
            num_scalar_prefetch=0,
            grid=grid,
            in_specs=in_specs,
            out_specs=out_specs,
        ),
        compiler_params=pltpu.CompilerParams(**cp_kwargs),
        cost_estimate=pl.CostEstimate(
            flops=int(flops), transcendentals=0, bytes_accessed=int(bytes_accessed)
        ),
    )
    feat_pad, proj_pad = fn(x_p, *plist)
    feat = feat_pad[:B, :num_classes].astype(jnp.float32)
    proj = proj_pad[:B, :projection_dim].astype(jnp.float32)
    return feat, proj


def xavier_uniform(key, fan_in, fan_out, dtype=jnp.float32):
    """nn.init.xavier_uniform_ equivalent; returns (in, out) layout."""
    limit = (6.0 / (fan_in + fan_out)) ** 0.5
    return jax.random.uniform(
        key, (fan_in, fan_out), dtype=dtype, minval=-limit, maxval=limit
    )


def init_params(key, num_features, num_classes, projection_dim=128):
    keys = jax.random.split(key, 6)
    dims = [
        ("w1", num_features, 1024),
        ("w2", 1024, 512),
        ("w3", 512, 512),
        ("w4", 512, num_classes),
        ("wp1", num_classes, 512),
        ("wp2", 512, projection_dim),
    ]
    params = {}
    for k, (name, din, dout) in zip(keys, dims):
        params[name] = xavier_uniform(k, din, dout)
        params["b" + name[1:]] = jnp.zeros((1, dout), jnp.float32)  # constant_(bias, 0)
    return params


def reference_forward(x, p):
    """Pure f32 PyTorch-faithful reference."""
    relu = lambda v: jnp.maximum(v, 0.0)
    h = relu(x @ p["w1"] + p["b1"])
    h = relu(h @ p["w2"] + p["b2"])
    h = relu(h @ p["w3"] + p["b3"])
    feat = h @ p["w4"] + p["b4"]
    proj = relu(feat @ p["wp1"] + p["bp1"]) @ p["wp2"] + p["bp2"]
    return feat, proj


if __name__ == "__main__":
    num_features = 32
    num_classes = 16
    projection_dim = 128
    batch = 256          # tile_b auto-picks 128 -> 2 parallel grid steps (both v7x TCs)

    key = jax.random.PRNGKey(0)
    k_x, k_p = jax.random.split(key)
    x = jax.random.normal(k_x, (batch, num_features), dtype=jnp.float32)
    params = init_params(k_p, num_features, num_classes, projection_dim)

    feat, proj = simclr_mlp_forward(
        x, params, num_classes=num_classes, projection_dim=projection_dim,
    )
    feat, proj = jax.block_until_ready((feat, proj))

    feat_ref, proj_ref = reference_forward(x, params)
    assert feat.shape == (batch, num_classes)
    assert proj.shape == (batch, projection_dim)
    # Tolerance accounts for bf16 weight/activation/output quantization inside
    # the kernel vs. the pure f32 reference (observed error is O(1e-3)).
    assert jnp.allclose(feat, feat_ref, atol=2e-2, rtol=2e-2)
    assert jnp.allclose(proj, proj_ref, atol=2e-2, rtol=2e-2)

    print("KERNEL_OK")
</pallas_src>

<mosaic_0001>
module attributes {stable_mosaic.version = 11 : i64} {
  func.func @_simclr_mlp_kernel(%arg0: i32, %arg1: memref<128x128xbf16, #tpu.memory_space<vmem>>, %arg2: memref<128x1024xbf16, #tpu.memory_space<vmem>>, %arg3: memref<1x1024xf32, #tpu.memory_space<vmem>>, %arg4: memref<1024x512xbf16, #tpu.memory_space<vmem>>, %arg5: memref<1x512xf32, #tpu.memory_space<vmem>>, %arg6: memref<512x512xbf16, #tpu.memory_space<vmem>>, %arg7: memref<1x512xf32, #tpu.memory_space<vmem>>, %arg8: memref<512x128xbf16, #tpu.memory_space<vmem>>, %arg9: memref<1x128xf32, #tpu.memory_space<vmem>>, %arg10: memref<128x512xbf16, #tpu.memory_space<vmem>>, %arg11: memref<1x512xf32, #tpu.memory_space<vmem>>, %arg12: memref<512x128xbf16, #tpu.memory_space<vmem>>, %arg13: memref<1x128xf32, #tpu.memory_space<vmem>>, %arg14: memref<128x128xbf16, #tpu.memory_space<vmem>>, %arg15: memref<128x128xbf16, #tpu.memory_space<vmem>>) attributes {dimension_semantics = [#tpu.dimension_semantics<parallel>], iteration_bounds = array<i64: 2>, scalar_prefetch = 0 : i64, scratch_operands = 0 : i64, tpu.core_type = #tpu.core_type<tc>, window_params = [{transform_indices = @transform_0, window_bounds = array<i64: 128, 128>}, {pipeline_mode = #tpu.pipeline_mode<synchronous>, transform_indices = @transform_1, window_bounds = array<i64: 128, 1024>}, {pipeline_mode = #tpu.pipeline_mode<synchronous>, transform_indices = @transform_2, window_bounds = array<i64: 1, 1024>}, {pipeline_mode = #tpu.pipeline_mode<synchronous>, transform_indices = @transform_3, window_bounds = array<i64: 1024, 512>}, {pipeline_mode = #tpu.pipeline_mode<synchronous>, transform_indices = @transform_4, window_bounds = array<i64: 1, 512>}, {pipeline_mode = #tpu.pipeline_mode<synchronous>, transform_indices = @transform_5, window_bounds = array<i64: 512, 512>}, {pipeline_mode = #tpu.pipeline_mode<synchronous>, transform_indices = @transform_6, window_bounds = array<i64: 1, 512>}, {pipeline_mode = #tpu.pipeline_mode<synchronous>, transform_indices = @transform_7, window_bounds = array<i64: 512, 128>}, {pipeline_mode = #tpu.pipeline_mode<synchronous>, transform_indices = @transform_8, window_bounds = array<i64: 1, 128>}, {pipeline_mode = #tpu.pipeline_mode<synchronous>, transform_indices = @transform_9, window_bounds = array<i64: 128, 512>}, {pipeline_mode = #tpu.pipeline_mode<synchronous>, transform_indices = @transform_10, window_bounds = array<i64: 1, 512>}, {pipeline_mode = #tpu.pipeline_mode<synchronous>, transform_indices = @transform_11, window_bounds = array<i64: 512, 128>}, {pipeline_mode = #tpu.pipeline_mode<synchronous>, transform_indices = @transform_12, window_bounds = array<i64: 1, 128>}, {transform_indices = @transform_13, window_bounds = array<i64: 128, 128>}, {transform_indices = @transform_14, window_bounds = array<i64: 128, 128>}]} {
    %c0 = arith.constant 0 : index
    %c0_0 = arith.constant 0 : index
    %0 = vector.load %arg1[%c0, %c0_0] : memref<128x128xbf16, #tpu.memory_space<vmem>>, vector<128x128xbf16>
    %c0_1 = arith.constant 0 : index
    %c0_2 = arith.constant 0 : index
    %1 = vector.load %arg2[%c0_1, %c0_2] : memref<128x1024xbf16, #tpu.memory_space<vmem>>, vector<128x1024xbf16>
    %cst = arith.constant dense<0.000000e+00> : vector<128x1024xf32>
    %2 = tpu.matmul %0, %1, %cst {dimension_numbers = #tpu.dot_dimension_numbers<[1], [0], [0], [1], [0, 0, 1, 1], [], []>} : vector<128x128xbf16>, vector<128x1024xbf16>, vector<128x1024xf32> -> vector<128x1024xf32>
    %c0_3 = arith.constant 0 : index
    %c0_4 = arith.constant 0 : index
    %3 = vector.load %arg3[%c0_3, %c0_4] : memref<1x1024xf32, #tpu.memory_space<vmem>>, vector<1x1024xf32>
    %4 = vector.broadcast %3 : vector<1x1024xf32> to vector<128x1024xf32>
    %5 = arith.addf %2, %4 : vector<128x1024xf32>
    %cst_5 = arith.constant 0.000000e+00 : f32
    %6 = vector.broadcast %cst_5 : f32 to vector<128x1024xf32>
    %7 = arith.maximumf %5, %6 : vector<128x1024xf32>
    %8 = arith.truncf %7 : vector<128x1024xf32> to vector<128x1024xbf16>
    %c0_6 = arith.constant 0 : index
    %c0_7 = arith.constant 0 : index
    %9 = vector.load %arg4[%c0_6, %c0_7] : memref<1024x512xbf16, #tpu.memory_space<vmem>>, vector<1024x512xbf16>
    %cst_8 = arith.constant dense<0.000000e+00> : vector<128x512xf32>
    %10 = tpu.matmul %8, %9, %cst_8 {dimension_numbers = #tpu.dot_dimension_numbers<[1], [0], [0], [1], [0, 0, 1, 1], [], []>} : vector<128x1024xbf16>, vector<1024x512xbf16>, vector<128x512xf32> -> vector<128x512xf32>
    %c0_9 = arith.constant 0 : index
    %c0_10 = arith.constant 0 : index
    %11 = vector.load %arg5[%c0_9, %c0_10] : memref<1x512xf32, #tpu.memory_space<vmem>>, vector<1x512xf32>
    %12 = vector.broadcast %11 : vector<1x512xf32> to vector<128x512xf32>
    %13 = arith.addf %10, %12 : vector<128x512xf32>
    %cst_11 = arith.constant 0.000000e+00 : f32
    %14 = vector.broadcast %cst_11 : f32 to vector<128x512xf32>
    %15 = arith.maximumf %13, %14 : vector<128x512xf32>
    %16 = arith.truncf %15 : vector<128x512xf32> to vector<128x512xbf16>
    %c0_12 = arith.constant 0 : index
    %c0_13 = arith.constant 0 : index
    %17 = vector.load %arg6[%c0_12, %c0_13] : memref<512x512xbf16, #tpu.memory_space<vmem>>, vector<512x512xbf16>
    %cst_14 = arith.constant dense<0.000000e+00> : vector<128x512xf32>
    %18 = tpu.matmul %16, %17, %cst_14 {dimension_numbers = #tpu.dot_dimension_numbers<[1], [0], [0], [1], [0, 0, 1, 1], [], []>} : vector<128x512xbf16>, vector<512x512xbf16>, vector<128x512xf32> -> vector<128x512xf32>
    %c0_15 = arith.constant 0 : index
    %c0_16 = arith.constant 0 : index
    %19 = vector.load %arg7[%c0_15, %c0_16] : memref<1x512xf32, #tpu.memory_space<vmem>>, vector<1x512xf32>
    %20 = vector.broadcast %19 : vector<1x512xf32> to vector<128x512xf32>
    %21 = arith.addf %18, %20 : vector<128x512xf32>
    %cst_17 = arith.constant 0.000000e+00 : f32
    %22 = vector.broadcast %cst_17 : f32 to vector<128x512xf32>
    %23 = arith.maximumf %21, %22 : vector<128x512xf32>
    %24 = arith.truncf %23 : vector<128x512xf32> to vector<128x512xbf16>
    %c0_18 = arith.constant 0 : index
    %c0_19 = arith.constant 0 : index
    %25 = vector.load %arg8[%c0_18, %c0_19] : memref<512x128xbf16, #tpu.memory_space<vmem>>, vector<512x128xbf16>
    %cst_20 = arith.constant dense<0.000000e+00> : vector<128x128xf32>
    %26 = tpu.matmul %24, %25, %cst_20 {dimension_numbers = #tpu.dot_dimension_numbers<[1], [0], [0], [1], [0, 0, 1, 1], [], []>} : vector<128x512xbf16>, vector<512x128xbf16>, vector<128x128xf32> -> vector<128x128xf32>
    %c0_21 = arith.constant 0 : index
    %c0_22 = arith.constant 0 : index
    %27 = vector.load %arg9[%c0_21, %c0_22] : memref<1x128xf32, #tpu.memory_space<vmem>>, vector<1x128xf32>
    %28 = vector.broadcast %27 : vector<1x128xf32> to vector<128x128xf32>
    %29 = arith.addf %26, %28 : vector<128x128xf32>
    %30 = arith.truncf %29 : vector<128x128xf32> to vector<128x128xbf16>
    %c0_23 = arith.constant 0 : index
    %c0_24 = arith.constant 0 : index
    %31 = vector.load %arg14[%c0_23, %c0_24] : memref<128x128xbf16, #tpu.memory_space<vmem>>, vector<128x128xbf16>
    tpu.vector_store %arg14[%c0_23, %c0_24], %30 {strides = array<i32>} : memref<128x128xbf16, #tpu.memory_space<vmem>>, vector<128x128xbf16>,
    %32 = arith.truncf %29 : vector<128x128xf32> to vector<128x128xbf16>
    %c0_25 = arith.constant 0 : index
    %c0_26 = arith.constant 0 : index
    %33 = vector.load %arg10[%c0_25, %c0_26] : memref<128x512xbf16, #tpu.memory_space<vmem>>, vector<128x512xbf16>
    %cst_27 = arith.constant dense<0.000000e+00> : vector<128x512xf32>
    %34 = tpu.matmul %32, %33, %cst_27 {dimension_numbers = #tpu.dot_dimension_numbers<[1], [0], [0], [1], [0, 0, 1, 1], [], []>} : vector<128x128xbf16>, vector<128x512xbf16>, vector<128x512xf32> -> vector<128x512xf32>
    %c0_28 = arith.constant 0 : index
    %c0_29 = arith.constant 0 : index
    %35 = vector.load %arg11[%c0_28, %c0_29] : memref<1x512xf32, #tpu.memory_space<vmem>>, vector<1x512xf32>
    %36 = vector.broadcast %35 : vector<1x512xf32> to vector<128x512xf32>
    %37 = arith.addf %34, %36 : vector<128x512xf32>
    %cst_30 = arith.constant 0.000000e+00 : f32
    %38 = vector.broadcast %cst_30 : f32 to vector<128x512xf32>
    %39 = arith.maximumf %37, %38 : vector<128x512xf32>
    %40 = arith.truncf %39 : vector<128x512xf32> to vector<128x512xbf16>
    %c0_31 = arith.constant 0 : index
    %c0_32 = arith.constant 0 : index
    %41 = vector.load %arg12[%c0_31, %c0_32] : memref<512x128xbf16, #tpu.memory_space<vmem>>, vector<512x128xbf16>
    %cst_33 = arith.constant dense<0.000000e+00> : vector<128x128xf32>
    %42 = tpu.matmul %40, %41, %cst_33 {dimension_numbers = #tpu.dot_dimension_numbers<[1], [0], [0], [1], [0, 0, 1, 1], [], []>} : vector<128x512xbf16>, vector<512x128xbf16>, vector<128x128xf32> -> vector<128x128xf32>
    %c0_34 = arith.constant 0 : index
    %c0_35 = arith.constant 0 : index
    %43 = vector.load %arg13[%c0_34, %c0_35] : memref<1x128xf32, #tpu.memory_space<vmem>>, vector<1x128xf32>
    %44 = vector.broadcast %43 : vector<1x128xf32> to vector<128x128xf32>
    %45 = arith.addf %42, %44 : vector<128x128xf32>
    %46 = arith.truncf %45 : vector<128x128xf32> to vector<128x128xbf16>
    %c0_36 = arith.constant 0 : index
    %c0_37 = arith.constant 0 : index
    %47 = vector.load %arg15[%c0_36, %c0_37] : memref<128x128xbf16, #tpu.memory_space<vmem>>, vector<128x128xbf16>
    tpu.vector_store %arg15[%c0_36, %c0_37], %46 {strides = array<i32>} : memref<128x128xbf16, #tpu.memory_space<vmem>>, vector<128x128xbf16>,
    return
  }
  func.func @transform_0(%arg0: i32) -> (i32, i32) {
    %c0_i32 = arith.constant 0 : i32
    %c0_i32_0 = arith.constant 0 : i32
    return %arg0, %c0_i32 : i32, i32
  }
  func.func @transform_1(%arg0: i32) -> (i32, i32) {
    %c0_i32 = arith.constant 0 : i32
    %c0_i32_0 = arith.constant 0 : i32
    %c0_i32_1 = arith.constant 0 : i32
    return %c0_i32, %c0_i32_0 : i32, i32
  }
  func.func @transform_2(%arg0: i32) -> (i32, i32) {
    %c0_i32 = arith.constant 0 : i32
    %c0_i32_0 = arith.constant 0 : i32
    %c0_i32_1 = arith.constant 0 : i32
    return %c0_i32, %c0_i32_0 : i32, i32
  }
  func.func @transform_3(%arg0: i32) -> (i32, i32) {
    %c0_i32 = arith.constant 0 : i32
    %c0_i32_0 = arith.constant 0 : i32
    %c0_i32_1 = arith.constant 0 : i32
    return %c0_i32, %c0_i32_0 : i32, i32
  }
  func.func @transform_4(%arg0: i32) -> (i32, i32) {
    %c0_i32 = arith.constant 0 : i32
    %c0_i32_0 = arith.constant 0 : i32
    %c0_i32_1 = arith.constant 0 : i32
    return %c0_i32, %c0_i32_0 : i32, i32
  }
  func.func @transform_5(%arg0: i32) -> (i32, i32) {
    %c0_i32 = arith.constant 0 : i32
    %c0_i32_0 = arith.constant 0 : i32
    %c0_i32_1 = arith.constant 0 : i32
    return %c0_i32, %c0_i32_0 : i32, i32
  }
  func.func @transform_6(%arg0: i32) -> (i32, i32) {
    %c0_i32 = arith.constant 0 : i32
    %c0_i32_0 = arith.constant 0 : i32
    %c0_i32_1 = arith.constant 0 : i32
    return %c0_i32, %c0_i32_0 : i32, i32
  }
  func.func @transform_7(%arg0: i32) -> (i32, i32) {
    %c0_i32 = arith.constant 0 : i32
    %c0_i32_0 = arith.constant 0 : i32
    %c0_i32_1 = arith.constant 0 : i32
    return %c0_i32, %c0_i32_0 : i32, i32
  }
  func.func @transform_8(%arg0: i32) -> (i32, i32) {
    %c0_i32 = arith.constant 0 : i32
    %c0_i32_0 = arith.constant 0 : i32
    %c0_i32_1 = arith.constant 0 : i32
    return %c0_i32, %c0_i32_0 : i32, i32
  }
  func.func @transform_9(%arg0: i32) -> (i32, i32) {
    %c0_i32 = arith.constant 0 : i32
    %c0_i32_0 = arith.constant 0 : i32
    %c0_i32_1 = arith.constant 0 : i32
    return %c0_i32, %c0_i32_0 : i32, i32
  }
  func.func @transform_10(%arg0: i32) -> (i32, i32) {
    %c0_i32 = arith.constant 0 : i32
    %c0_i32_0 = arith.constant 0 : i32
    %c0_i32_1 = arith.constant 0 : i32
    return %c0_i32, %c0_i32_0 : i32, i32
  }
  func.func @transform_11(%arg0: i32) -> (i32, i32) {
    %c0_i32 = arith.constant 0 : i32
    %c0_i32_0 = arith.constant 0 : i32
    %c0_i32_1 = arith.constant 0 : i32
    return %c0_i32, %c0_i32_0 : i32, i32
  }
  func.func @transform_12(%arg0: i32) -> (i32, i32) {
    %c0_i32 = arith.constant 0 : i32
    %c0_i32_0 = arith.constant 0 : i32
    %c0_i32_1 = arith.constant 0 : i32
    return %c0_i32, %c0_i32_0 : i32, i32
  }
  func.func @transform_13(%arg0: i32) -> (i32, i32) {
    %c0_i32 = arith.constant 0 : i32
    %c0_i32_0 = arith.constant 0 : i32
    return %arg0, %c0_i32 : i32, i32
  }
  func.func @transform_14(%arg0: i32) -> (i32, i32) {
    %c0_i32 = arith.constant 0 : i32
    %c0_i32_0 = arith.constant 0 : i32
    return %arg0, %c0_i32 : i32, i32
  }
}

</mosaic_0001>

<bundles_post_ra>
// kernel: tpu_custom_call.1
= control target key start
LH: loop header
LB: loop body
LE: loop exit
PB: predicated region body
PF: predicated region fallthrough
CT: control target
= control target key end

     0   :  { %s11338_s0 = inlined_call_operand.hbm [shape: bf16[256,128], index: 0, kind: input, shape index: {}]   ;;  %s11339_s1 = inlined_call_operand.hbm [shape: bf16[128,1024], index: 1, kind: input, shape index: {}]   ;;  %s11340_s2 = inlined_call_operand.hbm [shape: f32[1,1024], index: 2, kind: input, shape index: {}]   ;;  %s11341_s3 = inlined_call_operand.hbm [shape: bf16[1024,512], index: 3, kind: input, shape index: {}]   ;;  %s11342_s4 = inlined_call_operand.vmem [shape: f32[1,512], index: 4, kind: input, shape index: {}]   ;;  %s11343_s5 = inlined_call_operand.hbm [shape: bf16[512,512], index: 5, kind: input, shape index: {}]   ;;  %s11344_s6 = inlined_call_operand.vmem [shape: f32[1,512], index: 6, kind: input, shape index: {}]   ;;  %s11345_s7 = inlined_call_operand.hbm [shape: bf16[512,128], index: 7, kind: input, shape index: {}]   ;;  %s11346_s8 = inlined_call_operand.vmem [shape: f32[1,128], index: 8, kind: input, shape index: {}]   ;;  %s11347_s9 = inlined_call_operand.hbm [shape: bf16[128,512], index: 9, kind: input, shape index: {}]   ;;  %s11348_s10 = inlined_call_operand.vmem [shape: f32[1,512], index: 10, kind: input, shape index: {}]   ;;  %s11349_s11 = inlined_call_operand.hbm [shape: bf16[512,128], index: 11, kind: input, shape index: {}]   ;;  %s11350_s12 = inlined_call_operand.vmem [shape: f32[1,128], index: 12, kind: input, shape index: {}]   ;;  %s11351_s13 = inlined_call_operand.hbm [shape: bf16[256,128], index: 13, kind: output, shape index: {0}]   ;;  %s11352_s14 = inlined_call_operand.hbm [shape: bf16[256,128], index: 14, kind: output, shape index: {1}]  }
   0x1   :  { %11364 = sst [smem:[#allocation26_spill]] %s11339_s1 }
   0x2   :  { %11365 = sst [smem:[#allocation27_spill]] %s11341_s3 }
   0x3   :  { %11366 = sst [smem:[#allocation28_spill]] %s11344_s6 }
   0x4   :  { %11367 = sst [smem:[#allocation29_spill]] %s11346_s8 }
   0x5   :  { %11368 = sst [smem:[#allocation30_spill]] %s11348_s10 }
   0x6   :  { %11369 = sst [smem:[#allocation31_spill]] %s11350_s12 }
   0x7   :  { %11370 = sst [smem:[#allocation32_spill]] %s11351_s13 }
   0x8   :  { %11371 = sst [smem:[#allocation33_spill]] %s11352_s14 }
   0x9   :  { %20 = vsyncpa [#allocation3], 0 }
   0xa   :  { %22 = vsyncpa [#allocation3 + $0x1], 0 }
   0xb   :  { %23 = vsyncpa [#allocation6], 0 }
   0xc   :  { %24 = vsyncpa [#allocation9], 0 }
   0xd   :  { %25 = vsyncpa [#allocation12], 0 }
   0xe   :  { %26 = vsyncpa [#allocation15], 0 }
   0xf   :  { %27 = vsyncpa [#allocation4], 0 }
  0x10   :  { %29 = vsyncpa [#allocation4 + $0x1], 0 }
  0x11   :  { %30 = vsyncpa [#allocation18], 0 }
  0x12   :  { %32 = vsyncpa [#allocation18 + $0x1], 0  ;;  %s10098_s29 = smov 0   ;;  %s10100_s30 = smov 0  }
  0x13   :  { %s10102_s15 = smov 0   ;;  %s10104_s16 = smov 0  }
  0x14 LB: > { %s10004_s17 = smov [#allocation5]   ;;  %s10119_s19 = sadd.s32 4294967295, %s10002_s16   ;;  %s10002_s16 = sphi %s10104_s16, %s11406_s16   ;;  %s9998_s15 = sphi %s10102_s15, %s11405_s15   ;;  %s9994_s30 = sphi %s10100_s30, %s11404_s30   ;;  %s9990_s29 = sphi %s10098_s29, %s11403_s29  }
  0x15   : > { %s385_s18 = sshll.u32 %s10004_s17, 4  ;;  %p7449_p0 = scmp.ge.s32.totalorder %s10002_s16, 1  ;;  %s10124_s18 = int_to_ptr.vmem [resolvable:$true] %s385_s18 }
  0x16   : > { %p11355_p1 = scmp.eq.s32.totalorder %s10119_s19, 0  ;;  %p373_p2 = scmp.lt.s32.totalorder %s10002_s16, 3 }
  0x17   : > { %s10005_s21 = smov [#allocation8]   ;;  %s10006_s24 = smov [#allocation11]  }
  0x18   : > { %p10126_p3 = pnand %p7449_p0, %p373_p2  ;;  %s409_s22 = sshll.u32 %s10005_s21, 4  ;;  %s10139_s22 = int_to_ptr.vmem [resolvable:$true] %s409_s22 }
  0x19   : > { %s10141_s25 = sshll.u32 %s10006_s24, 4  ;;  %s11374_s1 = sld [smem:[#allocation26_spill]]  ;;  %s442_s25 = int_to_ptr.vmem [resolvable:$true] %s10141_s25 }
  0x1a   : > { %s11372_s20 = scalar_select %p10126_p3, 1, 0 }
  0x1b   : > { %p8869_p5 = pneg %p10126_p3 }
  0x1d   : > { %p10135_p6 = pnand %p8869_p5, %p11355_p1 }
  0x1f   : > { %s9662_s28 = scalar_lea.hbm %s11374_s1, 8192  ;;  %p10151_p8 = pneg %p10135_p6 }
  0x20   : > { %p9663_p7 = scmp.ne.s32.totalorder %s11374_s1, %s9662_s28  ;;  %p9669_p11 = scmp.lt.u32.totalorder %s9662_s28, %s11374_s1 }
  0x22   : > { %p9665_p9 = pnand %p10151_p8, %p9663_p7 }
  0x24   : > { %p9666_p10 = pneg %p9665_p9 }
  0x26   : > { %p9671_p12 = pnand %p9669_p11, %p9666_p10 }
  0x28   : > { %9674 = shalt.err (!%p9671_p12)
}
  0x29   : > { %s9675_s14 = scalar_lea.vmem %s10124_s18, 8192  ;;  %p9683_p5 = scmp.lt.s32.totalorder %s10124_s18, %s10124_s18 }
  0x2a   : > { %p9676_p13 = scmp.ne.s32.totalorder %s10124_s18, %s9675_s14  ;;  %p9684_p4 = scmp.lt.s32.totalorder %s9675_s14, %s9675_s14 }
  0x2c   : > { %p9678_p0 = pnand %p9676_p13, %p10151_p8  ;;  %p9685_p7 = por %p9684_p4, %p9683_p5 }
  0x2e   : > { %p9679_p2 = pneg %p9678_p0 }
  0x30   : > { %p9686_p9 = pnand %p9685_p7, %p9679_p2 }
  0x32   : > { %9689 = shalt.err (!%p9686_p9)
}
  0x33   : > { %s10007_s26 = smov 512   ;;  %s10008_s12 = smov 32  }
  0x34   : > { %8872 = dma.hbm_to_vmem [thread:$0]  (!%p10135_p6), %s11374_s1, 8192, %s10124_s18, [#allocation6], %s10007_s26, %s10007_s26, %s10008_s12  }
  0x35   : > { %s11376_s3 = sld [smem:[#allocation27_spill]] }
  0x3b   : > { %s9690_s13 = scalar_lea.hbm %s11376_s3, 32768 }
  0x3c   : > { %p9691_p4 = scmp.ne.s32.totalorder %s11376_s3, %s9690_s13  ;;  %p9697_p12 = scmp.lt.u32.totalorder %s9690_s13, %s11376_s3 }
  0x3e   : > { %p9693_p10 = pnand %p9691_p4, %p10151_p8 }
  0x40   : > { %p9694_p11 = pneg %p9693_p10 }
  0x42   : > { %p9699_p13 = pnand %p9697_p12, %p9694_p11 }
  0x44   : > { %9702 = shalt.err (!%p9699_p13)
}
  0x45   : > { %s9703_s18 = scalar_lea.vmem %s10139_s22, 32768  ;;  %p9711_p7 = scmp.lt.s32.totalorder %s10139_s22, %s10139_s22 }
  0x46   : > { %p9704_p0 = scmp.ne.s32.totalorder %s10139_s22, %s9703_s18  ;;  %p9712_p9 = scmp.lt.s32.totalorder %s9703_s18, %s9703_s18 }
  0x48   : > { %p9706_p2 = pnand %p9704_p0, %p10151_p8  ;;  %p9713_p4 = por %p9712_p9, %p9711_p7 }
  0x4a   : > { %p9707_p5 = pneg %p9706_p2 }
  0x4c   : > { %p9714_p10 = pnand %p9713_p4, %p9707_p5 }
  0x4e   : > { %9717 = shalt.err (!%p9714_p10)
}
  0x4f   : > { %s11357_s8 = smov 256   ;;  %s11359_s6 = smov 16  }
  0x50   : > { %8878 = dma.hbm_to_vmem [thread:$0]  (!%p10135_p6), %s11376_s3, 32768, %s10139_s22, [#allocation9], %s11357_s8, %s11357_s8, %s11359_s6  }
  0x51   : > { %s9718_s27 = scalar_lea.hbm %s11345_s7, 4096 }
  0x52   : > { %p9719_p11 = scmp.ne.s32.totalorder %s11345_s7, %s9718_s27  ;;  %p9725_p0 = scmp.lt.u32.totalorder %s9718_s27, %s11345_s7 }
  0x54   : > { %p9721_p12 = pnand %p9719_p11, %p10151_p8 }
  0x56   : > { %p9722_p13 = pneg %p9721_p12 }
  0x58   : > { %p9727_p2 = pnand %p9725_p0, %p9722_p13 }
  0x5a   : > { %9730 = shalt.err (!%p9727_p2)
}
  0x5b   : > { %s9731_s18 = scalar_lea.vmem %s442_s25, 4096  ;;  %p9739_p4 = scmp.lt.s32.totalorder %s442_s25, %s442_s25 }
  0x5c   : > { %p9732_p5 = scmp.ne.s32.totalorder %s442_s25, %s9731_s18  ;;  %p9740_p10 = scmp.lt.s32.totalorder %s9731_s18, %s9731_s18 }
  0x5e   : > { %p9734_p7 = pnand %p9732_p5, %p10151_p8  ;;  %p9741_p1 = por %p9740_p10, %p9739_p4 }
  0x60   : > { %p9735_p9 = pneg %p9734_p7 }
  0x62   : > { %p9742_p3 = pnand %p9741_p1, %p9735_p9 }
  0x64   : > { %9745 = shalt.err (!%p9742_p3)
}
  0x65   : > { %s11361_s22 = smov 64   ;;  %s10012_s10 = smov 4  }
  0x66   : > { %8884 = dma.hbm_to_vmem [thread:$0]  (!%p10135_p6), %s11345_s7, 4096, %s442_s25, [#allocation12], %s11361_s22, %s11361_s22, %s10012_s10  }
  0x67   : > { %s10013_s12 = smov [#allocation7]   ;;  %s10014_s28 = smov [#allocation10]  }
  0x68   : > { %s399_s27 = sshll.u32 %s10013_s12, 4  ;;  %s425_s17 = sshll.u32 %s10014_s28, 4  ;;  %s400_s27 = int_to_ptr.vmem [resolvable:$true] %s399_s27  ;;  %s426_s17 = int_to_ptr.vmem [resolvable:$true] %s425_s17 }
  0x69   : > { %s9746_s18 = scalar_lea.hbm %s11340_s2, 128 }
  0x6a   : > { %p9747_p1 = scmp.ne.s32.totalorder %s11340_s2, %s9746_s18  ;;  %p9753_p12 = scmp.lt.u32.totalorder %s9746_s18, %s11340_s2 }
  0x6c   : > { %p9749_p3 = pnand %p9747_p1, %p10151_p8 }
  0x6e   : > { %p9750_p11 = pneg %p9749_p3 }
  0x70   : > { %p9755_p13 = pnand %p9753_p12, %p9750_p11 }
  0x72   : > { %9758 = shalt.err (!%p9755_p13)
}
  0x73   : > { %s9759_s25 = scalar_lea.vmem %s400_s27, 128  ;;  %p9767_p7 = scmp.lt.s32.totalorder %s400_s27, %s400_s27 }
  0x74   : > { %p9760_p0 = scmp.ne.s32.totalorder %s400_s27, %s9759_s25  ;;  %p9768_p9 = scmp.lt.s32.totalorder %s9759_s25, %s9759_s25 }
  0x76   : > { %p9762_p2 = pnand %p9760_p0, %p10151_p8  ;;  %p9769_p4 = por %p9768_p9, %p9767_p7 }
  0x78   : > { %p9763_p5 = pneg %p9762_p2 }
  0x7a   : > { %p9770_p10 = pnand %p9769_p4, %p9763_p5 }
  0x7c   : > { %9773 = shalt.err (!%p9770_p10)
}
  0x7d   : > { %8875 = dma.hbm_to_vmem [thread:$0]  (!%p10135_p6), %s11340_s2, 128, %s400_s27, [#allocation6]  }
  0x7e   : > { %s9774_s13 = scalar_lea.hbm %s11343_s5, 16384 }
  0x7f   : > { %p9775_p1 = scmp.ne.s32.totalorder %s11343_s5, %s9774_s13  ;;  %p9781_p12 = scmp.lt.u32.totalorder %s9774_s13, %s11343_s5 }
  0x81   : > { %p9777_p3 = pnand %p9775_p1, %p10151_p8 }
  0x83   : > { %p9778_p11 = pneg %p9777_p3 }
  0x85   : > { %p9783_p13 = pnand %p9781_p12, %p9778_p11 }
  0x87   : > { %9786 = shalt.err (!%p9783_p13)
}
  0x88   : > { %s9787_s14 = scalar_lea.vmem %s426_s17, 16384  ;;  %p9795_p7 = scmp.lt.s32.totalorder %s426_s17, %s426_s17 }
  0x89   : > { %p9788_p0 = scmp.ne.s32.totalorder %s426_s17, %s9787_s14  ;;  %p9796_p9 = scmp.lt.s32.totalorder %s9787_s14, %s9787_s14 }
  0x8b   : > { %p9790_p2 = pnand %p9788_p0, %p10151_p8  ;;  %p9797_p4 = por %p9796_p9, %p9795_p7 }
  0x8d   : > { %p9791_p5 = pneg %p9790_p2 }
  0x8f   : > { %p9798_p10 = pnand %p9797_p4, %p9791_p5 }
  0x91   : > { %9801 = shalt.err (!%p9798_p10)
}
  0x92   : > { %s11377_s27 = smov 16   ;;  %s11378_s18 = smov 256  }
  0x93   : > { %8881 = dma.hbm_to_vmem [thread:$0]  (!%p10135_p6), %s11343_s5, 16384, %s426_s17, [#allocation9], %s11378_s18, %s11378_s18, %s11377_s27  }
  0x94   : > { %s10015_s6 = smov [#allocation13]   ;;  %s10016_s3 = smov [#allocation14]  }
  0x95   : > { %s457_s1 = sshll.u32 %s10015_s6, 4  ;;  %s473_s13 = sshll.u32 %s10016_s3, 4  ;;  %s458_s1 = int_to_ptr.vmem [resolvable:$true] %s457_s1  ;;  %s474_s13 = int_to_ptr.vmem [resolvable:$true] %s473_s13 }
  0x96   : > { %s9802_s28 = scalar_lea.hbm %s11347_s9, 4096 }
  0x97   : > { %p9803_p1 = scmp.ne.s32.totalorder %s11347_s9, %s9802_s28  ;;  %p9809_p12 = scmp.lt.u32.totalorder %s9802_s28, %s11347_s9 }
  0x99   : > { %p9805_p3 = pnand %p9803_p1, %p10151_p8 }
  0x9b   : > { %p9806_p11 = pneg %p9805_p3 }
  0x9d   : > { %p9811_p13 = pnand %p9809_p12, %p9806_p11 }
  0x9f   : > { %9814 = shalt.err (!%p9811_p13)
}
  0xa0   : > { %s9815_s17 = scalar_lea.vmem %s458_s1, 4096  ;;  %p9823_p7 = scmp.lt.s32.totalorder %s458_s1, %s458_s1 }
  0xa1   : > { %p9816_p0 = scmp.ne.s32.totalorder %s458_s1, %s9815_s17  ;;  %p9824_p9 = scmp.lt.s32.totalorder %s9815_s17, %s9815_s17 }
  0xa3   : > { %p9818_p2 = pnand %p9816_p0, %p10151_p8  ;;  %p9825_p4 = por %p9824_p9, %p9823_p7 }
  0xa5   : > { %p9819_p5 = pneg %p9818_p2 }
  0xa7   : > { %p9826_p10 = pnand %p9825_p4, %p9819_p5 }
  0xa9   : > { %9829 = shalt.err (!%p9826_p10)
}
  0xaa   : > { %8887 = dma.hbm_to_vmem [thread:$0]  (!%p10135_p6), %s11347_s9, 4096, %s458_s1, [#allocation12], %s11378_s18, %s11378_s18, %s11377_s27  }
  0xab   : > { %s9830_s26 = scalar_lea.hbm %s11349_s11, 4096 }
  0xac   : > { %p9831_p1 = scmp.ne.s32.totalorder %s11349_s11, %s9830_s26  ;;  %p9837_p12 = scmp.lt.u32.totalorder %s9830_s26, %s11349_s11 }
  0xae   : > { %p9833_p3 = pnand %p9831_p1, %p10151_p8 }
  0xb0   : > { %p9834_p11 = pneg %p9833_p3 }
  0xb2   : > { %p9839_p13 = pnand %p9837_p12, %p9834_p11 }
  0xb4   : > { %9842 = shalt.err (!%p9839_p13)
}
  0xb5   : > { %s9843_s25 = scalar_lea.vmem %s474_s13, 4096  ;;  %p9851_p7 = scmp.lt.s32.totalorder %s474_s13, %s474_s13 }
  0xb6   : > { %p9844_p0 = scmp.ne.s32.totalorder %s474_s13, %s9843_s25  ;;  %p9852_p9 = scmp.lt.s32.totalorder %s9843_s25, %s9843_s25 }
  0xb8   : > { %p9846_p2 = pnand %p9844_p0, %p10151_p8  ;;  %p9853_p4 = por %p9852_p9, %p9851_p7 }
  0xba   : > { %p9847_p5 = pneg %p9846_p2 }
  0xbc   : > { %p9854_p10 = pnand %p9853_p4, %p9847_p5 }
  0xbe   : > { %9857 = shalt.err (!%p9854_p10)
}
  0xbf   : > { %s11379_s27 = smov 64   ;;  %s7448_s23 = sadd.s32 4294967294, %s10002_s16  }
  0xc0   : > { %8890 = dma.hbm_to_vmem [thread:$0]  (!%p10135_p6), %s11349_s11, 4096, %s474_s13, [#allocation15], %s11379_s27, %s11379_s27, %s10012_s10  }
  0xc1   : > { %s10303_s21 = sadd.s32 1, %s10002_s16   ;;  %s45_s17 = sadd.s32 1, %s9998_s15 }
  0xc2   : > { %s42_s22 = ssub.s32 %s10002_s16, %s10303_s21  ;;  %p52_p8 = scmp.ne.s32.totalorder %s9998_s15, %s9994_s30 }
  0xc3   : > { %p43_p1 = scmp.eq.s32.totalorder %s42_s22, 0  ;;  %p53_p3 = scmp.eq.s32.totalorder %s10002_s16, 0 }
  0xc4   : > { %p58_p11 = scmp.ne.s32.totalorder %s9994_s30, %s9990_s29  ;;  %p334_p12 = scmp.eq.s32.totalorder %s10119_s19, 1 }
  0xc5   : > { %s10315_s8 = scalar_select %p43_p1, %s9998_s15, %s45_s17  }
  0xc6   : > { %p54_p13 = por %p53_p3, %p52_p8  ;;  %p11380_p0 = scmp.eq.s32.totalorder %s10119_s19, 0 }
  0xc7   : > { %p10323_p6 = por %p334_p12, %p52_p8  ;;  %p340_p5 = scmp.eq.s32.totalorder %s7448_s23, 1 }
  0xc8   : > { %p10319_p2 = por %p11380_p0, %p58_p11  ;;  %p8909_p7 = scmp.lt.s32.totalorder %s10002_s16, 2 }
  0xc9   : > { %s11382_s13 = scalar_select %p10323_p6, 1, 0 }
  0xca   : > { %s490_s3 = sand.u32 1, %s9998_s15   ;;  %p10329_p9 = por %p340_p5, %p58_p11 }
  0xcb   : > { %s7458_s12 = sshll.u32 %s490_s3, 6  ;;  %s8066_s28 = sshll.u32 %s10002_s16, 10 }
  0xcc   : > { %s11383_s26 = scalar_select %p10329_p9, 1, 0 }
  0xcd   : > { %s10337_s25 = scalar_lea.hbm %s11338_s0, %s8066_s28  ;;  %s494_s18 = scalar_lea.vmem [#allocation2], %s7458_s12 }
  0xce   : > { %s501_s1 = sshll.u32 %s494_s18, 4  ;;  %p10339_p4 = pnand %p8909_p7, %p54_p13  ;;  %s10343_s1 = int_to_ptr.vmem [resolvable:$true] %s501_s1 }
  0xcf   : > { %s10345_s17 = scalar_lea.sflag [#allocation3], %s490_s3  ;;  %s9858_s22 = scalar_lea.hbm %s10337_s25, 1024 }
  0xd0   : > { %p9859_p10 = scmp.ne.s32.totalorder %s10337_s25, %s9858_s22  ;;  %p9860_p8 = pneg %p10339_p4 }
  0xd1   : > { %s9863_s24 = scalar_lea.hbm %s11338_s0, 2048  ;;  %p9864_p11 = scmp.lt.u32.totalorder %s10337_s25, %s11338_s0 }
  0xd2   : > { %p9861_p1 = pnand %p9860_p8, %p9859_p10  ;;  %p9865_p12 = scmp.lt.u32.totalorder %s9863_s24, %s9858_s22 }
  0xd3   : > { %p9867_p0 = scmp.lt.u32.totalorder %s9858_s22, %s10337_s25 }
  0xd4   : > { %p9862_p3 = pneg %p9861_p1  ;;  %p9866_p13 = por %p9865_p12, %p9864_p11 }
  0xd6   : > { %p9868_p5 = por %p9867_p0, %p9866_p13 }
  0xd8   : > { %p9869_p7 = pnand %p9868_p5, %p9862_p3 }
  0xda   : > { %9872 = shalt.err (!%p9869_p7)
}
  0xdb   : > { %s9873_s3 = scalar_lea.vmem %s10343_s1, 1024  ;;  %s10017_s12 = smov [#allocation2]  }
  0xdc   : > { %p9874_p10 = scmp.ne.s32.totalorder %s10343_s1, %s9873_s3  ;;  %s9878_s28 = sshll.u32 %s10017_s12, 4  ;;  %s9879_s28 = int_to_ptr.vmem [resolvable:$false] %s9878_s28 }
  0xdd   : > { %s9880_s14 = scalar_lea.vmem %s9879_s28, 2048  ;;  %p9881_p6 = scmp.lt.s32.totalorder %s10343_s1, %s9879_s28 }
  0xde   : > { %p9876_p1 = pnand %p9874_p10, %p9860_p8  ;;  %p9882_p11 = scmp.lt.s32.totalorder %s9880_s14, %s9873_s3 }
  0xe0   : > { %p9877_p9 = pneg %p9876_p1  ;;  %p9883_p12 = por %p9882_p11, %p9881_p6 }
  0xe2   : > { %p9884_p13 = pnand %p9883_p12, %p9877_p9 }
  0xe4   : > { %9887 = shalt.err (!%p9884_p13)
}
  0xe5   : > { %8894 = dma.hbm_to_vmem [thread:$0]  (!%p10339_p4), %s10337_s25, 1024, %s10343_s1, %s10345_s17, %s11379_s27, %s11379_s27, %s10012_s10  }
  0xe6   : > { %p11385_p8 = scmp.ne.s32.totalorder %s11372_s20, 0 }
  0xe7   : > { %s10379_s22 = sand.u32 (!%p11385_p8), 1, %s9994_s30  }
  0xe8   : > { %513 = sbr.rel (%p11385_p8) target bundleno = 1949 (0x79d), region = 72  ;;  %s10382_s24 = sshll.u32 (!%p11385_p8), %s10379_s22, 6 }
  0xe9   : > { %s516_s23 = scalar_lea.sflag (!%p11385_p8), [#allocation3], %s10379_s22  ;;  %s10386_s18 = scalar_lea.vmem (!%p11385_p8), [#allocation2], %s10382_s24 }
  0xef   : > { %9961 = dma.done.wait (%p10319_p2), %s516_s23, 1024  }
  0xf0   : > { %9963 = vsyncadd (%p10319_p2), %s516_s23, 4294966272  ;;  %p11386_p6 = scmp.eq.s32.totalorder %s10119_s19, 0 }
  0xf2   : > { %9965 = dma.done.wait (%p11386_p6), [#allocation6], 8320   ;;  %p11387_p9 = pmov %p11386_p6 }
  0xf3   : > { %p11388_p4 = pmov %p11386_p6 }
  0xf4   : > { %9967 = vsyncadd (%p11387_p9), [#allocation6], 4294958976 }
  0xf5   : > { %9969 = dma.done.wait (%p11388_p4), [#allocation9], 49152   ;;  %p11389_p3 = pmov %p11388_p4 }
  0xf7   : > { %9971 = vsyncadd (%p11389_p3), [#allocation9], 4294918144  ;;  %p11390_p0 = pmov %p11389_p3 }
  0xf9   : > { %9973 = dma.done.wait (%p11390_p0), [#allocation12], 8192   ;;  %p11391_p5 = pmov %p11390_p0 }
  0xfa   : > { %p11392_p2 = pmov %p11390_p0 }
  0xfb   : > { %9975 = vsyncadd (%p11391_p5), [#allocation12], 4294959104 }
  0xfc   : > { %9977 = dma.done.wait (%p11392_p2), [#allocation15], 4096   ;;  %p11393_p7 = pmov %p11390_p0 }
  0xfd   : > { %v10018_v0 = vmov 0   ;;  %v617_v1 = vld [vmem:[#allocation5] sm:$0xff]  ;;  %v618_v17 = vld [vmem:[#allocation5 + $0x8] sm:$0xff]  ;;  %v619_v55 = vld [vmem:[#allocation5 + $0x10] sm:$0xff]  ;;  %s11394_s25 = sld [smem:[#allocation28_spill]]  ;;  %s11395_s3 = sld [smem:[#allocation29_spill]] }
  0xfe   : > { %9979 = vsyncadd (%p11393_p7), [#allocation15], 4294963200  ;;  %1123 = vmatprep.mubr.bf16.mxu0 %v10018_v0  ;;  %1236 = vmatprep.mubr.bf16.mxu1 %v10018_v0  ;;  %v621_v2 = vld [vmem:[#allocation5 + $0x20] sm:$0xff]  ;;  %v622_v18 = vld [vmem:[#allocation5 + $0x28] sm:$0xff]  ;;  %s11096_s12 = scalar_lea.vmem [#allocation16], %s10382_s24  ;;  %s11396_s23 = sld [smem:[#allocation30_spill]] }
  0xff   : > { %v625_v3 = vld [vmem:[#allocation5 + $0x40] sm:$0xff]  ;;  %v7481_v4 = vcombine.high %v617_v1, %v621_v2  ;;  %v7480_v5 = vcombine.low %v617_v1, %v621_v2  ;;  %v7483_v20 = vcombine.high %v618_v17, %v622_v18  ;;  %v7482_v21 = vcombine.low %v618_v17, %v622_v18  ;;  %v626_v22 = vld [vmem:[#allocation5 + $0x48] sm:$0xff]  ;;  %v623_v56 = vld [vmem:[#allocation5 + $0x30] sm:$0xff]  ;;  %s11397_s27 = sld [smem:[#allocation32_spill]]  ;;  %s7242_s1 = scalar_lea.sflag [#allocation4], %s10379_s22 }
 0x100   : > { %v629_v6 = vld [vmem:[#allocation5 + $0x60] sm:$0xff]  ;;  %v630_v23 = vld [vmem:[#allocation5 + $0x68] sm:$0xff]  ;;  %v7485_v62 = vcombine.high %v619_v55, %v623_v56  ;;  %v627_v1 = vld [vmem:[#allocation5 + $0x50] sm:$0xff]  ;;  %p11398_p1 = scmp.ne.s32.totalorder %s11382_s13, 0 }
 0x101   : > { %v7489_v7 = vcombine.high %v625_v3, %v629_v6  ;;  %v633_v8 = vld [vmem:[#allocation5 + $0x80] sm:$0xff]  ;;  %1091 = vmatprep.subr.bf16.mxu0 %v7481_v4  ;;  %v7488_v10 = vcombine.low %v625_v3, %v629_v6  ;;  %v634_v24 = vld [vmem:[#allocation5 + $0x88] sm:$0xff]  ;;  %1204 = vmatprep.subr.bf16.mxu1 %v7483_v20  ;;  %v7491_v26 = vcombine.high %v626_v22, %v630_v23  ;;  %v631_v2 = vld [vmem:[#allocation5 + $0x70] sm:$0xff] }
 0x102   : > { %v637_v9 = vld [vmem:[#allocation5 + $0xa0] sm:$0xff]  ;;  %1092 = vmatpush1.bf16.msra.mxu0 %v7480_v5  ;;  %v638_v27 = vld [vmem:[#allocation5 + $0xa8] sm:$0xff]  ;;  %1205 = vmatpush1.bf16.msra.mxu1 %v7482_v21  ;;  %v7490_v29 = vcombine.low %v626_v22, %v630_v23  ;;  %v7484_v5 = vcombine.low %v619_v55, %v623_v56  ;;  %v643_v17 = vld [vmem:[#allocation5 + $0xd0] sm:$0xff] }
 0x103   : > { %1093 = vmatprep.subr.bf16.mxu0 %v7489_v7  ;;  %v7497_v11 = vcombine.high %v633_v8, %v637_v9  ;;  %v641_v12 = vld [vmem:[#allocation5 + $0xc0] sm:$0xff]  ;;  %v7496_v14 = vcombine.low %v633_v8, %v637_v9  ;;  %1206 = vmatprep.subr.bf16.mxu1 %v7491_v26  ;;  %v7499_v32 = vcombine.high %v634_v24, %v638_v27  ;;  %v642_v33 = vld [vmem:[#allocation5 + $0xc8] sm:$0xff]  ;;  %v635_v9 = vld [vmem:[#allocation5 + $0x90] sm:$0xff] }
 0x104   : > { %v645_v13 = vld [vmem:[#allocation5 + $0xe0] sm:$0xff]  ;;  %v646_v34 = vld [vmem:[#allocation5 + $0xe8] sm:$0xff]  ;;  %v7498_v37 = vcombine.low %v634_v24, %v638_v27  ;;  %v7493_v7 = vcombine.high %v627_v1, %v631_v2  ;;  %v628_v20 = vld [vmem:[#allocation5 + $0x58] sm:$0xff] }
 0x105   : > { %v7505_v15 = vcombine.high %v641_v12, %v645_v13  ;;  %v649_v16 = vld [vmem:[#allocation5 + $0x100] sm:$0xff]  ;;  %v7504_v25 = vcombine.low %v641_v12, %v645_v13  ;;  %v7507_v40 = vcombine.high %v642_v33, %v646_v34  ;;  %v650_v41 = vld [vmem:[#allocation5 + $0x108] sm:$0xff]  ;;  %v7506_v45 = vcombine.low %v642_v33, %v646_v34  ;;  %v624_v12 = vld [vmem:[#allocation5 + $0x38] sm:$0xff] }
 0x106   : > { %1094 = vmatpush1.bf16.msra.mxu0 %v7488_v10  ;;  %v653_v19 = vld [vmem:[#allocation5 + $0x120] sm:$0xff]  ;;  %1207 = vmatpush1.bf16.msra.mxu1 %v7490_v29  ;;  %v654_v42 = vld [vmem:[#allocation5 + $0x128] sm:$0xff]  ;;  %v639_v10 = vld [vmem:[#allocation5 + $0xb0] sm:$0xff]  ;;  %v7492_v13 = vcombine.low %v627_v1, %v631_v2 }
 0x107   : > { %1095 = vmatprep.subr.bf16.mxu0 %v7497_v11  ;;  %v7513_v28 = vcombine.high %v649_v16, %v653_v19  ;;  %v657_v30 = vld [vmem:[#allocation5 + $0x140] sm:$0xff]  ;;  %v7512_v35 = vcombine.low %v649_v16, %v653_v19  ;;  %1208 = vmatprep.subr.bf16.mxu1 %v7499_v32  ;;  %v7515_v48 = vcombine.high %v650_v41, %v654_v42  ;;  %v658_v49 = vld [vmem:[#allocation5 + $0x148] sm:$0xff]  ;;  %v620_v11 = vld [vmem:[#allocation5 + $0x18] sm:$0xff] }
 0x108   : > { %v661_v31 = vld [vmem:[#allocation5 + $0x160] sm:$0xff]  ;;  %v662_v50 = vld [vmem:[#allocation5 + $0x168] sm:$0xff]  ;;  %v7514_v53 = vcombine.low %v650_v41, %v654_v42  ;;  %v7487_v18 = vcombine.high %v620_v11, %v624_v12  ;;  %v647_v19 = vld [vmem:[#allocation5 + $0xf0] sm:$0xff]  ;;  %v7500_v22 = vcombine.low %v635_v9, %v639_v10 }
 0x109   : > { %v7521_v36 = vcombine.high %v657_v30, %v661_v31  ;;  %v665_v38 = vld [vmem:[#allocation5 + $0x180] sm:$0xff]  ;;  %v7520_v43 = vcombine.low %v657_v30, %v661_v31  ;;  %v7523_v54 = vcombine.high %v658_v49, %v662_v50  ;;  %v666_v57 = vld [vmem:[#allocation5 + $0x188] sm:$0xff]  ;;  %v7522_v61 = vcombine.low %v658_v49, %v662_v50  ;;  %v632_v21 = vld [vmem:[#allocation5 + $0x78] sm:$0xff] }
 0x10a   : > { %1096 = vmatpush1.bf16.msra.mxu0 %v7496_v14  ;;  %v669_v39 = vld [vmem:[#allocation5 + $0x1a0] sm:$0xff]  ;;  %1209 = vmatpush1.bf16.msra.mxu1 %v7498_v37  ;;  %v670_v58 = vld [vmem:[#allocation5 + $0x1a8] sm:$0xff]  ;;  %v7509_v23 = vcombine.high %v643_v17, %v647_v19  ;;  %v651_v24 = vld [vmem:[#allocation5 + $0x110] sm:$0xff]  ;;  %v7495_v27 = vcombine.high %v628_v20, %v632_v21  ;;  %v7508_v30 = vcombine.low %v643_v17, %v647_v19 }
 0x10b   : > { %1097 = vmatprep.subr.bf16.mxu0 %v7505_v15  ;;  %v7529_v44 = vcombine.high %v665_v38, %v669_v39  ;;  %v673_v46 = vld [vmem:[#allocation5 + $0x1c0] sm:$0xff]  ;;  %1210 = vmatprep.subr.bf16.mxu1 %v7507_v40  ;;  %v7528_v51 = vcombine.low %v665_v38, %v669_v39  ;;  %v7531_v63 = vcombine.high %v666_v57, %v670_v58  ;;  %v674_v3 = vld [vmem:[#allocation5 + $0x1c8] sm:$0xff]  ;;  %v655_v26 = vld [vmem:[#allocation5 + $0x130] sm:$0xff] }
 0x10c   : > { %v677_v47 = vld [vmem:[#allocation5 + $0x1e0] sm:$0xff]  ;;  %v678_v4 = vld [vmem:[#allocation5 + $0x1e8] sm:$0xff]  ;;  %v7530_v6 = vcombine.low %v666_v57, %v670_v58  ;;  %v7501_v15 = vcombine.high %v635_v9, %v639_v10  ;;  %v640_v29 = vld [vmem:[#allocation5 + $0xb8] sm:$0xff]  ;;  %v7517_v32 = vcombine.high %v651_v24, %v655_v26  ;;  %v7494_v34 = vcombine.low %v628_v20, %v632_v21 }
 0x10d   : > { %v7537_v52 = vcombine.high %v673_v46, %v677_v47  ;;  %v7536_v59 = vcombine.low %v673_v46, %v677_v47  ;;  %v10411_v60 = vld [vmem:[%s10386_s18] sm:$0xff]   ;;  %v7539_v8 = vcombine.high %v674_v3, %v678_v4  ;;  %v7538_v14 = vcombine.low %v674_v3, %v678_v4  ;;  %v10416_v16 = vld [vmem:[%s10386_s18 + $0x8] sm:$0xff]   ;;  %v10423_v31 = vld [vmem:[%s10386_s18 + $0x10] sm:$0xff]  }
 0x10e   : > { %1098 = vmatpush1.bf16.msra.mxu0 %v7504_v25  ;;  %1211 = vmatpush1.bf16.msra.mxu1 %v7506_v45  ;;  %v7486_v25 = vcombine.low %v620_v11, %v624_v12  ;;  %v659_v33 = vld [vmem:[#allocation5 + $0x150] sm:$0xff]  ;;  %v644_v37 = vld [vmem:[#allocation5 + $0xd8] sm:$0xff]  ;;  %v7516_v39 = vcombine.low %v651_v24, %v655_v26  ;;  %v10437_v3 = vld [vmem:[%s10386_s18 + $0x20] sm:$0xff]  }
 0x10f   : > { %1099 = vmatprep.subr.bf16.mxu0 %v7513_v28  ;;  %1212 = vmatprep.subr.bf16.mxu1 %v7515_v48  ;;  %v636_v28 = vld [vmem:[#allocation5 + $0x98] sm:$0xff]  ;;  %v667_v41 = vld [vmem:[#allocation5 + $0x190] sm:$0xff]  ;;  %v10443_v9 = vld [vmem:[%s10386_s18 + $0x28] sm:$0xff]  }
 0x110   : > { %v648_v38 = vld [vmem:[#allocation5 + $0xf8] sm:$0xff]  ;;  %v7502_v42 = vcombine.low %v636_v28, %v640_v29  ;;  %v675_v50 = vld [vmem:[#allocation5 + $0x1d0] sm:$0xff] }
 0x111   : > { %v652_v45 = vld [vmem:[#allocation5 + $0x118] sm:$0xff]  ;;  %v8979_v10 = vld [vmem:[#allocation8 + $0xc] ss:$16 sps:$4 sm:$0xff]   ;;  %v8977_v19 = vld [vmem:[#allocation8 + $0x8] ss:$16 sps:$4 sm:$0xff]  }
 0x112   : > { %1100 = vmatpush1.bf16.msra.mxu0 %v7512_v35  ;;  %1213 = vmatpush1.bf16.msra.mxu1 %v7514_v53  ;;  %v663_v35 = vld [vmem:[#allocation5 + $0x170] sm:$0xff]  ;;  %v656_v46 = vld [vmem:[#allocation5 + $0x138] sm:$0xff] }
 0x113   : > { %1101 = vmatprep.subr.bf16.mxu0 %v7521_v36  ;;  %1214 = vmatprep.subr.bf16.mxu1 %v7523_v54  ;;  %v7503_v36 = vcombine.high %v636_v28, %v640_v29  ;;  %v7525_v40 = vcombine.high %v659_v33, %v663_v35  ;;  %v7524_v47 = vcombine.low %v659_v33, %v663_v35  ;;  %v10430_v48 = vld [vmem:[%s10386_s18 + $0x18] sm:$0xff]   ;;  %v10450_v12 = vld [vmem:[%s10386_s18 + $0x30] sm:$0xff]  }
 0x114   : > { %v7519_v53 = vcombine.high %v652_v45, %v656_v46  ;;  %v660_v54 = vld [vmem:[#allocation5 + $0x158] sm:$0xff]  ;;  %v7518_v58 = vcombine.low %v652_v45, %v656_v46  ;;  %v8985_v20 = vld [vmem:[#allocation8 + $0x2c] ss:$16 sps:$4 sm:$0xff]   ;;  %v9019_v45 = vld [vmem:[#allocation8 + $0xe8] ss:$16 sps:$4 sm:$0xff]  }
 0x115   : > { %v664_v55 = vld [vmem:[#allocation5 + $0x178] sm:$0xff]  ;;  %v8991_v24 = vld [vmem:[#allocation8 + $0x4c] ss:$16 sps:$4 sm:$0xff]  }
 0x116   : > { %1102 = vmatpush1.bf16.msra.mxu0 %v7520_v43  ;;  %1215 = vmatpush1.bf16.msra.mxu1 %v7522_v61  ;;  %v671_v43 = vld [vmem:[#allocation5 + $0x1b0] sm:$0xff]  ;;  %v668_v61 = vld [vmem:[#allocation5 + $0x198] sm:$0xff]  ;;  %v7526_v1 = vcombine.low %v660_v54, %v664_v55 }
 0x117   : > { %1103 = vmatprep.subr.bf16.mxu0 %v7529_v44  ;;  %1216 = vmatprep.subr.bf16.mxu1 %v7531_v63  ;;  %v7511_v44 = vcombine.high %v644_v37, %v648_v38  ;;  %v7533_v49 = vcombine.high %v667_v41, %v671_v43  ;;  %v7532_v56 = vcombine.low %v667_v41, %v671_v43  ;;  %v8976_v2 = vld [vmem:[#allocation8 + $0x4] ss:$16 sps:$4 sm:$0xff]   ;;  %v8980_v17 = vld [vmem:[#allocation8 + $0x20] ss:$16 sps:$4 sm:$0xff]   ;;  %v8997_v28 = vld [vmem:[#allocation8 + $0x6c] ss:$16 sps:$4 sm:$0xff]  }
 0x118   : > { %v8986_v21 = vld [vmem:[#allocation8 + $0x40] ss:$16 sps:$4 sm:$0xff]   ;;  %v9000_v26 = vld [vmem:[#allocation8 + $0x84] ss:$16 sps:$4 sm:$0xff]   ;;  %v9013_v41 = vld [vmem:[#allocation8 + $0xc8] ss:$16 sps:$4 sm:$0xff]  }
 0x119   : > { %v8998_v29 = vld [vmem:[#allocation8 + $0x80] ss:$16 sps:$4 sm:$0xff]   ;;  %v9012_v35 = vld [vmem:[#allocation8 + $0xc4] ss:$16 sps:$4 sm:$0xff]   ;;  %v9021_v43 = vld [vmem:[#allocation8 + $0xec] ss:$16 sps:$4 sm:$0xff]  }
 0x11a   : > { %1104 = vmatpush1.bf16.msra.mxu0 %v7528_v51  ;;  %1217 = vmatpush1.bf16.msra.mxu1 %v7530_v6  ;;  %v7510_v51 = vcombine.low %v644_v37, %v648_v38  ;;  %v680_v6 = vld [vmem:[#allocation5 + $0x1f8] sm:$0xff]  ;;  %v9007_v38 = vld [vmem:[#allocation8 + $0xa8] ss:$16 sps:$4 sm:$0xff]   ;;  %v9027_v46 = vld [vmem:[#allocation8 + $0x10c] ss:$16 sps:$4 sm:$0xff]  }
 0x11b   : > { %1105 = vmatprep.subr.bf16.mxu0 %v7537_v52  ;;  %1218 = vmatprep.subr.bf16.mxu1 %v7539_v8  ;;  %v679_v52 = vld [vmem:[#allocation5 + $0x1f0] sm:$0xff]  ;;  %v9004_v33 = vld [vmem:[#allocation8 + $0xa0] ss:$16 sps:$4 sm:$0xff]  }
 0x11c   : > { %v7541_v57 = vcombine.high %v675_v50, %v679_v52  ;;  %v7540_v63 = vcombine.low %v675_v50, %v679_v52  ;;  %v9010_v37 = vld [vmem:[#allocation8 + $0xc0] ss:$16 sps:$4 sm:$0xff]   ;;  %v9036_v50 = vld [vmem:[#allocation8 + $0x144] ss:$16 sps:$4 sm:$0xff]  }
 0x11d   : > { %v9034_v52 = vld [vmem:[#allocation8 + $0x140] ss:$16 sps:$4 sm:$0xff]  }
 0x11e   : > { %1106 = vmatpush1.bf16.msra.mxu0 %v7536_v59  ;;  %1219 = vmatpush1.bf16.msra.mxu1 %v7538_v14  ;;  %v7527_v59 = vcombine.high %v660_v54, %v664_v55  ;;  %v8974_v14 = vld [vmem:[#allocation8] ss:$16 sps:$4 sm:$0xff]   ;;  %v9039_v54 = vld [vmem:[#allocation8 + $0x14c] ss:$16 sps:$4 sm:$0xff]  }
 0x11f   : > { %1317 = vmatprep.subr.bf16.mxu0 %v7485_v62  ;;  %1430 = vmatprep.subr.bf16.mxu1 %v7487_v18  ;;  %v672_v62 = vld [vmem:[#allocation5 + $0x1b8] sm:$0xff] }
 0x120   : > { %v7535_v4 = vcombine.high %v668_v61, %v672_v62  ;;  %v8988_v18 = vld [vmem:[#allocation8 + $0x44] ss:$16 sps:$4 sm:$0xff]   ;;  %v9040_v55 = vld [vmem:[#allocation8 + $0x160] ss:$16 sps:$4 sm:$0xff]  }
 0x121   : > { %1124 = vmatmul.mubr.bf16.vlgmr.msra.gmra.mrb[0].mxu0 %v10411_v60  ;;  %1237 = vmatmul.mubr.bf16.vlgmr.msra.gmra.mrb[0].mxu1 %v10411_v60 }
 0x122   : > { %1133 = vmatprep.mubr.bf16.mxu0 %v10018_v0  ;;  %1318 = vmatpush1.bf16.msra.mxu0 %v7484_v5  ;;  %v676_v5 = vld [vmem:[#allocation5 + $0x1d8] sm:$0xff] }
 0x123   : > { %1319 = vmatprep.subr.bf16.mxu0 %v7493_v7  ;;  %1246 = vmatprep.mubr.bf16.mxu1 %v10018_v0  ;;  %v7534_v7 = vcombine.low %v668_v61, %v672_v62  ;;  %v7543_v8 = vcombine.high %v676_v5, %v680_v6  ;;  %v7542_v11 = vcombine.low %v676_v5, %v680_v6  ;;  %v9043_v61 = vld [vmem:[#allocation8 + $0x168] ss:$16 sps:$4 sm:$0xff]   ;;  %v9054_v62 = vld [vmem:[#allocation8 + $0x1a4] ss:$16 sps:$4 sm:$0xff]   ;;  %v9058_v5 = vld [vmem:[#allocation8 + $0x1c0] ss:$16 sps:$4 sm:$0xff]  }
 0x124   : > { %1431 = vmatpush1.bf16.msra.mxu1 %v7486_v25  ;;  %v8992_v25 = vld [vmem:[#allocation8 + $0x60] ss:$16 sps:$4 sm:$0xff]   ;;  %v9055_v6 = vld [vmem:[#allocation8 + $0x1a8] ss:$16 sps:$4 sm:$0xff]  }
 0x125   : > { %1432 = vmatprep.subr.bf16.mxu1 %v7495_v27  ;;  %v8989_v27 = vld [vmem:[#allocation8 + $0x48] ss:$16 sps:$4 sm:$0xff]  }
 0x126   : > { %1320 = vmatpush1.bf16.msra.mxu0 %v7492_v13  ;;  %v10457_v13 = vld [vmem:[%s10386_s18 + $0x38] sm:$0xff]   ;;  %s8099_s18 = sshll.u32 %s10119_s19, 10 }
 0x127   : > { %1321 = vmatprep.subr.bf16.mxu0 %v7501_v15  ;;  %v8982_v15 = vld [vmem:[#allocation8 + $0x24] ss:$16 sps:$4 sm:$0xff]   ;;  %s11219_s6 = scalar_lea.hbm %s11397_s27, %s8099_s18 }
 0x128   : > { %1433 = vmatpush1.bf16.msra.mxu1 %v7494_v34  ;;  %v9001_v34 = vld [vmem:[#allocation8 + $0x88] ss:$16 sps:$4 sm:$0xff]  }
 0x129   : > { %1134 = vmatmul.mubr.bf16.gmra.mrb[4].mxu0 %v10416_v16  ;;  %1434 = vmatprep.subr.bf16.mxu1 %v7503_v36  ;;  %v9009_v36 = vld [vmem:[#allocation8 + $0xac] ss:$16 sps:$4 sm:$0xff]  }
 0x12a   : > { %1143 = vmatprep.mubr.bf16.mxu0 %v10018_v0  ;;  %1322 = vmatpush1.bf16.msra.mxu0 %v7500_v22  ;;  %v8994_v22 = vld [vmem:[#allocation8 + $0x64] ss:$16 sps:$4 sm:$0xff]  }
 0x12b   : > { %1323 = vmatprep.subr.bf16.mxu0 %v7509_v23  ;;  %1247 = vmatmul.mubr.bf16.gmra.mrb[4].mxu1 %v10416_v16  ;;  %v8983_v23 = vld [vmem:[#allocation8 + $0x28] ss:$16 sps:$4 sm:$0xff]  }
 0x12c   : > { %1256 = vmatprep.mubr.bf16.mxu1 %v10018_v0  ;;  %1435 = vmatpush1.bf16.msra.mxu1 %v7502_v42  ;;  %v9024_v42 = vld [vmem:[#allocation8 + $0x104] ss:$16 sps:$4 sm:$0xff]  }
 0x12d   : > { %1436 = vmatprep.subr.bf16.mxu1 %v7511_v44  ;;  %v9022_v44 = vld [vmem:[#allocation8 + $0x100] ss:$16 sps:$4 sm:$0xff]  }
 0x12e   : > { %1324 = vmatpush1.bf16.msra.mxu0 %v7508_v30  ;;  %v9006_v30 = vld [vmem:[#allocation8 + $0xa4] ss:$16 sps:$4 sm:$0xff]  }
 0x12f   : > { %1325 = vmatprep.subr.bf16.mxu0 %v7517_v32  ;;  %v8995_v32 = vld [vmem:[#allocation8 + $0x68] ss:$16 sps:$4 sm:$0xff]  }
 0x130   : > { %1437 = vmatpush1.bf16.msra.mxu1 %v7510_v51  ;;  %v9033_v51 = vld [vmem:[#allocation8 + $0x12c] ss:$16 sps:$4 sm:$0xff]  }
 0x131   : > { %1144 = vmatmul.mubr.bf16.gmra.mrb[8].mxu0 %v10423_v31  ;;  %1438 = vmatprep.subr.bf16.mxu1 %v7519_v53  ;;  %v9031_v53 = vld [vmem:[#allocation8 + $0x128] ss:$16 sps:$4 sm:$0xff]  }
 0x132   : > { %1153 = vmatprep.mubr.bf16.mxu0 %v10018_v0  ;;  %1326 = vmatpush1.bf16.msra.mxu0 %v7516_v39  ;;  %v9015_v39 = vld [vmem:[#allocation8 + $0xcc] ss:$16 sps:$4 sm:$0xff]  }
 0x133   : > { %1327 = vmatprep.subr.bf16.mxu0 %v7525_v40  ;;  %1257 = vmatmul.mubr.bf16.gmra.mrb[8].mxu1 %v10423_v31  ;;  %v9016_v40 = vld [vmem:[#allocation8 + $0xe0] ss:$16 sps:$4 sm:$0xff]  }
 0x134   : > { %1266 = vmatprep.mubr.bf16.mxu1 %v10018_v0  ;;  %1439 = vmatpush1.bf16.msra.mxu1 %v7518_v58  ;;  %v9045_v58 = vld [vmem:[#allocation8 + $0x16c] ss:$16 sps:$4 sm:$0xff]  }
 0x135   : > { %1440 = vmatprep.subr.bf16.mxu1 %v7527_v59  ;;  %v9046_v59 = vld [vmem:[#allocation8 + $0x180] ss:$16 sps:$4 sm:$0xff]  }
 0x136   : > { %1328 = vmatpush1.bf16.msra.mxu0 %v7524_v47  ;;  %v9028_v47 = vld [vmem:[#allocation8 + $0x120] ss:$16 sps:$4 sm:$0xff]  }
 0x137   : > { %1329 = vmatprep.subr.bf16.mxu0 %v7533_v49  ;;  %v9025_v49 = vld [vmem:[#allocation8 + $0x108] ss:$16 sps:$4 sm:$0xff]  }
 0x138   : > { %1441 = vmatpush1.bf16.msra.mxu1 %v7526_v1  ;;  %v9052_v1 = vld [vmem:[#allocation8 + $0x1a0] ss:$16 sps:$4 sm:$0xff]  }
 0x139   : > { %1154 = vmatmul.mubr.bf16.gmra.mrb[12].mxu0 %v10430_v48  ;;  %1442 = vmatprep.subr.bf16.mxu1 %v7535_v4  ;;  %v9057_v4 = vld [vmem:[#allocation8 + $0x1ac] ss:$16 sps:$4 sm:$0xff]  }
 0x13a   : > { %1163 = vmatprep.mubr.bf16.mxu0 %v10018_v0  ;;  %1330 = vmatpush1.bf16.msra.mxu0 %v7532_v56  ;;  %v9037_v56 = vld [vmem:[#allocation8 + $0x148] ss:$16 sps:$4 sm:$0xff]  }
 0x13b   : > { %1331 = vmatprep.subr.bf16.mxu0 %v7541_v57  ;;  %1267 = vmatmul.mubr.bf16.gmra.mrb[12].mxu1 %v10430_v48  ;;  %v9048_v57 = vld [vmem:[#allocation8 + $0x184] ss:$16 sps:$4 sm:$0xff]  }
 0x13c   : > { %1276 = vmatprep.mubr.bf16.mxu1 %v10018_v0  ;;  %1443 = vmatpush1.bf16.msra.mxu1 %v7534_v7  ;;  %v9066_v7 = vld [vmem:[#allocation8 + $0x1e4] ss:$16 sps:$4 sm:$0xff]  }
 0x13d   : > { %1444 = vmatprep.subr.bf16.mxu1 %v7543_v8  ;;  %v9063_v8 = vld [vmem:[#allocation8 + $0x1cc] ss:$16 sps:$4 sm:$0xff]  }
 0x13e   : > { %1332 = vmatpush1.bf16.msra.mxu0 %v7540_v63  ;;  %v9051_v63 = vld [vmem:[#allocation8 + $0x18c] ss:$16 sps:$4 sm:$0xff]  }
 0x13f   : > { %3293 = vmatprep.subr.bf16.mxu0 %v8976_v2  ;;  %v9049_v2 = vld [vmem:[#allocation8 + $0x188] ss:$16 sps:$4 sm:$0xff]  }
 0x140   : > { %1445 = vmatpush1.bf16.msra.mxu1 %v7542_v11  ;;  %v9061_v11 = vld [vmem:[#allocation8 + $0x1c8] ss:$16 sps:$4 sm:$0xff]  }
 0x141   : > { %1164 = vmatmul.mubr.bf16.gmra.mrb[16].mxu0 %v10437_v3  ;;  %3745 = vmatprep.subr.bf16.mxu1 %v8979_v10  ;;  %v9072_v10 = vld [vmem:[#allocation8 + $0x204] ss:$16 sps:$4 sm:$0xff]  }
 0x142   : > { %1173 = vmatprep.mubr.bf16.mxu0 %v10018_v0 }
 0x143   : > { %1277 = vmatmul.mubr.bf16.gmra.mrb[16].mxu1 %v10437_v3 }
 0x144   : > { %1286 = vmatprep.mubr.bf16.mxu1 %v10018_v0 }
 0x149   : > { %1174 = vmatmul.mubr.bf16.gmra.mrb[20].mxu0 %v10443_v9 }
 0x14a   : > { %1183 = vmatprep.mubr.bf16.mxu0 %v10018_v0 }
 0x14b   : > { %1287 = vmatmul.mubr.bf16.gmra.mrb[20].mxu1 %v10443_v9 }
 0x14c   : > { %1296 = vmatprep.mubr.bf16.mxu1 %v10018_v0 }
 0x151   : > { %1184 = vmatmul.mubr.bf16.gmra.mrb[24].mxu0 %v10450_v12 }
 0x152   : > { %1193 = vmatprep.mubr.bf16.mxu0 %v10018_v0 }
 0x153   : > { %1297 = vmatmul.mubr.bf16.gmra.mrb[24].mxu1 %v10450_v12 }
 0x154   : > { %1306 = vmatprep.mubr.bf16.mxu1 %v10018_v0 }
 0x159   : > { %1194 = vmatmul.mubr.bf16.gmra.mrb[28].mxu0 %v10457_v13 }
 0x15a   : > { %1349 = vmatprep.mubr.bf16.mxu0 %v10018_v0 }
 0x15b   : > { %1307 = vmatmul.mubr.bf16.gmra.mrb[28].mxu1 %v10457_v13 }
 0x15c   : > { %1462 = vmatprep.mubr.bf16.mxu1 %v10018_v0 }
 0x161   : > { %1350 = vmatmul.mubr.bf16.vlgmr.msra.gmra.mrb[32].mxu0 %v10411_v60 }
 0x162   : > { %1359 = vmatprep.mubr.bf16.mxu0 %v10018_v0  ;;  %3294 = vmatpush1.bf16.msra.mxu0 %v8974_v14  ;;  %v9069_v14 = vld [vmem:[#allocation8 + $0x1ec] ss:$16 sps:$4 sm:$0xff]  }
 0x163   : > { %3295 = vmatprep.subr.bf16.mxu0 %v8982_v15  ;;  %1463 = vmatmul.mubr.bf16.vlgmr.msra.gmra.mrb[32].mxu1 %v10411_v60  ;;  %v9003_v60 = vld [vmem:[#allocation8 + $0x8c] ss:$16 sps:$4 sm:$0xff]   ;;  %v9067_v15 = vld [vmem:[#allocation8 + $0x1e8] ss:$16 sps:$4 sm:$0xff]  }
 0x164   : > { %3746 = vmatpush1.bf16.msra.mxu1 %v8977_v19  ;;  %1472 = vmatprep.mubr.bf16.mxu1 %v10018_v0 }
 0x165   : > { %3747 = vmatprep.subr.bf16.mxu1 %v8985_v20  ;;  %v10501_v20 = vld [vmem:[#allocation7] sm:$0xff] }
 0x166   : > { %3296 = vmatpush1.bf16.msra.mxu0 %v8980_v17  ;;  %v9075_v17 = vld [vmem:[#allocation8 + $0x20c] ss:$16 sps:$4 sm:$0xff]  }
 0x167   : > { %3297 = vmatprep.subr.bf16.mxu0 %v8988_v18 }
 0x168   : > { %3748 = vmatpush1.bf16.msra.mxu1 %v8983_v23 }
 0x169   : > { %1360 = vmatmul.mubr.bf16.gmra.mrb[36].mxu0 %v10416_v16  ;;  %3749 = vmatprep.subr.bf16.mxu1 %v8991_v24 }
 0x16a   : > { %1369 = vmatprep.mubr.bf16.mxu0 %v10018_v0  ;;  %3298 = vmatpush1.bf16.msra.mxu0 %v8986_v21 }
 0x16b   : > { %3299 = vmatprep.subr.bf16.mxu0 %v8994_v22  ;;  %1473 = vmatmul.mubr.bf16.gmra.mrb[36].mxu1 %v10416_v16  ;;  %v9018_v16 = vld [vmem:[#allocation8 + $0xe4] ss:$16 sps:$4 sm:$0xff]  }
 0x16c   : > { %3750 = vmatpush1.bf16.msra.mxu1 %v8989_v27  ;;  %1482 = vmatprep.mubr.bf16.mxu1 %v10018_v0 }
 0x16d   : > { %3751 = vmatprep.subr.bf16.mxu1 %v8997_v28 }
 0x16e   : > { %3300 = vmatpush1.bf16.msra.mxu0 %v8992_v25 }
 0x16f   : > { %3301 = vmatprep.subr.bf16.mxu0 %v9000_v26 }
 0x170   : > { %3752 = vmatpush1.bf16.msra.mxu1 %v8995_v32 }
 0x171   : > { %1370 = vmatmul.mubr.bf16.gmra.mrb[40].mxu0 %v10423_v31  ;;  %3753 = vmatprep.subr.bf16.mxu1 %v9003_v60 }
 0x172   : > { %1379 = vmatprep.mubr.bf16.mxu0 %v10018_v0  ;;  %3302 = vmatpush1.bf16.msra.mxu0 %v8998_v29 }
 0x173   : > { %3303 = vmatprep.subr.bf16.mxu0 %v9006_v30  ;;  %1483 = vmatmul.mubr.bf16.gmra.mrb[40].mxu1 %v10423_v31  ;;  %v9030_v31 = vld [vmem:[#allocation8 + $0x124] ss:$16 sps:$4 sm:$0xff]  }
 0x174   : > { %3754 = vmatpush1.bf16.msra.mxu1 %v9001_v34  ;;  %1492 = vmatprep.mubr.bf16.mxu1 %v10018_v0 }
 0x175   : > { %3755 = vmatprep.subr.bf16.mxu1 %v9009_v36 }
 0x176   : > { %3304 = vmatpush1.bf16.msra.mxu0 %v9004_v33 }
 0x177   : > { %3305 = vmatprep.subr.bf16.mxu0 %v9012_v35 }
 0x178   : > { %3756 = vmatpush1.bf16.msra.mxu1 %v9007_v38 }
 0x179   : > { %1380 = vmatmul.mubr.bf16.gmra.mrb[44].mxu0 %v10430_v48  ;;  %3757 = vmatprep.subr.bf16.mxu1 %v9015_v39 }
 0x17a   : > { %1389 = vmatprep.mubr.bf16.mxu0 %v10018_v0  ;;  %3306 = vmatpush1.bf16.msra.mxu0 %v9010_v37  ;;  %v9070_v37 = vld [vmem:[#allocation8 + $0x200] ss:$16 sps:$4 sm:$0xff]  }
 0x17b   : > { %3307 = vmatprep.subr.bf16.mxu0 %v9018_v16  ;;  %1493 = vmatmul.mubr.bf16.gmra.mrb[44].mxu1 %v10430_v48  ;;  %v9042_v48 = vld [vmem:[#allocation8 + $0x164] ss:$16 sps:$4 sm:$0xff]  }
 0x17c   : > { %3758 = vmatpush1.bf16.msra.mxu1 %v9013_v41  ;;  %1502 = vmatprep.mubr.bf16.mxu1 %v10018_v0 }
 0x17d   : > { %3759 = vmatprep.subr.bf16.mxu1 %v9021_v43  ;;  %v9078_v43 = vld [vmem:[#allocation8 + $0x224] ss:$16 sps:$4 sm:$0xff]  }
 0x17e   : > { %3308 = vmatpush1.bf16.msra.mxu0 %v9016_v40 }
 0x17f   : > { %3309 = vmatprep.subr.bf16.mxu0 %v9024_v42  ;;  %v9073_v42 = vld [vmem:[#allocation8 + $0x208] ss:$16 sps:$4 sm:$0xff]  }
 0x180   : > { %3760 = vmatpush1.bf16.msra.mxu1 %v9019_v45 }
 0x181   : > { %1390 = vmatmul.mubr.bf16.gmra.mrb[48].mxu0 %v10437_v3  ;;  %3761 = vmatprep.subr.bf16.mxu1 %v9027_v46 }
 0x182   : > { %1399 = vmatprep.mubr.bf16.mxu0 %v10018_v0  ;;  %3310 = vmatpush1.bf16.msra.mxu0 %v9022_v44 }
 0x183   : > { %3311 = vmatprep.subr.bf16.mxu0 %v9030_v31  ;;  %1503 = vmatmul.mubr.bf16.gmra.mrb[48].mxu1 %v10437_v3  ;;  %v9060_v3 = vld [vmem:[#allocation8 + $0x1c4] ss:$16 sps:$4 sm:$0xff]   ;;  %v9081_v31 = vld [vmem:[#allocation8 + $0x22c] ss:$16 sps:$4 sm:$0xff]  }
 0x184   : > { %3762 = vmatpush1.bf16.msra.mxu1 %v9025_v49  ;;  %1512 = vmatprep.mubr.bf16.mxu1 %v10018_v0 }
 0x185   : > { %3763 = vmatprep.subr.bf16.mxu1 %v9033_v51 }
 0x186   : > { %3312 = vmatpush1.bf16.msra.mxu0 %v9028_v47 }
 0x187   : > { %3313 = vmatprep.subr.bf16.mxu0 %v9036_v50 }
 0x188   : > { %3764 = vmatpush1.bf16.msra.mxu1 %v9031_v53 }
 0x189   : > { %1400 = vmatmul.mubr.bf16.gmra.mrb[52].mxu0 %v10443_v9  ;;  %3765 = vmatprep.subr.bf16.mxu1 %v9039_v54 }
 0x18a   : > { %1409 = vmatprep.mubr.bf16.mxu0 %v10018_v0  ;;  %3314 = vmatpush1.bf16.msra.mxu0 %v9034_v52 }
 0x18b   : > { %3315 = vmatprep.subr.bf16.mxu0 %v9042_v48  ;;  %1513 = vmatmul.mubr.bf16.gmra.mrb[52].mxu1 %v10443_v9  ;;  %v9064_v9 = vld [vmem:[#allocation8 + $0x1e0] ss:$16 sps:$4 sm:$0xff]  }
 0x18c   : > { %3766 = vmatpush1.bf16.msra.mxu1 %v9037_v56  ;;  %1522 = vmatprep.mubr.bf16.mxu1 %v10018_v0  ;;  %v9076_v48 = vld [vmem:[#allocation8 + $0x220] ss:$16 sps:$4 sm:$0xff]  }
 0x18d   : > { %3767 = vmatprep.subr.bf16.mxu1 %v9045_v58  ;;  %v9084_v58 = vld [vmem:[#allocation8 + $0x244] ss:$16 sps:$4 sm:$0xff]  }
 0x18e   : > { %3316 = vmatpush1.bf16.msra.mxu0 %v9040_v55 }
 0x18f   : > { %3317 = vmatprep.subr.bf16.mxu0 %v9048_v57  ;;  %v9079_v57 = vld [vmem:[#allocation8 + $0x228] ss:$16 sps:$4 sm:$0xff]  }
 0x190   : > { %3768 = vmatpush1.bf16.msra.mxu1 %v9043_v61 }
 0x191   : > { %1410 = vmatmul.mubr.bf16.gmra.mrb[56].mxu0 %v10450_v12  ;;  %3769 = vmatprep.subr.bf16.mxu1 %v9051_v63 }
 0x192   : > { %1419 = vmatprep.mubr.bf16.mxu0 %v10018_v0  ;;  %3318 = vmatpush1.bf16.msra.mxu0 %v9046_v59 }
 0x193   : > { %3319 = vmatprep.subr.bf16.mxu0 %v9054_v62  ;;  %1523 = vmatmul.mubr.bf16.gmra.mrb[56].mxu1 %v10450_v12  ;;  %v683_v12 = vlaneseq }
 0x194   : > { %3770 = vmatpush1.bf16.msra.mxu1 %v9049_v2  ;;  %1532 = vmatprep.mubr.bf16.mxu1 %v10018_v0  ;;  %v9087_v2 = vld [vmem:[#allocation8 + $0x24c] ss:$16 sps:$4 sm:$0xff]  }
 0x195   : > { %3771 = vmatprep.subr.bf16.mxu1 %v9057_v4  ;;  %v10496_v18 = vshrl.u32 %v683_v12, 7 }
 0x196   : > { %3320 = vmatpush1.bf16.msra.mxu0 %v9052_v1 }
 0x197   : > { %3321 = vmatprep.subr.bf16.mxu0 %v9060_v3  ;;  %v10499_v19 = vsub.s32 0, %v10496_v18  ;;  %v10504_v21 = vsub.s32 1, %v10496_v18  ;;  %v10517_v28 = vsub.s32 2, %v10496_v18  ;;  %v10521_v32 = vsub.s32 3, %v10496_v18 }
 0x198   : > { %3772 = vmatpush1.bf16.msra.mxu1 %v9055_v6 }
 0x199   : > { %1420 = vmatmul.mubr.bf16.gmra.mrb[60].mxu0 %v10457_v13  ;;  %3773 = vmatprep.subr.bf16.mxu1 %v9063_v8  ;;  %v10512_v22 = vrot.slane %v10501_v20, %v10504_v21  ;;  %v10526_v38 = vrot.slane %v10501_v20, %v10517_v28  ;;  %v10530_v39 = vrot.slane %v10501_v20, %v10521_v32 }
 0x19a   : > { %3322 = vmatpush1.bf16.msra.mxu0 %v9058_v5 }
 0x19b   : > { %3323 = vmatprep.subr.bf16.mxu0 %v9066_v7  ;;  %1533 = vmatmul.mubr.bf16.gmra.mrb[60].mxu1 %v10457_v13  ;;  %v10508_v13 = vrot.slane %v10501_v20, %v10499_v19  ;;  %v9082_v7 = vld [vmem:[#allocation8 + $0x240] ss:$16 sps:$4 sm:$0xff]  }
 0x19c   : > { %3774 = vmatpush1.bf16.msra.mxu1 %v9061_v11 }
 0x19d   : > { %3775 = vmatprep.subr.bf16.mxu1 %v9069_v14 }
 0x19e   : > { %3324 = vmatpush1.bf16.msra.mxu0 %v9064_v9 }
 0x19f   : > { %3406 = vmatprep.subr.bf16.mxu0 %v9072_v10 }
 0x1a0   : > { %3776 = vmatpush1.bf16.msra.mxu1 %v9067_v15  ;;  %v9085_v15 = vld [vmem:[#allocation8 + $0x248] ss:$16 sps:$4 sm:$0xff]  }
 0x1a1   : > { %3858 = vmatprep.subr.bf16.mxu1 %v9075_v17  ;;  %v9090_v17 = vld [vmem:[#allocation8 + $0x264] ss:$16 sps:$4 sm:$0xff]  }
 0x1f4   : > { %v1125_v23 = vpop.f32.mrb[0].mxu0  ;;  %v1238_v46 = vpop.f32.mrb[0].mxu1 }
 0x1f5   : > { %v1126_v24 = vadd.f32 %v1125_v23, %v10508_v13  ;;  %v1127_v25 = vpop.f32.mrb[1].mxu0  ;;  %v1239_v50 = vadd.f32 %v1238_v46, %v10526_v38  ;;  %v1240_v51 = vpop.f32.mrb[1].mxu1 }
 0x1f6   : > { %v1128_v26 = vadd.f32 %v1127_v25, %v10512_v22  ;;  %v1129_v27 = vpop.f32.mrb[2].mxu0  ;;  %v1241_v54 = vadd.f32 %v1240_v51, %v10530_v39  ;;  %v1242_v55 = vpop.f32.mrb[2].mxu1  ;;  %v9093_v25 = vld [vmem:[#allocation8 + $0x26c] ss:$16 sps:$4 sm:$0xff]  }
 0x1f7   : > { %v1130_v29 = vadd.f32 %v1129_v27, %v10508_v13  ;;  %v1131_v30 = vpop.f32.mrb[3].mxu0  ;;  %v1543_v33 = vmax.f32 %v1126_v24, 0.0  ;;  %v1545_v59 = vmax.f32 %v1239_v50, 0.0  ;;  %v1243_v61 = vadd.f32 %v1242_v55, %v10526_v38  ;;  %v1244_v62 = vpop.f32.mrb[3].mxu1 }
 0x1f8   : > { %v1132_v60 = vadd.f32 %v1131_v30, %v10512_v22  ;;  %v1544_v35 = vmax.f32 %v1128_v26, 0.0  ;;  %v1546_v3 = vmax.f32 %v1241_v54, 0.0  ;;  %v1245_v4 = vadd.f32 %v1244_v62, %v10530_v39 }
 0x1f9   : > { %v1551_v34 = vmax.f32 %v1130_v29, 0.0  ;;  %v1553_v8 = vmax.f32 %v1243_v61, 0.0 }
 0x1fa   : > { %v1552_v36 = vmax.f32 %v1132_v60, 0.0  ;;  %v1554_v10 = vmax.f32 %v1245_v4, 0.0 }
 0x1fb   : > { %v1671_v16 = vpack.c.bf16 %v1551_v34, %v1543_v33  ;;  %v10540_v12 = vpack.c.bf16 %v1553_v8, %v1545_v59  ;;  %v9102_v59 = vld [vmem:[#allocation8 + $0x2a4] ss:$16 sps:$4 sm:$0xff]  }
 0x1fc   : > { %v1672_v40 = vpack.c.bf16 %v1552_v36, %v1544_v35  ;;  %v1135_v41 = vpop.f32.mrb[4].mxu0  ;;  %v10543_v26 = vpack.c.bf16 %v1554_v10, %v1546_v3  ;;  %v9088_v36 = vld [vmem:[#allocation8 + $0x260] ss:$16 sps:$4 sm:$0xff]  }
 0x1fd   : > { %v1136_v44 = vadd.f32 %v1135_v41, %v10508_v13  ;;  %v1137_v45 = vpop.f32.mrb[5].mxu0  ;;  %v9091_v41 = vld [vmem:[#allocation8 + $0x268] ss:$16 sps:$4 sm:$0xff]   ;;  %v9100_v10 = vld [vmem:[#allocation8 + $0x2a0] ss:$16 sps:$4 sm:$0xff]  }
 0x1fe   : > { %v1138_v47 = vadd.f32 %v1137_v45, %v10512_v22  ;;  %v1139_v49 = vpop.f32.mrb[6].mxu0  ;;  %3325 = vmatprep.mubr.bf16.mxu0 %v1672_v40  ;;  %3777 = vmatprep.mubr.bf16.mxu1 %v1672_v40  ;;  %v1248_v27 = vpop.f32.mrb[4].mxu1 }
 0x1ff   : > { %v1140_v52 = vadd.f32 %v1139_v49, %v10508_v13  ;;  %v1141_v53 = vpop.f32.mrb[7].mxu0  ;;  %3326 = vmatmul.mubr.bf16.vlgmr.msra.gmra.mrb[64].mxu0 %v1671_v16  ;;  %3778 = vmatmul.mubr.bf16.vlgmr.msra.gmra.mrb[64].mxu1 %v1671_v16  ;;  %v1559_v63 = vmax.f32 %v1136_v44, 0.0  ;;  %v1249_v60 = vadd.f32 %v1248_v27, %v10526_v38  ;;  %v1250_v33 = vpop.f32.mrb[5].mxu1 }
 0x200   : > { %v1142_v56 = vadd.f32 %v1141_v53, %v10512_v22  ;;  %3407 = vmatpush1.bf16.msra.mxu0 %v9070_v37  ;;  %3859 = vmatpush1.bf16.msra.mxu1 %v9073_v42  ;;  %v1560_v5 = vmax.f32 %v1138_v47, 0.0  ;;  %v1251_v37 = vadd.f32 %v1250_v33, %v10530_v39  ;;  %v1252_v16 = vpop.f32.mrb[6].mxu1  ;;  %v9096_v42 = vld [vmem:[#allocation8 + $0x284] ss:$16 sps:$4 sm:$0xff]   ;;  %v9099_v47 = vld [vmem:[#allocation8 + $0x28c] ss:$16 sps:$4 sm:$0xff]  }
 0x201   : > { %v1567_v1 = vmax.f32 %v1140_v52, 0.0  ;;  %3408 = vmatprep.subr.bf16.mxu0 %v9078_v43  ;;  %3860 = vmatprep.subr.bf16.mxu1 %v9081_v31  ;;  %v1561_v43 = vmax.f32 %v1249_v60, 0.0  ;;  %v1253_v44 = vadd.f32 %v1252_v16, %v10526_v38  ;;  %v1254_v45 = vpop.f32.mrb[7].mxu1  ;;  %v9094_v53 = vld [vmem:[#allocation8 + $0x280] ss:$16 sps:$4 sm:$0xff]  }
 0x202   : > { %v1568_v6 = vmax.f32 %v1142_v56, 0.0  ;;  %v1562_v49 = vmax.f32 %v1251_v37, 0.0  ;;  %v1255_v50 = vadd.f32 %v1254_v45, %v10530_v39  ;;  %v9111_v60 = vld [vmem:[#allocation8 + $0x2cc] ss:$16 sps:$4 sm:$0xff]   ;;  %v9106_v37 = vld [vmem:[#allocation8 + $0x2c0] ss:$16 sps:$4 sm:$0xff]  }
 0x203   : > { %v1679_v9 = vpack.c.bf16 %v1567_v1, %v1559_v63  ;;  %v9105_v1 = vld [vmem:[#allocation8 + $0x2ac] ss:$16 sps:$4 sm:$0xff]   ;;  %v9114_v45 = vld [vmem:[#allocation8 + $0x2e4] ss:$16 sps:$4 sm:$0xff]  }
 0x204   : > { %v1680_v11 = vpack.c.bf16 %v1568_v6, %v1560_v5  ;;  %3409 = vmatpush1.bf16.msra.mxu0 %v9076_v48  ;;  %v1145_v14 = vpop.f32.mrb[8].mxu0  ;;  %3861 = vmatpush1.bf16.msra.mxu1 %v9079_v57  ;;  %v1569_v48 = vmax.f32 %v1253_v44, 0.0  ;;  %v1570_v55 = vmax.f32 %v1255_v50, 0.0  ;;  %v9109_v44 = vld [vmem:[#allocation8 + $0x2c8] ss:$16 sps:$4 sm:$0xff]  }
 0x205   : > { %v1146_v23 = vadd.f32 %v1145_v14, %v10508_v13  ;;  %v1147_v24 = vpop.f32.mrb[9].mxu0  ;;  %3410 = vmatprep.subr.bf16.mxu0 %v9084_v58  ;;  %3862 = vmatprep.subr.bf16.mxu1 %v9087_v2  ;;  %v9097_v58 = vld [vmem:[#allocation8 + $0x288] ss:$16 sps:$4 sm:$0xff]  }
 0x206   : > { %v1148_v29 = vadd.f32 %v1147_v24, %v10512_v22  ;;  %v1149_v30 = vpop.f32.mrb[10].mxu0  ;;  %3335 = vmatprep.mubr.bf16.mxu0 %v1680_v11  ;;  %3787 = vmatprep.mubr.bf16.mxu1 %v1680_v11  ;;  %v10552_v61 = vpack.c.bf16 %v1569_v48, %v1561_v43  ;;  %v10555_v2 = vpack.c.bf16 %v1570_v55, %v1562_v49  ;;  %v1258_v3 = vpop.f32.mrb[8].mxu1  ;;  %v9117_v49 = vld [vmem:[#allocation8 + $0x2ec] ss:$16 sps:$4 sm:$0xff]  }
 0x207   : > { %v1150_v34 = vadd.f32 %v1149_v30, %v10508_v13  ;;  %v1151_v35 = vpop.f32.mrb[11].mxu0  ;;  %3336 = vmatmul.mubr.bf16.gmra.mrb[68].mxu0 %v1679_v9  ;;  %3788 = vmatmul.mubr.bf16.gmra.mrb[68].mxu1 %v1679_v9  ;;  %v1575_v31 = vmax.f32 %v1146_v23, 0.0  ;;  %v1259_v6 = vadd.f32 %v1258_v3, %v10526_v38  ;;  %v9108_v23 = vld [vmem:[#allocation8 + $0x2c4] ss:$16 sps:$4 sm:$0xff]  }
 0x208   : > { %v1152_v40 = vadd.f32 %v1151_v35, %v10512_v22  ;;  %3411 = vmatpush1.bf16.msra.mxu0 %v9082_v7  ;;  %3863 = vmatpush1.bf16.msra.mxu1 %v9085_v15  ;;  %v1576_v51 = vmax.f32 %v1148_v29, 0.0  ;;  %v1260_v7 = vpop.f32.mrb[9].mxu1 }
 0x209   : > { %v1583_v46 = vmax.f32 %v1150_v34, 0.0  ;;  %3412 = vmatprep.subr.bf16.mxu0 %v9090_v17  ;;  %3864 = vmatprep.subr.bf16.mxu1 %v9093_v25  ;;  %v1261_v11 = vadd.f32 %v1260_v7, %v10530_v39  ;;  %v1262_v14 = vpop.f32.mrb[10].mxu1  ;;  %v9103_v17 = vld [vmem:[#allocation8 + $0x2a8] ss:$16 sps:$4 sm:$0xff]   ;;  %v1577_v24 = vmax.f32 %v1259_v6, 0.0 }
 0x20a   : > { %v1584_v52 = vmax.f32 %v1152_v40, 0.0  ;;  %v1263_v25 = vadd.f32 %v1262_v14, %v10526_v38  ;;  %v1264_v27 = vpop.f32.mrb[11].mxu1 }
 0x20b   : > { %v1687_v54 = vpack.c.bf16 %v1583_v46, %v1575_v31  ;;  %v1578_v33 = vmax.f32 %v1261_v11, 0.0  ;;  %v1265_v34 = vadd.f32 %v1264_v27, %v10530_v39 }
 0x20c   : > { %v1688_v56 = vpack.c.bf16 %v1584_v52, %v1576_v51  ;;  %3413 = vmatpush1.bf16.msra.mxu0 %v9088_v36  ;;  %v1155_v57 = vpop.f32.mrb[12].mxu0  ;;  %3865 = vmatpush1.bf16.msra.mxu1 %v9091_v41  ;;  %v1585_v16 = vmax.f32 %v1263_v25, 0.0 }
 0x20d   : > { %v1156_v62 = vadd.f32 %v1155_v57, %v10508_v13  ;;  %v1157_v63 = vpop.f32.mrb[13].mxu0  ;;  %3414 = vmatprep.subr.bf16.mxu0 %v9096_v42  ;;  %3866 = vmatprep.subr.bf16.mxu1 %v9099_v47  ;;  %v1586_v41 = vmax.f32 %v1265_v34, 0.0  ;;  %v9112_v57 = vld [vmem:[#allocation8 + $0x2e0] ss:$16 sps:$4 sm:$0xff]  }
 0x20e   : > { %v1158_v4 = vadd.f32 %v1157_v63, %v10512_v22  ;;  %v1159_v5 = vpop.f32.mrb[14].mxu0  ;;  %3345 = vmatprep.mubr.bf16.mxu0 %v1688_v56  ;;  %3797 = vmatprep.mubr.bf16.mxu1 %v1688_v56  ;;  %v10564_v31 = vpack.c.bf16 %v1585_v16, %v1577_v24  ;;  %v1268_v51 = vpop.f32.mrb[12].mxu1  ;;  %v9115_v63 = vld [vmem:[#allocation8 + $0x2e8] ss:$16 sps:$4 sm:$0xff]  }
 0x20f   : > { %v1160_v8 = vadd.f32 %v1159_v5, %v10508_v13  ;;  %v1161_v9 = vpop.f32.mrb[15].mxu0  ;;  %3346 = vmatmul.mubr.bf16.gmra.mrb[72].mxu0 %v1687_v54  ;;  %3798 = vmatmul.mubr.bf16.gmra.mrb[72].mxu1 %v1687_v54  ;;  %v1591_v29 = vmax.f32 %v1156_v62, 0.0  ;;  %v10567_v50 = vpack.c.bf16 %v1586_v41, %v1578_v33  ;;  %v1269_v48 = vadd.f32 %v1268_v51, %v10526_v38  ;;  %v1270_v54 = vpop.f32.mrb[13].mxu1  ;;  %v9127_v51 = vld [vmem:[#allocation8 + $0x328] ss:$16 sps:$4 sm:$0xff]  }
 0x210   : > { %v1162_v15 = vadd.f32 %v1161_v9, %v10512_v22  ;;  %3415 = vmatpush1.bf16.msra.mxu0 %v9094_v53  ;;  %3867 = vmatpush1.bf16.msra.mxu1 %v9097_v58  ;;  %v1592_v35 = vmax.f32 %v1158_v4, 0.0  ;;  %v1271_v58 = vadd.f32 %v1270_v54, %v10530_v39 }
 0x211   : > { %v1599_v30 = vmax.f32 %v1160_v8, 0.0  ;;  %3416 = vmatprep.subr.bf16.mxu0 %v9102_v59  ;;  %3868 = vmatprep.subr.bf16.mxu1 %v9105_v1  ;;  %v1272_v59 = vpop.f32.mrb[14].mxu1  ;;  %v9120_v1 = vld [vmem:[#allocation8 + $0x304] ss:$16 sps:$4 sm:$0xff]   ;;  %v1593_v3 = vmax.f32 %v1269_v48, 0.0 }
 0x212   : > { %v1600_v36 = vmax.f32 %v1162_v15, 0.0  ;;  %v1273_v4 = vadd.f32 %v1272_v59, %v10526_v38  ;;  %v1274_v5 = vpop.f32.mrb[15].mxu1  ;;  %v9123_v8 = vld [vmem:[#allocation8 + $0x30c] ss:$16 sps:$4 sm:$0xff]   ;;  %v1594_v9 = vmax.f32 %v1271_v58, 0.0 }
 0x213   : > { %v1695_v40 = vpack.c.bf16 %v1599_v30, %v1591_v29  ;;  %v9118_v15 = vld [vmem:[#allocation8 + $0x300] ss:$16 sps:$4 sm:$0xff]   ;;  %v9121_v29 = vld [vmem:[#allocation8 + $0x308] ss:$16 sps:$4 sm:$0xff]   ;;  %v9126_v30 = vld [vmem:[#allocation8 + $0x324] ss:$16 sps:$4 sm:$0xff]  }
 0x214   : > { %v1696_v42 = vpack.c.bf16 %v1600_v36, %v1592_v35  ;;  %3417 = vmatpush1.bf16.msra.mxu0 %v9100_v10  ;;  %v1165_v43 = vpop.f32.mrb[16].mxu0  ;;  %3869 = vmatpush1.bf16.msra.mxu1 %v9103_v17  ;;  %v1275_v10 = vadd.f32 %v1274_v5, %v10530_v39  ;;  %v1601_v17 = vmax.f32 %v1273_v4, 0.0  ;;  %v9129_v35 = vld [vmem:[#allocation8 + $0x32c] ss:$16 sps:$4 sm:$0xff]  }
 0x215   : > { %v1166_v46 = vadd.f32 %v1165_v43, %v10508_v13  ;;  %v1167_v47 = vpop.f32.mrb[17].mxu0  ;;  %3418 = vmatprep.subr.bf16.mxu0 %v9108_v23  ;;  %3870 = vmatprep.subr.bf16.mxu1 %v9111_v60 }
 0x216   : > { %v1168_v52 = vadd.f32 %v1167_v47, %v10512_v22  ;;  %v1169_v53 = vpop.f32.mrb[18].mxu0  ;;  %3355 = vmatprep.mubr.bf16.mxu0 %v1696_v42  ;;  %3807 = vmatprep.mubr.bf16.mxu1 %v1696_v42  ;;  %v1602_v24 = vmax.f32 %v1275_v10, 0.0  ;;  %v10576_v60 = vpack.c.bf16 %v1601_v17, %v1593_v3 }
 0x217   : > { %v1170_v55 = vadd.f32 %v1169_v53, %v10508_v13  ;;  %v1171_v56 = vpop.f32.mrb[19].mxu0  ;;  %3356 = vmatmul.mubr.bf16.gmra.mrb[76].mxu0 %v1695_v40  ;;  %3808 = vmatmul.mubr.bf16.gmra.mrb[76].mxu1 %v1695_v40  ;;  %v1607_v6 = vmax.f32 %v1166_v46, 0.0 }
 0x218   : > { %v1172_v62 = vadd.f32 %v1171_v56, %v10512_v22  ;;  %3419 = vmatpush1.bf16.msra.mxu0 %v9106_v37  ;;  %3871 = vmatpush1.bf16.msra.mxu1 %v9109_v44  ;;  %v1608_v11 = vmax.f32 %v1168_v52, 0.0  ;;  %v10579_v36 = vpack.c.bf16 %v1602_v24, %v1594_v9  ;;  %v1278_v37 = vpop.f32.mrb[16].mxu1  ;;  %v9132_v52 = vld [vmem:[#allocation8 + $0x344] ss:$16 sps:$4 sm:$0xff]  }
 0x219   : > { %v1615_v7 = vmax.f32 %v1170_v55, 0.0  ;;  %3420 = vmatprep.subr.bf16.mxu0 %v9114_v45  ;;  %3872 = vmatprep.subr.bf16.mxu1 %v9117_v49  ;;  %v1279_v41 = vadd.f32 %v1278_v37, %v10526_v38  ;;  %v1280_v42 = vpop.f32.mrb[17].mxu1  ;;  %v9124_v45 = vld [vmem:[#allocation8 + $0x320] ss:$16 sps:$4 sm:$0xff]   ;;  %v9138_v9 = vld [vmem:[#allocation8 + $0x364] ss:$16 sps:$4 sm:$0xff]  }
 0x21a   : > { %v1616_v14 = vmax.f32 %v1172_v62, 0.0  ;;  %v1281_v46 = vadd.f32 %v1280_v42, %v10530_v39  ;;  %v1282_v47 = vpop.f32.mrb[18].mxu1 }
 0x21b   : > { %v1703_v23 = vpack.c.bf16 %v1615_v7, %v1607_v6  ;;  %v1609_v53 = vmax.f32 %v1279_v41, 0.0  ;;  %v1283_v48 = vadd.f32 %v1282_v47, %v10526_v38  ;;  %v1284_v54 = vpop.f32.mrb[19].mxu1  ;;  %v9144_v41 = vld [vmem:[#allocation8 + $0x384] ss:$16 sps:$4 sm:$0xff]   ;;  %v9147_v47 = vld [vmem:[#allocation8 + $0x38c] ss:$16 sps:$4 sm:$0xff]  }
 0x21c   : > { %v1704_v25 = vpack.c.bf16 %v1616_v14, %v1608_v11  ;;  %3421 = vmatpush1.bf16.msra.mxu0 %v9112_v57  ;;  %v1175_v27 = vpop.f32.mrb[20].mxu0  ;;  %3873 = vmatpush1.bf16.msra.mxu1 %v9115_v63  ;;  %v9135_v57 = vld [vmem:[#allocation8 + $0x34c] ss:$16 sps:$4 sm:$0xff]   ;;  %v1610_v58 = vmax.f32 %v1281_v46, 0.0  ;;  %v1285_v59 = vadd.f32 %v1284_v54, %v10530_v39 }
 0x21d   : > { %v1176_v33 = vadd.f32 %v1175_v27, %v10508_v13  ;;  %v1177_v34 = vpop.f32.mrb[21].mxu0  ;;  %3422 = vmatprep.subr.bf16.mxu0 %v9120_v1  ;;  %3874 = vmatprep.subr.bf16.mxu1 %v9123_v8  ;;  %v9130_v1 = vld [vmem:[#allocation8 + $0x340] ss:$16 sps:$4 sm:$0xff]   ;;  %v1617_v3 = vmax.f32 %v1283_v48, 0.0  ;;  %v9133_v8 = vld [vmem:[#allocation8 + $0x348] ss:$16 sps:$4 sm:$0xff]  }
 0x21e   : > { %v1178_v16 = vadd.f32 %v1177_v34, %v10512_v22  ;;  %v1179_v40 = vpop.f32.mrb[22].mxu0  ;;  %3365 = vmatprep.mubr.bf16.mxu0 %v1704_v25  ;;  %3817 = vmatprep.mubr.bf16.mxu1 %v1704_v25  ;;  %v1618_v5 = vmax.f32 %v1285_v59, 0.0  ;;  %v9136_v34 = vld [vmem:[#allocation8 + $0x360] ss:$16 sps:$4 sm:$0xff]   ;;  %v9145_v59 = vld [vmem:[#allocation8 + $0x388] ss:$16 sps:$4 sm:$0xff]  }
 0x21f   : > { %v1180_v43 = vadd.f32 %v1179_v40, %v10508_v13  ;;  %v1181_v44 = vpop.f32.mrb[23].mxu0  ;;  %3366 = vmatmul.mubr.bf16.gmra.mrb[80].mxu0 %v1703_v23  ;;  %3818 = vmatmul.mubr.bf16.gmra.mrb[80].mxu1 %v1703_v23  ;;  %v1623_v55 = vmax.f32 %v1176_v33, 0.0  ;;  %v10588_v10 = vpack.c.bf16 %v1617_v3, %v1609_v53  ;;  %v1288_v23 = vpop.f32.mrb[20].mxu1  ;;  %v9139_v40 = vld [vmem:[#allocation8 + $0x368] ss:$16 sps:$4 sm:$0xff]  }
 0x220   : > { %v1182_v49 = vadd.f32 %v1181_v44, %v10512_v22  ;;  %3423 = vmatpush1.bf16.msra.mxu0 %v9118_v15  ;;  %3875 = vmatpush1.bf16.msra.mxu1 %v9121_v29  ;;  %v1624_v62 = vmax.f32 %v1178_v16, 0.0  ;;  %v9141_v15 = vld [vmem:[#allocation8 + $0x36c] ss:$16 sps:$4 sm:$0xff]   ;;  %v10591_v17 = vpack.c.bf16 %v1618_v5, %v1610_v58  ;;  %v1289_v27 = vadd.f32 %v1288_v23, %v10526_v38  ;;  %v1290_v29 = vpop.f32.mrb[21].mxu1  ;;  %v9142_v48 = vld [vmem:[#allocation8 + $0x380] ss:$16 sps:$4 sm:$0xff]  }
 0x221   : > { %v1631_v56 = vmax.f32 %v1180_v43, 0.0  ;;  %3424 = vmatprep.subr.bf16.mxu0 %v9126_v30  ;;  %3876 = vmatprep.subr.bf16.mxu1 %v9129_v35  ;;  %v1291_v35 = vadd.f32 %v1290_v29, %v10530_v39  ;;  %v1292_v37 = vpop.f32.mrb[22].mxu1  ;;  %v9153_v5 = vld [vmem:[#allocation8 + $0x3ac] ss:$16 sps:$4 sm:$0xff]  }
 0x222   : > { %v1632_v63 = vmax.f32 %v1182_v49, 0.0  ;;  %v1625_v42 = vmax.f32 %v1289_v27, 0.0  ;;  %v1293_v43 = vadd.f32 %v1292_v37, %v10526_v38  ;;  %v1294_v44 = vpop.f32.mrb[23].mxu1 }
 0x223   : > { %v1711_v4 = vpack.c.bf16 %v1631_v56, %v1623_v55  ;;  %v1626_v49 = vmax.f32 %v1291_v35, 0.0 }
 0x224   : > { %v1712_v6 = vpack.c.bf16 %v1632_v63, %v1624_v62  ;;  %3425 = vmatpush1.bf16.msra.mxu0 %v9124_v45  ;;  %v1185_v7 = vpop.f32.mrb[24].mxu0  ;;  %3877 = vmatpush1.bf16.msra.mxu1 %v9127_v51  ;;  %v1295_v51 = vadd.f32 %v1294_v44, %v10530_v39  ;;  %v1633_v54 = vmax.f32 %v1293_v43, 0.0  ;;  %v9150_v62 = vld [vmem:[#allocation8 + $0x3a4] ss:$16 sps:$4 sm:$0xff]  }
 0x225   : > { %v1186_v11 = vadd.f32 %v1185_v7, %v10508_v13  ;;  %v1187_v14 = vpop.f32.mrb[25].mxu0  ;;  %3426 = vmatprep.subr.bf16.mxu0 %v9132_v52  ;;  %3878 = vmatprep.subr.bf16.mxu1 %v9135_v57 }
 0x226   : > { %v1188_v24 = vadd.f32 %v1187_v14, %v10512_v22  ;;  %v1189_v25 = vpop.f32.mrb[26].mxu0  ;;  %3375 = vmatprep.mubr.bf16.mxu0 %v1712_v6  ;;  %3827 = vmatprep.mubr.bf16.mxu1 %v1712_v6  ;;  %v1634_v56 = vmax.f32 %v1295_v51, 0.0  ;;  %v10600_v63 = vpack.c.bf16 %v1633_v54, %v1625_v42  ;;  %v1298_v7 = vpop.f32.mrb[24].mxu1  ;;  %v9159_v42 = vld [vmem:[#allocation8 + $0x3cc] ss:$16 sps:$4 sm:$0xff]  }
 0x227   : > { %v1190_v30 = vadd.f32 %v1189_v25, %v10508_v13  ;;  %v1191_v33 = vpop.f32.mrb[27].mxu0  ;;  %3376 = vmatmul.mubr.bf16.gmra.mrb[84].mxu0 %v1711_v4  ;;  %3828 = vmatmul.mubr.bf16.gmra.mrb[84].mxu1 %v1711_v4  ;;  %v1639_v45 = vmax.f32 %v1186_v11, 0.0  ;;  %v1299_v11 = vadd.f32 %v1298_v7, %v10526_v38  ;;  %v1300_v14 = vpop.f32.mrb[25].mxu1  ;;  %v9148_v25 = vld [vmem:[#allocation8 + $0x3a0] ss:$16 sps:$4 sm:$0xff]  }
 0x228   : > { %v1192_v16 = vadd.f32 %v1191_v33, %v10512_v22  ;;  %3427 = vmatpush1.bf16.msra.mxu0 %v9130_v1  ;;  %3879 = vmatpush1.bf16.msra.mxu1 %v9133_v8  ;;  %v1640_v52 = vmax.f32 %v1188_v24, 0.0  ;;  %v701_v1 = vsub.s32 4, %v10496_v18  ;;  %v10604_v6 = vpack.c.bf16 %v1634_v56, %v1626_v49  ;;  %v1302_v29 = vpop.f32.mrb[26].mxu1  ;;  %v9151_v33 = vld [vmem:[#allocation8 + $0x3a8] ss:$16 sps:$4 sm:$0xff]  }
 0x229   : > { %v1647_v46 = vmax.f32 %v1190_v30, 0.0  ;;  %3428 = vmatprep.subr.bf16.mxu0 %v9138_v9  ;;  %3880 = vmatprep.subr.bf16.mxu1 %v9141_v15  ;;  %v705_v15 = vsub.s32 5, %v10496_v18  ;;  %v1301_v27 = vadd.f32 %v1300_v14, %v10530_v39  ;;  %v1641_v35 = vmax.f32 %v1299_v11, 0.0  ;;  %v9154_v51 = vld [vmem:[#allocation8 + $0x3c0] ss:$16 sps:$4 sm:$0xff]  }
 0x22a   : > { %v1648_v53 = vmax.f32 %v1192_v16, 0.0  ;;  %v1303_v37 = vadd.f32 %v1302_v29, %v10526_v38  ;;  %v1304_v16 = vpop.f32.mrb[27].mxu1  ;;  %v9162_v54 = vld [vmem:[#allocation8 + $0x3e4] ss:$16 sps:$4 sm:$0xff]  }
 0x22b   : > { %v1719_v55 = vpack.c.bf16 %v1647_v46, %v1639_v45  ;;  %v1642_v43 = vmax.f32 %v1301_v27, 0.0  ;;  %v1305_v44 = vadd.f32 %v1304_v16, %v10530_v39  ;;  %v9163_v27 = vld [vmem:[#allocation8 + $0x3e8] ss:$16 sps:$4 sm:$0xff]   ;;  %v9171_v16 = vld [vmem:[#allocation8 + $0x40c] ss:$16 sps:$4 sm:$0xff]  }
 0x22c   : > { %v1720_v57 = vpack.c.bf16 %v1648_v53, %v1640_v52  ;;  %3429 = vmatpush1.bf16.msra.mxu0 %v9136_v34  ;;  %v1195_v58 = vpop.f32.mrb[28].mxu0  ;;  %3881 = vmatpush1.bf16.msra.mxu1 %v9139_v40  ;;  %v9156_v34 = vld [vmem:[#allocation8 + $0x3c4] ss:$16 sps:$4 sm:$0xff]   ;;  %v10614_v40 = vrot.slane %v10501_v20, %v701_v1  ;;  %v1649_v46 = vmax.f32 %v1303_v37, 0.0 }
 0x22d   : > { %v1196_v3 = vadd.f32 %v1195_v58, %v10508_v13  ;;  %v1197_v4 = vpop.f32.mrb[29].mxu0  ;;  %3430 = vmatprep.subr.bf16.mxu0 %v9144_v41  ;;  %3882 = vmatprep.subr.bf16.mxu1 %v9147_v47  ;;  %v10618_v47 = vrot.slane %v10501_v20, %v705_v15  ;;  %v1650_v52 = vmax.f32 %v1305_v44, 0.0  ;;  %v9168_v37 = vld [vmem:[#allocation8 + $0x404] ss:$16 sps:$4 sm:$0xff]  }
 0x22e   : > { %v1198_v8 = vadd.f32 %v1197_v4, %v10512_v22  ;;  %v1199_v9 = vpop.f32.mrb[30].mxu0  ;;  %3385 = vmatprep.mubr.bf16.mxu0 %v1720_v57  ;;  %3837 = vmatprep.mubr.bf16.mxu1 %v1720_v57  ;;  %v9165_v57 = vld [vmem:[#allocation8 + $0x3ec] ss:$16 sps:$4 sm:$0xff]  }
 0x22f   : > { %v1200_v23 = vadd.f32 %v1199_v9, %v10508_v13  ;;  %v1201_v24 = vpop.f32.mrb[31].mxu0  ;;  %3386 = vmatmul.mubr.bf16.gmra.mrb[88].mxu0 %v1719_v55  ;;  %3838 = vmatmul.mubr.bf16.gmra.mrb[88].mxu1 %v1719_v55  ;;  %v1655_v13 = vmax.f32 %v1196_v3, 0.0  ;;  %v10620_v55 = vpack.c.bf16 %v1649_v46, %v1641_v35  ;;  %v10622_v58 = vpack.c.bf16 %v1650_v52, %v1642_v43  ;;  %v9160_v3 = vld [vmem:[#allocation8 + $0x3e0] ss:$16 sps:$4 sm:$0xff]   ;;  %v9169_v43 = vld [vmem:[#allocation8 + $0x408] ss:$16 sps:$4 sm:$0xff]  }
 0x230   : > { %v1202_v30 = vadd.f32 %v1201_v24, %v10512_v22  ;;  %3431 = vmatpush1.bf16.msra.mxu0 %v9142_v48  ;;  %3883 = vmatpush1.bf16.msra.mxu1 %v9145_v59  ;;  %v1656_v22 = vmax.f32 %v1198_v8, 0.0  ;;  %v9157_v48 = vld [vmem:[#allocation8 + $0x3c8] ss:$16 sps:$4 sm:$0xff]   ;;  %v1308_v59 = vpop.f32.mrb[28].mxu1  ;;  %v709_v9 = vsub.s32 6, %v10496_v18 }
 0x231   : > { %v1663_v41 = vmax.f32 %v1200_v23, 0.0  ;;  %3432 = vmatprep.subr.bf16.mxu0 %v9150_v62  ;;  %3884 = vmatprep.subr.bf16.mxu1 %v9153_v5  ;;  %v1309_v4 = vadd.f32 %v1308_v59, %v10526_v38  ;;  %v1310_v5 = vpop.f32.mrb[29].mxu1  ;;  %v9172_v59 = vld [vmem:[#allocation8 + $0x420] ss:$16 sps:$4 sm:$0xff]  }
 0x232   : > { %v1664_v45 = vmax.f32 %v1202_v30, 0.0  ;;  %v1311_v11 = vadd.f32 %v1310_v5, %v10530_v39  ;;  %v1312_v14 = vpop.f32.mrb[30].mxu1  ;;  %v9180_v5 = vld [vmem:[#allocation8 + $0x444] ss:$16 sps:$4 sm:$0xff]  }
 0x233   : > { %v1727_v49 = vpack.c.bf16 %v1663_v41, %v1655_v13  ;;  %v1657_v29 = vmax.f32 %v1309_v4, 0.0  ;;  %v1313_v30 = vadd.f32 %v1312_v14, %v10526_v38 }
 0x234   : > { %v1728_v53 = vpack.c.bf16 %v1664_v45, %v1656_v22  ;;  %3433 = vmatpush1.bf16.msra.mxu0 %v9148_v25  ;;  %3885 = vmatpush1.bf16.msra.mxu1 %v9151_v33  ;;  %v1351_v56 = vpop.f32.mrb[32].mxu0  ;;  %v713_v25 = vsub.s32 7, %v10496_v18  ;;  %v1314_v33 = vpop.f32.mrb[31].mxu1  ;;  %v1658_v13 = vmax.f32 %v1311_v11, 0.0  ;;  %v9166_v18 = vld [vmem:[#allocation8 + $0x400] ss:$16 sps:$4 sm:$0xff]   ;;  %v10637_v22 = vrot.slane %v10501_v20, %v709_v9 }
 0x235   : > { %3434 = vmatprep.subr.bf16.mxu0 %v9156_v34  ;;  %3886 = vmatprep.subr.bf16.mxu1 %v9159_v42  ;;  %v1352_v62 = vadd.f32 %v1351_v56, %v10614_v40  ;;  %v1353_v1 = vpop.f32.mrb[33].mxu0  ;;  %v1315_v41 = vadd.f32 %v1314_v33, %v10530_v39  ;;  %v1665_v44 = vmax.f32 %v1313_v30, 0.0  ;;  %v9174_v45 = vld [vmem:[#allocation8 + $0x424] ss:$16 sps:$4 sm:$0xff]   ;;  %v9177_v39 = vld [vmem:[#allocation8 + $0x42c] ss:$16 sps:$4 sm:$0xff]  }
 0x236   : > { %3395 = vmatprep.mubr.bf16.mxu0 %v1728_v53  ;;  %3847 = vmatprep.mubr.bf16.mxu1 %v1728_v53  ;;  %v1354_v7 = vadd.f32 %v1353_v1, %v10618_v47  ;;  %v1355_v8 = vpop.f32.mrb[34].mxu0 }
 0x237   : > { %3396 = vmatmul.mubr.bf16.gmra.mrb[92].mxu0 %v1727_v49  ;;  %3848 = vmatmul.mubr.bf16.gmra.mrb[92].mxu1 %v1727_v49  ;;  %v1547_v15 = vmax.f32 %v1352_v62, 0.0  ;;  %v1356_v23 = vadd.f32 %v1355_v8, %v10614_v40  ;;  %v1357_v24 = vpop.f32.mrb[35].mxu0  ;;  %v1666_v46 = vmax.f32 %v1315_v41, 0.0  ;;  %v10644_v52 = vpack.c.bf16 %v1665_v44, %v1657_v29  ;;  %v9175_v62 = vld [vmem:[#allocation8 + $0x428] ss:$16 sps:$4 sm:$0xff]  }
 0x238   : > { %3435 = vmatpush1.bf16.msra.mxu0 %v9154_v51  ;;  %3887 = vmatpush1.bf16.msra.mxu1 %v9157_v48  ;;  %v1548_v34 = vmax.f32 %v1354_v7, 0.0  ;;  %v1358_v35 = vadd.f32 %v1357_v24, %v10618_v47  ;;  %v10642_v51 = vrot.slane %v10501_v20, %v713_v25  ;;  %v9183_v7 = vld [vmem:[#allocation8 + $0x44c] ss:$16 sps:$4 sm:$0xff]  }
 0x239   : > { %3436 = vmatprep.subr.bf16.mxu0 %v9162_v54  ;;  %3438 = vmatprep.mubr.bf16.mxu0 %v10543_v26  ;;  %v1555_v42 = vmax.f32 %v1356_v23, 0.0  ;;  %v10648_v48 = vpack.c.bf16 %v1666_v46, %v1658_v13  ;;  %v9186_v13 = vld [vmem:[#allocation8 + $0x464] ss:$16 sps:$4 sm:$0xff]  }
 0x23a   : > { %3888 = vmatprep.subr.bf16.mxu1 %v9165_v57  ;;  %3890 = vmatprep.mubr.bf16.mxu1 %v10543_v26  ;;  %v1556_v38 = vmax.f32 %v1358_v35, 0.0  ;;  %v1464_v57 = vpop.f32.mrb[32].mxu1  ;;  %v9181_v35 = vld [vmem:[#allocation8 + $0x448] ss:$16 sps:$4 sm:$0xff]  }
 0x23b   : > { %v10639_v49 = vpack.c.bf16 %v1555_v42, %v1547_v15  ;;  %v1466_v4 = vpop.f32.mrb[33].mxu1 }
 0x23c   : > { %3437 = vmatpush1.bf16.msra.mxu0 %v9160_v3  ;;  %3889 = vmatpush1.bf16.msra.mxu1 %v9163_v27  ;;  %v10646_v26 = vpack.c.bf16 %v1556_v38, %v1548_v34  ;;  %v1361_v53 = vpop.f32.mrb[36].mxu0  ;;  %v1465_v3 = vadd.f32 %v1464_v57, %v10637_v22  ;;  %v1467_v14 = vadd.f32 %v1466_v4, %v10642_v51  ;;  %v1468_v15 = vpop.f32.mrb[34].mxu1  ;;  %v9178_v34 = vld [vmem:[#allocation8 + $0x440] ss:$16 sps:$4 sm:$0xff]  }
 0x23d   : > { %3519 = vmatprep.subr.bf16.mxu0 %v9168_v37  ;;  %3971 = vmatprep.subr.bf16.mxu1 %v9171_v16  ;;  %v1362_v54 = vadd.f32 %v1361_v53, %v10614_v40  ;;  %v1363_v56 = vpop.f32.mrb[37].mxu0  ;;  %v1469_v27 = vadd.f32 %v1468_v15, %v10637_v22  ;;  %v1470_v29 = vpop.f32.mrb[35].mxu1  ;;  %v9195_v15 = vld [vmem:[#allocation8 + $0x48c] ss:$16 sps:$4 sm:$0xff]  }
 0x23e   : > { %v1364_v20 = vadd.f32 %v1363_v56, %v10618_v47  ;;  %v1365_v1 = vpop.f32.mrb[38].mxu0  ;;  %v1549_v25 = vmax.f32 %v1465_v3, 0.0  ;;  %v1550_v30 = vmax.f32 %v1467_v14, 0.0  ;;  %v1471_v33 = vadd.f32 %v1470_v29, %v10642_v51  ;;  %v1474_v46 = vpop.f32.mrb[36].mxu1 }
 0x23f   : > { %3439 = vmatmul.mubr.bf16.vlgmr.msra.gmra.mrb[64].mxu0 %v10540_v12  ;;  %3891 = vmatmul.mubr.bf16.vlgmr.msra.gmra.mrb[64].mxu1 %v10540_v12  ;;  %v1563_v8 = vmax.f32 %v1362_v54, 0.0  ;;  %v1366_v9 = vadd.f32 %v1365_v1, %v10614_v40  ;;  %v1367_v11 = vpop.f32.mrb[39].mxu0  ;;  %v1557_v16 = vmax.f32 %v1469_v27, 0.0  ;;  %v1475_v56 = vadd.f32 %v1474_v46, %v10637_v22  ;;  %v1476_v57 = vpop.f32.mrb[37].mxu1 }
 0x240   : > { %3520 = vmatpush1.bf16.msra.mxu0 %v9166_v18  ;;  %3972 = vmatpush1.bf16.msra.mxu1 %v9169_v43  ;;  %v1564_v23 = vmax.f32 %v1364_v20, 0.0  ;;  %v1368_v24 = vadd.f32 %v1367_v11, %v10618_v47  ;;  %v1558_v42 = vmax.f32 %v1471_v33, 0.0  ;;  %v1477_v3 = vadd.f32 %v1476_v57, %v10642_v51  ;;  %v1478_v4 = vpop.f32.mrb[38].mxu1  ;;  %v9190_v33 = vld [vmem:[#allocation8 + $0x480] ss:$16 sps:$4 sm:$0xff]  }
 0x241   : > { %3521 = vmatprep.subr.bf16.mxu0 %v9174_v45  ;;  %3448 = vmatprep.mubr.bf16.mxu0 %v10555_v2  ;;  %v1571_v12 = vmax.f32 %v1366_v9, 0.0  ;;  %v10666_v44 = vpack.c.bf16 %v1557_v16, %v1549_v25  ;;  %v1565_v9 = vmax.f32 %v1475_v56, 0.0  ;;  %v1479_v11 = vadd.f32 %v1478_v4, %v10637_v22  ;;  %v1480_v14 = vpop.f32.mrb[39].mxu1  ;;  %v9196_v56 = vld [vmem:[#allocation8 + $0x4a0] ss:$16 sps:$4 sm:$0xff]  }
 0x242   : > { %3900 = vmatprep.mubr.bf16.mxu1 %v10555_v2  ;;  %3973 = vmatprep.subr.bf16.mxu1 %v9177_v39  ;;  %v1572_v37 = vmax.f32 %v1368_v24, 0.0  ;;  %v10669_v45 = vpack.c.bf16 %v1558_v42, %v1550_v30  ;;  %v9189_v39 = vld [vmem:[#allocation8 + $0x46c] ss:$16 sps:$4 sm:$0xff]   ;;  %v1566_v24 = vmax.f32 %v1477_v3, 0.0  ;;  %v1481_v25 = vadd.f32 %v1480_v14, %v10642_v51  ;;  %v9199_v3 = vld [vmem:[#allocation8 + $0x4a8] ss:$16 sps:$4 sm:$0xff]  }
 0x243   : > { %v10662_v41 = vpack.c.bf16 %v1571_v12, %v1563_v8  ;;  %v1573_v29 = vmax.f32 %v1479_v11, 0.0  ;;  %v9207_v11 = vld [vmem:[#allocation8 + $0x4cc] ss:$16 sps:$4 sm:$0xff]  }
 0x244   : > { %3522 = vmatpush1.bf16.msra.mxu0 %v9172_v59  ;;  %3974 = vmatpush1.bf16.msra.mxu1 %v9175_v62  ;;  %v10664_v18 = vpack.c.bf16 %v1572_v37, %v1564_v23  ;;  %v1371_v43 = vpop.f32.mrb[40].mxu0  ;;  %v9184_v59 = vld [vmem:[#allocation8 + $0x460] ss:$16 sps:$4 sm:$0xff]   ;;  %v1574_v30 = vmax.f32 %v1481_v25, 0.0 }
 0x245   : > { %3523 = vmatprep.subr.bf16.mxu0 %v9180_v5  ;;  %3975 = vmatprep.subr.bf16.mxu1 %v9183_v7  ;;  %v1372_v2 = vadd.f32 %v1371_v43, %v10614_v40  ;;  %v1373_v38 = vpop.f32.mrb[41].mxu0  ;;  %v9187_v5 = vld [vmem:[#allocation8 + $0x468] ss:$16 sps:$4 sm:$0xff]   ;;  %v10686_v16 = vpack.c.bf16 %v1573_v29, %v1565_v9  ;;  %v9202_v29 = vld [vmem:[#allocation8 + $0x4c0] ss:$16 sps:$4 sm:$0xff]  }
 0x246   : > { %v1374_v53 = vadd.f32 %v1373_v38, %v10618_v47  ;;  %v1375_v54 = vpop.f32.mrb[42].mxu0  ;;  %v10689_v43 = vpack.c.bf16 %v1574_v30, %v1566_v24  ;;  %v9201_v38 = vld [vmem:[#allocation8 + $0x4ac] ss:$16 sps:$4 sm:$0xff]   ;;  %v9205_v30 = vld [vmem:[#allocation8 + $0x4c8] ss:$16 sps:$4 sm:$0xff]  }
 0x247   : > { %3449 = vmatmul.mubr.bf16.gmra.mrb[68].mxu0 %v10552_v61  ;;  %3901 = vmatmul.mubr.bf16.gmra.mrb[68].mxu1 %v10552_v61  ;;  %v1579_v62 = vmax.f32 %v1372_v2, 0.0  ;;  %v1376_v20 = vadd.f32 %v1375_v54, %v10614_v40  ;;  %v1377_v1 = vpop.f32.mrb[43].mxu0  ;;  %v9192_v61 = vld [vmem:[#allocation8 + $0x484] ss:$16 sps:$4 sm:$0xff]   ;;  %v1484_v2 = vpop.f32.mrb[40].mxu1 }
 0x248   : > { %3524 = vmatpush1.bf16.msra.mxu0 %v9178_v34  ;;  %3976 = vmatpush1.bf16.msra.mxu1 %v9181_v35  ;;  %v1580_v7 = vmax.f32 %v1374_v53, 0.0  ;;  %v1378_v8 = vadd.f32 %v1377_v1, %v10618_v47  ;;  %v9193_v34 = vld [vmem:[#allocation8 + $0x488] ss:$16 sps:$4 sm:$0xff]   ;;  %v1485_v53 = vadd.f32 %v1484_v2, %v10637_v22  ;;  %v1486_v54 = vpop.f32.mrb[41].mxu1 }
 0x249   : > { %3525 = vmatprep.subr.bf16.mxu0 %v9186_v13  ;;  %3458 = vmatprep.mubr.bf16.mxu0 %v10567_v50  ;;  %v1587_v23 = vmax.f32 %v1376_v20, 0.0  ;;  %v9198_v13 = vld [vmem:[#allocation8 + $0x4a4] ss:$16 sps:$4 sm:$0xff]   ;;  %v1487_v20 = vadd.f32 %v1486_v54, %v10642_v51  ;;  %v1488_v1 = vpop.f32.mrb[42].mxu1 }
 0x24a   : > { %3910 = vmatprep.mubr.bf16.mxu1 %v10567_v50  ;;  %3977 = vmatprep.subr.bf16.mxu1 %v9189_v39  ;;  %v1588_v27 = vmax.f32 %v1378_v8, 0.0  ;;  %v1489_v8 = vadd.f32 %v1488_v1, %v10637_v22  ;;  %v1490_v9 = vpop.f32.mrb[43].mxu1 }
 0x24b   : > { %v10682_v12 = vpack.c.bf16 %v1587_v23, %v1579_v62 }
 0x24c   : > { %3526 = vmatpush1.bf16.msra.mxu0 %v9184_v59  ;;  %3978 = vmatpush1.bf16.msra.mxu1 %v9187_v5  ;;  %v10684_v35 = vpack.c.bf16 %v1588_v27, %v1580_v7  ;;  %v1381_v37 = vpop.f32.mrb[44].mxu0  ;;  %v1581_v7 = vmax.f32 %v1485_v53, 0.0  ;;  %v1589_v24 = vmax.f32 %v1489_v8, 0.0 }
 0x24d   : > { %3527 = vmatprep.subr.bf16.mxu0 %v9192_v61  ;;  %3979 = vmatprep.subr.bf16.mxu1 %v9195_v15  ;;  %v1382_v50 = vadd.f32 %v1381_v37, %v10614_v40  ;;  %v1383_v42 = vpop.f32.mrb[45].mxu0  ;;  %v1582_v61 = vmax.f32 %v1487_v20, 0.0  ;;  %v1491_v15 = vadd.f32 %v1490_v9, %v10642_v51 }
 0x24e   : > { %v1384_v46 = vadd.f32 %v1383_v42, %v10618_v47  ;;  %v1385_v39 = vpop.f32.mrb[46].mxu0  ;;  %v10706_v37 = vpack.c.bf16 %v1589_v24, %v1581_v7  ;;  %v1494_v2 = vpop.f32.mrb[44].mxu1 }
 0x24f   : > { %3459 = vmatmul.mubr.bf16.gmra.mrb[72].mxu0 %v10564_v31  ;;  %3911 = vmatmul.mubr.bf16.gmra.mrb[72].mxu1 %v10564_v31  ;;  %v1595_v57 = vmax.f32 %v1382_v50, 0.0  ;;  %v1386_v59 = vadd.f32 %v1385_v39, %v10614_v40  ;;  %v1387_v62 = vpop.f32.mrb[47].mxu0  ;;  %v9204_v31 = vld [vmem:[#allocation8 + $0x4c4] ss:$16 sps:$4 sm:$0xff]   ;;  %v1590_v27 = vmax.f32 %v1491_v15, 0.0  ;;  %v1495_v53 = vadd.f32 %v1494_v2, %v10637_v22  ;;  %v1496_v54 = vpop.f32.mrb[45].mxu1 }
 0x250   : > { %3528 = vmatpush1.bf16.msra.mxu0 %v9190_v33  ;;  %3980 = vmatpush1.bf16.msra.mxu1 %v9193_v34  ;;  %v1596_v4 = vmax.f32 %v1384_v46, 0.0  ;;  %v1388_v5 = vadd.f32 %v1387_v62, %v10618_v47  ;;  %v1497_v20 = vadd.f32 %v1496_v54, %v10642_v51  ;;  %v1498_v1 = vpop.f32.mrb[46].mxu1 }
 0x251   : > { %3529 = vmatprep.subr.bf16.mxu0 %v9198_v13  ;;  %3468 = vmatprep.mubr.bf16.mxu0 %v10579_v36  ;;  %v1603_v14 = vmax.f32 %v1386_v59, 0.0  ;;  %v9210_v13 = vld [vmem:[#allocation8 + $0x4e4] ss:$16 sps:$4 sm:$0xff]   ;;  %v10709_v42 = vpack.c.bf16 %v1590_v27, %v1582_v61  ;;  %v1597_v7 = vmax.f32 %v1495_v53, 0.0  ;;  %v1499_v8 = vadd.f32 %v1498_v1, %v10637_v22  ;;  %v1500_v9 = vpop.f32.mrb[47].mxu1 }
 0x252   : > { %3920 = vmatprep.mubr.bf16.mxu1 %v10579_v36  ;;  %3981 = vmatprep.subr.bf16.mxu1 %v9201_v38  ;;  %v1604_v23 = vmax.f32 %v1388_v5, 0.0  ;;  %v9213_v38 = vld [vmem:[#allocation8 + $0x4ec] ss:$16 sps:$4 sm:$0xff]   ;;  %v1501_v61 = vadd.f32 %v1500_v9, %v10642_v51 }
 0x253   : > { %v10702_v25 = vpack.c.bf16 %v1603_v14, %v1595_v57  ;;  %v1598_v14 = vmax.f32 %v1497_v20, 0.0 }
 0x254   : > { %3530 = vmatpush1.bf16.msra.mxu0 %v9196_v56  ;;  %3982 = vmatpush1.bf16.msra.mxu1 %v9199_v3  ;;  %v10704_v33 = vpack.c.bf16 %v1604_v23, %v1596_v4  ;;  %v1391_v34 = vpop.f32.mrb[48].mxu0  ;;  %v9208_v56 = vld [vmem:[#allocation8 + $0x4e0] ss:$16 sps:$4 sm:$0xff]   ;;  %v9211_v3 = vld [vmem:[#allocation8 + $0x4e8] ss:$16 sps:$4 sm:$0xff]   ;;  %v1605_v23 = vmax.f32 %v1499_v8, 0.0 }
 0x255   : > { %3531 = vmatprep.subr.bf16.mxu0 %v9204_v31  ;;  %3983 = vmatprep.subr.bf16.mxu1 %v9207_v11  ;;  %v1392_v36 = vadd.f32 %v1391_v34, %v10614_v40  ;;  %v1393_v50 = vpop.f32.mrb[49].mxu0  ;;  %v9219_v31 = vld [vmem:[#allocation8 + $0x50c] ss:$16 sps:$4 sm:$0xff]   ;;  %v1606_v27 = vmax.f32 %v1501_v61, 0.0 }
 0x256   : > { %v1394_v46 = vadd.f32 %v1393_v50, %v10618_v47  ;;  %v1395_v39 = vpop.f32.mrb[50].mxu0  ;;  %v9222_v50 = vld [vmem:[#allocation8 + $0x524] ss:$16 sps:$4 sm:$0xff]  }
 0x257   : > { %3469 = vmatmul.mubr.bf16.gmra.mrb[76].mxu0 %v10576_v60  ;;  %3921 = vmatmul.mubr.bf16.gmra.mrb[76].mxu1 %v10576_v60  ;;  %v1611_v57 = vmax.f32 %v1392_v36, 0.0  ;;  %v1396_v59 = vadd.f32 %v1395_v39, %v10614_v40  ;;  %v1397_v62 = vpop.f32.mrb[51].mxu0  ;;  %v9216_v60 = vld [vmem:[#allocation8 + $0x504] ss:$16 sps:$4 sm:$0xff]   ;;  %v10726_v36 = vpack.c.bf16 %v1605_v23, %v1597_v7  ;;  %v9225_v39 = vld [vmem:[#allocation8 + $0x52c] ss:$16 sps:$4 sm:$0xff]  }
 0x258   : > { %3532 = vmatpush1.bf16.msra.mxu0 %v9202_v29  ;;  %3984 = vmatpush1.bf16.msra.mxu1 %v9205_v30  ;;  %v1612_v4 = vmax.f32 %v1394_v46, 0.0  ;;  %v1398_v5 = vadd.f32 %v1397_v62, %v10618_v47  ;;  %v9214_v29 = vld [vmem:[#allocation8 + $0x500] ss:$16 sps:$4 sm:$0xff]   ;;  %v9217_v30 = vld [vmem:[#allocation8 + $0x508] ss:$16 sps:$4 sm:$0xff]   ;;  %v1504_v46 = vpop.f32.mrb[48].mxu1 }
 0x259   : > { %3533 = vmatprep.subr.bf16.mxu0 %v9210_v13  ;;  %3478 = vmatprep.mubr.bf16.mxu0 %v10591_v17  ;;  %v1619_v11 = vmax.f32 %v1396_v59, 0.0  ;;  %v9220_v59 = vld [vmem:[#allocation8 + $0x520] ss:$16 sps:$4 sm:$0xff]  }
 0x25a   : > { %3930 = vmatprep.mubr.bf16.mxu1 %v10591_v17  ;;  %3985 = vmatprep.subr.bf16.mxu1 %v9213_v38  ;;  %v1620_v15 = vmax.f32 %v1398_v5, 0.0  ;;  %v10729_v38 = vpack.c.bf16 %v1606_v27, %v1598_v14  ;;  %v9223_v5 = vld [vmem:[#allocation8 + $0x528] ss:$16 sps:$4 sm:$0xff]  }
 0x25b   : > { %v10722_v24 = vpack.c.bf16 %v1619_v11, %v1611_v57  ;;  %v1506_v57 = vpop.f32.mrb[49].mxu1  ;;  %v9231_v11 = vld [vmem:[#allocation8 + $0x54c] ss:$16 sps:$4 sm:$0xff]  }
 0x25c   : > { %3534 = vmatpush1.bf16.msra.mxu0 %v9208_v56  ;;  %3986 = vmatpush1.bf16.msra.mxu1 %v9211_v3  ;;  %v10724_v34 = vpack.c.bf16 %v1620_v15, %v1612_v4  ;;  %v1401_v13 = vpop.f32.mrb[52].mxu0  ;;  %v1505_v56 = vadd.f32 %v1504_v46, %v10637_v22  ;;  %v1507_v3 = vadd.f32 %v1506_v57, %v10642_v51  ;;  %v1508_v4 = vpop.f32.mrb[50].mxu1  ;;  %v9237_v57 = vld [vmem:[#allocation8 + $0x56c] ss:$16 sps:$4 sm:$0xff]  }
 0x25d   : > { %3535 = vmatprep.subr.bf16.mxu0 %v9216_v60  ;;  %3987 = vmatprep.subr.bf16.mxu1 %v9219_v31  ;;  %v1402_v17 = vadd.f32 %v1401_v13, %v10614_v40  ;;  %v1403_v2 = vpop.f32.mrb[53].mxu0  ;;  %v1509_v60 = vadd.f32 %v1508_v4, %v10637_v22  ;;  %v1510_v31 = vpop.f32.mrb[51].mxu1  ;;  %v9226_v13 = vld [vmem:[#allocation8 + $0x540] ss:$16 sps:$4 sm:$0xff]  }
 0x25e   : > { %v1404_v53 = vadd.f32 %v1403_v2, %v10618_v47  ;;  %v1405_v54 = vpop.f32.mrb[54].mxu0  ;;  %v1613_v9 = vmax.f32 %v1505_v56, 0.0  ;;  %v1614_v61 = vmax.f32 %v1507_v3, 0.0  ;;  %v1511_v15 = vadd.f32 %v1510_v31, %v10642_v51  ;;  %v1514_v56 = vpop.f32.mrb[52].mxu1  ;;  %v9232_v3 = vld [vmem:[#allocation8 + $0x560] ss:$16 sps:$4 sm:$0xff]  }
 0x25f   : > { %3479 = vmatmul.mubr.bf16.gmra.mrb[80].mxu0 %v10588_v10  ;;  %3931 = vmatmul.mubr.bf16.gmra.mrb[80].mxu1 %v10588_v10  ;;  %v1627_v62 = vmax.f32 %v1402_v17, 0.0  ;;  %v1406_v20 = vadd.f32 %v1405_v54, %v10614_v40  ;;  %v1407_v1 = vpop.f32.mrb[55].mxu0  ;;  %v9228_v10 = vld [vmem:[#allocation8 + $0x544] ss:$16 sps:$4 sm:$0xff]   ;;  %v1621_v27 = vmax.f32 %v1509_v60, 0.0 }
 0x260   : > { %3536 = vmatpush1.bf16.msra.mxu0 %v9214_v29  ;;  %3988 = vmatpush1.bf16.msra.mxu1 %v9217_v30  ;;  %v1628_v7 = vmax.f32 %v1404_v53, 0.0  ;;  %v1408_v8 = vadd.f32 %v1407_v1, %v10618_v47  ;;  %v1622_v30 = vmax.f32 %v1511_v15, 0.0  ;;  %v9234_v53 = vld [vmem:[#allocation8 + $0x564] ss:$16 sps:$4 sm:$0xff]   ;;  %v1516_v1 = vpop.f32.mrb[53].mxu1 }
 0x261   : > { %3537 = vmatprep.subr.bf16.mxu0 %v9222_v50  ;;  %3488 = vmatprep.mubr.bf16.mxu0 %v10604_v6  ;;  %v1635_v14 = vmax.f32 %v1406_v20, 0.0  ;;  %v9229_v50 = vld [vmem:[#allocation8 + $0x548] ss:$16 sps:$4 sm:$0xff]   ;;  %v10746_v46 = vpack.c.bf16 %v1621_v27, %v1613_v9  ;;  %v1515_v20 = vadd.f32 %v1514_v56, %v10637_v22  ;;  %v1518_v9 = vpop.f32.mrb[54].mxu1  ;;  %v9243_v15 = vld [vmem:[#allocation8 + $0x58c] ss:$16 sps:$4 sm:$0xff]  }
 0x262   : > { %3940 = vmatprep.mubr.bf16.mxu1 %v10604_v6  ;;  %3989 = vmatprep.subr.bf16.mxu1 %v9225_v39  ;;  %v1636_v23 = vmax.f32 %v1408_v8, 0.0  ;;  %v10749_v54 = vpack.c.bf16 %v1622_v30, %v1614_v61  ;;  %v1517_v8 = vadd.f32 %v1516_v1, %v10642_v51  ;;  %v9235_v60 = vld [vmem:[#allocation8 + $0x568] ss:$16 sps:$4 sm:$0xff]   ;;  %v1520_v61 = vpop.f32.mrb[55].mxu1 }
 0x263   : > { %v10742_v29 = vpack.c.bf16 %v1635_v14, %v1627_v62  ;;  %v1519_v14 = vadd.f32 %v1518_v9, %v10637_v22  ;;  %v1521_v30 = vadd.f32 %v1520_v61, %v10642_v51 }
 0x264   : > { %3538 = vmatpush1.bf16.msra.mxu0 %v9220_v59  ;;  %3990 = vmatpush1.bf16.msra.mxu1 %v9223_v5  ;;  %v10744_v17 = vpack.c.bf16 %v1636_v23, %v1628_v7  ;;  %v1411_v2 = vpop.f32.mrb[56].mxu0  ;;  %v1630_v27 = vmax.f32 %v1517_v8, 0.0 }
 0x265   : > { %3539 = vmatprep.subr.bf16.mxu0 %v9228_v10  ;;  %3991 = vmatprep.subr.bf16.mxu1 %v9231_v11  ;;  %v1412_v6 = vadd.f32 %v1411_v2, %v10614_v40  ;;  %v1413_v39 = vpop.f32.mrb[57].mxu0  ;;  %v1629_v11 = vmax.f32 %v1515_v20, 0.0  ;;  %v9246_v20 = vld [vmem:[#allocation8 + $0x5a4] ss:$16 sps:$4 sm:$0xff]  }
 0x266   : > { %v1414_v59 = vadd.f32 %v1413_v39, %v10618_v47  ;;  %v1415_v62 = vpop.f32.mrb[58].mxu0  ;;  %v9238_v39 = vld [vmem:[#allocation8 + $0x580] ss:$16 sps:$4 sm:$0xff]  }
 0x267   : > { %3489 = vmatmul.mubr.bf16.gmra.mrb[84].mxu0 %v10600_v63  ;;  %3941 = vmatmul.mubr.bf16.gmra.mrb[84].mxu1 %v10600_v63  ;;  %v1643_v4 = vmax.f32 %v1412_v6, 0.0  ;;  %v1416_v5 = vadd.f32 %v1415_v62, %v10614_v40  ;;  %v1417_v7 = vpop.f32.mrb[59].mxu0  ;;  %v9240_v63 = vld [vmem:[#allocation8 + $0x584] ss:$16 sps:$4 sm:$0xff]   ;;  %v1638_v6 = vmax.f32 %v1521_v30, 0.0 }
 0x268   : > { %3540 = vmatpush1.bf16.msra.mxu0 %v9226_v13  ;;  %3992 = vmatpush1.bf16.msra.mxu1 %v9229_v50  ;;  %v1644_v31 = vmax.f32 %v1414_v59, 0.0  ;;  %v1418_v10 = vadd.f32 %v1417_v7, %v10618_v47  ;;  %v1637_v50 = vmax.f32 %v1519_v14, 0.0 }
 0x269   : > { %3541 = vmatprep.subr.bf16.mxu0 %v9234_v53  ;;  %3498 = vmatprep.mubr.bf16.mxu0 %v10622_v58  ;;  %v1651_v23 = vmax.f32 %v1416_v5, 0.0  ;;  %v9241_v53 = vld [vmem:[#allocation8 + $0x588] ss:$16 sps:$4 sm:$0xff]   ;;  %v10769_v1 = vpack.c.bf16 %v1638_v6, %v1630_v27  ;;  %v9249_v5 = vld [vmem:[#allocation8 + $0x5ac] ss:$16 sps:$4 sm:$0xff]  }
 0x26a   : > { %3950 = vmatprep.mubr.bf16.mxu1 %v10622_v58  ;;  %3993 = vmatprep.subr.bf16.mxu1 %v9237_v57  ;;  %v1652_v13 = vmax.f32 %v1418_v10, 0.0  ;;  %v10766_v62 = vpack.c.bf16 %v1637_v50, %v1629_v11  ;;  %v9255_v50 = vld [vmem:[#allocation8 + $0x5cc] ss:$16 sps:$4 sm:$0xff]  }
 0x26b   : > { %v10762_v2 = vpack.c.bf16 %v1651_v23, %v1643_v4  ;;  %v1524_v4 = vpop.f32.mrb[56].mxu1 }
 0x26c   : > { %3542 = vmatpush1.bf16.msra.mxu0 %v9232_v3  ;;  %3994 = vmatpush1.bf16.msra.mxu1 %v9235_v60  ;;  %v10764_v56 = vpack.c.bf16 %v1652_v13, %v1644_v31  ;;  %v1421_v59 = vpop.f32.mrb[60].mxu0  ;;  %v1525_v8 = vadd.f32 %v1524_v4, %v10637_v22  ;;  %v1526_v9 = vpop.f32.mrb[57].mxu1  ;;  %v9244_v60 = vld [vmem:[#allocation8 + $0x5a0] ss:$16 sps:$4 sm:$0xff]  }
 0x26d   : > { %3543 = vmatprep.subr.bf16.mxu0 %v9240_v63  ;;  %3995 = vmatprep.subr.bf16.mxu1 %v9243_v15  ;;  %v1422_v58 = vadd.f32 %v1421_v59, %v10614_v40  ;;  %v1423_v57 = vpop.f32.mrb[61].mxu0  ;;  %v1527_v14 = vadd.f32 %v1526_v9, %v10642_v51  ;;  %v1528_v61 = vpop.f32.mrb[58].mxu1  ;;  %v9247_v63 = vld [vmem:[#allocation8 + $0x5a8] ss:$16 sps:$4 sm:$0xff]  }
 0x26e   : > { %v1424_v3 = vadd.f32 %v1423_v57, %v10618_v47  ;;  %v1425_v7 = vpop.f32.mrb[62].mxu0  ;;  %v1645_v27 = vmax.f32 %v1525_v8, 0.0  ;;  %v1529_v30 = vadd.f32 %v1528_v61, %v10637_v22  ;;  %v1530_v13 = vpop.f32.mrb[59].mxu1  ;;  %v9250_v57 = vld [vmem:[#allocation8 + $0x5c0] ss:$16 sps:$4 sm:$0xff]  }
 0x26f   : > { %3499 = vmatmul.mubr.bf16.gmra.mrb[88].mxu0 %v10620_v55  ;;  %3951 = vmatmul.mubr.bf16.gmra.mrb[88].mxu1 %v10620_v55  ;;  %v1659_v31 = vmax.f32 %v1422_v58, 0.0  ;;  %v1426_v10 = vadd.f32 %v1425_v7, %v10614_v40  ;;  %v1427_v11 = vpop.f32.mrb[63].mxu0  ;;  %v9252_v55 = vld [vmem:[#allocation8 + $0x5c4] ss:$16 sps:$4 sm:$0xff]   ;;  %v1646_v6 = vmax.f32 %v1527_v14, 0.0  ;;  %v1531_v59 = vadd.f32 %v1530_v13, %v10642_v51 }
 0x270   : > { %3544 = vmatpush1.bf16.msra.mxu0 %v9238_v39  ;;  %3996 = vmatpush1.bf16.msra.mxu1 %v9241_v53  ;;  %v1660_v15 = vmax.f32 %v1424_v3, 0.0  ;;  %v1428_v23 = vadd.f32 %v1427_v11, %v10618_v47  ;;  %v1653_v53 = vmax.f32 %v1529_v30, 0.0  ;;  %v9258_v7 = vld [vmem:[#allocation8 + $0x5e4] ss:$16 sps:$4 sm:$0xff]   ;;  %v9256_v11 = vld [vmem:[#allocation8 + $0x5e0] ss:$16 sps:$4 sm:$0xff]  }
 0x271   : > { %3545 = vmatprep.subr.bf16.mxu0 %v9246_v20  ;;  %3508 = vmatprep.mubr.bf16.mxu0 %v10648_v48  ;;  %v1667_v40 = vmax.f32 %v1426_v10, 0.0  ;;  %v1654_v47 = vmax.f32 %v1531_v59, 0.0  ;;  %v9253_v20 = vld [vmem:[#allocation8 + $0x5c8] ss:$16 sps:$4 sm:$0xff]  }
 0x272   : > { %3960 = vmatprep.mubr.bf16.mxu1 %v10648_v48  ;;  %3997 = vmatprep.subr.bf16.mxu1 %v9249_v5  ;;  %v1668_v39 = vmax.f32 %v1428_v23, 0.0  ;;  %v10786_v3 = vpack.c.bf16 %v1653_v53, %v1645_v27  ;;  %v1534_v48 = vpop.f32.mrb[60].mxu1  ;;  %v9261_v5 = vld [vmem:[#allocation8 + $0x5ec] ss:$16 sps:$4 sm:$0xff]   ;;  %v9259_v14 = vld [vmem:[#allocation8 + $0x5e8] ss:$16 sps:$4 sm:$0xff]  }
 0x273   : > { %v10782_v58 = vpack.c.bf16 %v1667_v40, %v1659_v31  ;;  %v10788_v8 = vpack.c.bf16 %v1654_v47, %v1646_v6  ;;  %v1535_v9 = vadd.f32 %v1534_v48, %v10637_v22  ;;  %v1536_v31 = vpop.f32.mrb[61].mxu1  ;;  %v9264_v23 = vld [vmem:[#allocation8 + $0x604] ss:$16 sps:$4 sm:$0xff]   ;;  %v9267_v27 = vld [vmem:[#allocation8 + $0x60c] ss:$16 sps:$4 sm:$0xff]  }
 0x274   : > { %3546 = vmatpush1.bf16.msra.mxu0 %v9244_v60  ;;  %3998 = vmatpush1.bf16.msra.mxu1 %v9247_v63  ;;  %v10784_v4 = vpack.c.bf16 %v1668_v39, %v1660_v15  ;;  %v1537_v60 = vadd.f32 %v1536_v31, %v10642_v51  ;;  %v1538_v10 = vpop.f32.mrb[62].mxu1  ;;  %v9265_v40 = vld [vmem:[#allocation8 + $0x608] ss:$16 sps:$4 sm:$0xff]   ;;  %v9273_v39 = vld [vmem:[#allocation8 + $0x62c] ss:$16 sps:$4 sm:$0xff]  }
 0x275   : > { %3547 = vmatprep.subr.bf16.mxu0 %v9252_v55  ;;  %3999 = vmatprep.subr.bf16.mxu1 %v9255_v50  ;;  %v1661_v61 = vmax.f32 %v1535_v9, 0.0  ;;  %v1539_v63 = vadd.f32 %v1538_v10, %v10637_v22  ;;  %v1540_v15 = vpop.f32.mrb[63].mxu1  ;;  %v9262_v50 = vld [vmem:[#allocation8 + $0x600] ss:$16 sps:$4 sm:$0xff]   ;;  %v9270_v22 = vld [vmem:[#allocation8 + $0x624] ss:$16 sps:$4 sm:$0xff]  }
 0x276   : > { %v1662_v30 = vmax.f32 %v1537_v60, 0.0  ;;  %v1541_v13 = vadd.f32 %v1540_v15, %v10642_v51  ;;  %v9268_v51 = vld [vmem:[#allocation8 + $0x620] ss:$16 sps:$4 sm:$0xff]   ;;  %v9276_v53 = vld [vmem:[#allocation8 + $0x644] ss:$16 sps:$4 sm:$0xff]  }
 0x277   : > { %3509 = vmatmul.mubr.bf16.gmra.mrb[92].mxu0 %v10644_v52  ;;  %3961 = vmatmul.mubr.bf16.gmra.mrb[92].mxu1 %v10644_v52  ;;  %v1669_v52 = vmax.f32 %v1539_v63, 0.0  ;;  %v9279_v47 = vld [vmem:[#allocation8 + $0x64c] ss:$16 sps:$4 sm:$0xff]   ;;  %v9280_v48 = vld [vmem:[#allocation8 + $0x660] ss:$16 sps:$4 sm:$0xff]  }
 0x278   : > { %3548 = vmatpush1.bf16.msra.mxu0 %v9250_v57  ;;  %4000 = vmatpush1.bf16.msra.mxu1 %v9253_v20  ;;  %v1670_v55 = vmax.f32 %v1541_v13, 0.0  ;;  %v9274_v57 = vld [vmem:[#allocation8 + $0x640] ss:$16 sps:$4 sm:$0xff]   ;;  %v9277_v20 = vld [vmem:[#allocation8 + $0x648] ss:$16 sps:$4 sm:$0xff]  }
 0x279   : > { %3549 = vmatprep.subr.bf16.mxu0 %v9258_v7  ;;  %3551 = vmatprep.mubr.bf16.mxu0 %v10646_v26  ;;  %v10798_v6 = vpack.c.bf16 %v1669_v52, %v1661_v61  ;;  %v9282_v7 = vld [vmem:[#allocation8 + $0x664] ss:$16 sps:$4 sm:$0xff]   ;;  %v9291_v9 = vld [vmem:[#allocation8 + $0x68c] ss:$16 sps:$4 sm:$0xff]   ;;  %v9286_v31 = vld [vmem:[#allocation8 + $0x680] ss:$16 sps:$4 sm:$0xff]  }
 0x27a   : > { %4001 = vmatprep.subr.bf16.mxu1 %v9261_v5  ;;  %4003 = vmatprep.mubr.bf16.mxu1 %v10646_v26  ;;  %v10800_v59 = vpack.c.bf16 %v1670_v55, %v1662_v30  ;;  %v9271_v26 = vld [vmem:[#allocation8 + $0x628] ss:$16 sps:$4 sm:$0xff]   ;;  %v9294_v10 = vld [vmem:[#allocation8 + $0x6a4] ss:$16 sps:$4 sm:$0xff]   ;;  %v9303_v61 = vld [vmem:[#allocation8 + $0x6cc] ss:$16 sps:$4 sm:$0xff]  }
 0x27b   : > { %v9283_v5 = vld [vmem:[#allocation8 + $0x668] ss:$16 sps:$4 sm:$0xff]   ;;  %v9298_v63 = vld [vmem:[#allocation8 + $0x6c0] ss:$16 sps:$4 sm:$0xff]   ;;  %v9315_v13 = vld [vmem:[#allocation8 + $0x70c] ss:$16 sps:$4 sm:$0xff]  }
 0x27c   : > { %3550 = vmatpush1.bf16.msra.mxu0 %v9256_v11  ;;  %4002 = vmatpush1.bf16.msra.mxu1 %v9259_v14  ;;  %v9289_v60 = vld [vmem:[#allocation8 + $0x688] ss:$16 sps:$4 sm:$0xff]   ;;  %v9292_v11 = vld [vmem:[#allocation8 + $0x6a0] ss:$16 sps:$4 sm:$0xff]  }
 0x27d   : > { %3632 = vmatprep.subr.bf16.mxu0 %v9264_v23  ;;  %4084 = vmatprep.subr.bf16.mxu1 %v9267_v27  ;;  %v9295_v14 = vld [vmem:[#allocation8 + $0x6a8] ss:$16 sps:$4 sm:$0xff]   ;;  %v9306_v23 = vld [vmem:[#allocation8 + $0x6e4] ss:$16 sps:$4 sm:$0xff]   ;;  %v9304_v27 = vld [vmem:[#allocation8 + $0x6e0] ss:$16 sps:$4 sm:$0xff]  }
 0x27e   : > { %v9301_v15 = vld [vmem:[#allocation8 + $0x6c8] ss:$16 sps:$4 sm:$0xff]   ;;  %v9310_v52 = vld [vmem:[#allocation8 + $0x700] ss:$16 sps:$4 sm:$0xff]  }
 0x27f   : > { %3552 = vmatmul.mubr.bf16.vlgmr.msra.gmra.mrb[64].mxu0 %v10639_v49  ;;  %4004 = vmatmul.mubr.bf16.vlgmr.msra.gmra.mrb[64].mxu1 %v10639_v49  ;;  %v9285_v49 = vld [vmem:[#allocation8 + $0x66c] ss:$16 sps:$4 sm:$0xff]   ;;  %v9307_v30 = vld [vmem:[#allocation8 + $0x6e8] ss:$16 sps:$4 sm:$0xff]  }
 0x280   : > { %3633 = vmatpush1.bf16.msra.mxu0 %v9262_v50  ;;  %4085 = vmatpush1.bf16.msra.mxu1 %v9265_v40  ;;  %v9313_v55 = vld [vmem:[#allocation8 + $0x708] ss:$16 sps:$4 sm:$0xff]   ;;  %v9318_v50 = vld [vmem:[#allocation8 + $0x724] ss:$16 sps:$4 sm:$0xff]   ;;  %v9316_v40 = vld [vmem:[#allocation8 + $0x720] ss:$16 sps:$4 sm:$0xff]  }
 0x281   : > { %3634 = vmatprep.subr.bf16.mxu0 %v9270_v22  ;;  %3561 = vmatprep.mubr.bf16.mxu0 %v10664_v18  ;;  %v9319_v22 = vld [vmem:[#allocation8 + $0x728] ss:$16 sps:$4 sm:$0xff]  }
 0x282   : > { %4013 = vmatprep.mubr.bf16.mxu1 %v10664_v18  ;;  %4086 = vmatprep.subr.bf16.mxu1 %v9273_v39  ;;  %v9288_v18 = vld [vmem:[#allocation8 + $0x684] ss:$16 sps:$4 sm:$0xff]   ;;  %v9327_v39 = vld [vmem:[#allocation8 + $0x74c] ss:$16 sps:$4 sm:$0xff]  }
 0x284   : > { %3635 = vmatpush1.bf16.msra.mxu0 %v9268_v51  ;;  %4087 = vmatpush1.bf16.msra.mxu1 %v9271_v26  ;;  %v9322_v51 = vld [vmem:[#allocation8 + $0x740] ss:$16 sps:$4 sm:$0xff]   ;;  %v9325_v26 = vld [vmem:[#allocation8 + $0x748] ss:$16 sps:$4 sm:$0xff]  }
 0x285   : > { %3636 = vmatprep.subr.bf16.mxu0 %v9276_v53  ;;  %4088 = vmatprep.subr.bf16.mxu1 %v9279_v47  ;;  %v9330_v53 = vld [vmem:[#allocation8 + $0x764] ss:$16 sps:$4 sm:$0xff]   ;;  %v9328_v47 = vld [vmem:[#allocation8 + $0x760] ss:$16 sps:$4 sm:$0xff]  }
 0x287   : > { %3562 = vmatmul.mubr.bf16.gmra.mrb[68].mxu0 %v10662_v41  ;;  %4014 = vmatmul.mubr.bf16.gmra.mrb[68].mxu1 %v10662_v41  ;;  %v9297_v41 = vld [vmem:[#allocation8 + $0x6ac] ss:$16 sps:$4 sm:$0xff]  }
 0x288   : > { %3637 = vmatpush1.bf16.msra.mxu0 %v9274_v57  ;;  %4089 = vmatpush1.bf16.msra.mxu1 %v9277_v20  ;;  %v9331_v57 = vld [vmem:[#allocation8 + $0x768] ss:$16 sps:$4 sm:$0xff]   ;;  %v9339_v20 = vld [vmem:[#allocation8 + $0x78c] ss:$16 sps:$4 sm:$0xff]  }
 0x289   : > { %3638 = vmatprep.subr.bf16.mxu0 %v9282_v7  ;;  %3571 = vmatprep.mubr.bf16.mxu0 %v10684_v35  ;;  %v9334_v7 = vld [vmem:[#allocation8 + $0x780] ss:$16 sps:$4 sm:$0xff]  }
 0x28a   : > { %4023 = vmatprep.mubr.bf16.mxu1 %v10684_v35  ;;  %4090 = vmatprep.subr.bf16.mxu1 %v9285_v49  ;;  %v9300_v35 = vld [vmem:[#allocation8 + $0x6c4] ss:$16 sps:$4 sm:$0xff]   ;;  %v9337_v49 = vld [vmem:[#allocation8 + $0x788] ss:$16 sps:$4 sm:$0xff]  }
 0x28c   : > { %3639 = vmatpush1.bf16.msra.mxu0 %v9280_v48  ;;  %4091 = vmatpush1.bf16.msra.mxu1 %v9283_v5  ;;  %v9342_v48 = vld [vmem:[#allocation8 + $0x7a4] ss:$16 sps:$4 sm:$0xff]   ;;  %v9340_v5 = vld [vmem:[#allocation8 + $0x7a0] ss:$16 sps:$4 sm:$0xff]  }
 0x28d   : > { %3640 = vmatprep.subr.bf16.mxu0 %v9288_v18  ;;  %4092 = vmatprep.subr.bf16.mxu1 %v9291_v9  ;;  %v9343_v18 = vld [vmem:[#allocation8 + $0x7a8] ss:$16 sps:$4 sm:$0xff]   ;;  %v9351_v9 = vld [vmem:[#allocation8 + $0x7cc] ss:$16 sps:$4 sm:$0xff]  }
 0x28f   : > { %3572 = vmatmul.mubr.bf16.gmra.mrb[72].mxu0 %v10682_v12  ;;  %4024 = vmatmul.mubr.bf16.gmra.mrb[72].mxu1 %v10682_v12  ;;  %v9309_v12 = vld [vmem:[#allocation8 + $0x6ec] ss:$16 sps:$4 sm:$0xff]  }
 0x290   : > { %3641 = vmatpush1.bf16.msra.mxu0 %v9286_v31  ;;  %4093 = vmatpush1.bf16.msra.mxu1 %v9289_v60  ;;  %v9346_v31 = vld [vmem:[#allocation8 + $0x7c0] ss:$16 sps:$4 sm:$0xff]   ;;  %v9349_v60 = vld [vmem:[#allocation8 + $0x7c8] ss:$16 sps:$4 sm:$0xff]  }
 0x291   : > { %3642 = vmatprep.subr.bf16.mxu0 %v9294_v10  ;;  %3581 = vmatprep.mubr.bf16.mxu0 %v10704_v33  ;;  %v9354_v10 = vld [vmem:[#allocation8 + $0x7e4] ss:$16 sps:$4 sm:$0xff]  }
 0x292   : > { %4033 = vmatprep.mubr.bf16.mxu1 %v10704_v33  ;;  %4094 = vmatprep.subr.bf16.mxu1 %v9297_v41  ;;  %v9312_v33 = vld [vmem:[#allocation8 + $0x704] ss:$16 sps:$4 sm:$0xff]   ;;  %v9352_v41 = vld [vmem:[#allocation8 + $0x7e0] ss:$16 sps:$4 sm:$0xff]  }
 0x294   : > { %3643 = vmatpush1.bf16.msra.mxu0 %v9292_v11  ;;  %4095 = vmatpush1.bf16.msra.mxu1 %v9295_v14  ;;  %v9355_v11 = vld [vmem:[#allocation8 + $0x7e8] ss:$16 sps:$4 sm:$0xff]   ;;  %v9363_v14 = vld [vmem:[#allocation10 + $0xc] ss:$16 sps:$4 sm:$0xff]  }
 0x295   : > { %3644 = vmatprep.subr.bf16.mxu0 %v9300_v35  ;;  %4096 = vmatprep.subr.bf16.mxu1 %v9303_v61  ;;  %v9358_v35 = vld [vmem:[#allocation10] ss:$16 sps:$4 sm:$0xff]   ;;  %v9361_v61 = vld [vmem:[#allocation10 + $0x8] ss:$16 sps:$4 sm:$0xff]  }
 0x297   : > { %3582 = vmatmul.mubr.bf16.gmra.mrb[76].mxu0 %v10702_v25  ;;  %4034 = vmatmul.mubr.bf16.gmra.mrb[76].mxu1 %v10702_v25  ;;  %v9321_v25 = vld [vmem:[#allocation8 + $0x72c] ss:$16 sps:$4 sm:$0xff]  }
 0x298   : > { %3645 = vmatpush1.bf16.msra.mxu0 %v9298_v63  ;;  %4097 = vmatpush1.bf16.msra.mxu1 %v9301_v15  ;;  %v9366_v63 = vld [vmem:[#allocation10 + $0x24] ss:$16 sps:$4 sm:$0xff]   ;;  %v9364_v15 = vld [vmem:[#allocation10 + $0x20] ss:$16 sps:$4 sm:$0xff]  }
 0x299   : > { %3646 = vmatprep.subr.bf16.mxu0 %v9306_v23  ;;  %3591 = vmatprep.mubr.bf16.mxu0 %v10724_v34  ;;  %v9372_v23 = vld [vmem:[#allocation10 + $0x44] ss:$16 sps:$4 sm:$0xff]  }
 0x29a   : > { %4043 = vmatprep.mubr.bf16.mxu1 %v10724_v34  ;;  %4098 = vmatprep.subr.bf16.mxu1 %v9309_v12  ;;  %v9324_v34 = vld [vmem:[#allocation8 + $0x744] ss:$16 sps:$4 sm:$0xff]   ;;  %v9375_v12 = vld [vmem:[#allocation10 + $0x4c] ss:$16 sps:$4 sm:$0xff]  }
 0x29c   : > { %3647 = vmatpush1.bf16.msra.mxu0 %v9304_v27  ;;  %4099 = vmatpush1.bf16.msra.mxu1 %v9307_v30  ;;  %v9370_v27 = vld [vmem:[#allocation10 + $0x40] ss:$16 sps:$4 sm:$0xff]   ;;  %v9373_v30 = vld [vmem:[#allocation10 + $0x48] ss:$16 sps:$4 sm:$0xff]  }
 0x29d   : > { %3648 = vmatprep.subr.bf16.mxu0 %v9312_v33  ;;  %4100 = vmatprep.subr.bf16.mxu1 %v9315_v13  ;;  %v9378_v33 = vld [vmem:[#allocation10 + $0x64] ss:$16 sps:$4 sm:$0xff]   ;;  %v9379_v13 = vld [vmem:[#allocation10 + $0x68] ss:$16 sps:$4 sm:$0xff]  }
 0x29f   : > { %3592 = vmatmul.mubr.bf16.gmra.mrb[80].mxu0 %v10722_v24  ;;  %4044 = vmatmul.mubr.bf16.gmra.mrb[80].mxu1 %v10722_v24  ;;  %v9333_v24 = vld [vmem:[#allocation8 + $0x76c] ss:$16 sps:$4 sm:$0xff]  }
 0x2a0   : > { %3649 = vmatpush1.bf16.msra.mxu0 %v9310_v52  ;;  %4101 = vmatpush1.bf16.msra.mxu1 %v9313_v55  ;;  %v9384_v52 = vld [vmem:[#allocation10 + $0x84] ss:$16 sps:$4 sm:$0xff]   ;;  %v9387_v55 = vld [vmem:[#allocation10 + $0x8c] ss:$16 sps:$4 sm:$0xff]  }
 0x2a1   : > { %3650 = vmatprep.subr.bf16.mxu0 %v9318_v50  ;;  %3601 = vmatprep.mubr.bf16.mxu0 %v10744_v17  ;;  %v9382_v50 = vld [vmem:[#allocation10 + $0x80] ss:$16 sps:$4 sm:$0xff]  }
 0x2a2   : > { %4053 = vmatprep.mubr.bf16.mxu1 %v10744_v17  ;;  %4102 = vmatprep.subr.bf16.mxu1 %v9321_v25  ;;  %v9336_v17 = vld [vmem:[#allocation8 + $0x784] ss:$16 sps:$4 sm:$0xff]   ;;  %v9385_v25 = vld [vmem:[#allocation10 + $0x88] ss:$16 sps:$4 sm:$0xff]  }
 0x2a4   : > { %3651 = vmatpush1.bf16.msra.mxu0 %v9316_v40  ;;  %4103 = vmatpush1.bf16.msra.mxu1 %v9319_v22  ;;  %v9390_v40 = vld [vmem:[#allocation10 + $0xa4] ss:$16 sps:$4 sm:$0xff]   ;;  %v9391_v22 = vld [vmem:[#allocation10 + $0xa8] ss:$16 sps:$4 sm:$0xff]  }
 0x2a5   : > { %3652 = vmatprep.subr.bf16.mxu0 %v9324_v34  ;;  %4104 = vmatprep.subr.bf16.mxu1 %v9327_v39  ;;  %v9396_v34 = vld [vmem:[#allocation10 + $0xc4] ss:$16 sps:$4 sm:$0xff]   ;;  %v9399_v39 = vld [vmem:[#allocation10 + $0xcc] ss:$16 sps:$4 sm:$0xff]  }
 0x2a7   : > { %3602 = vmatmul.mubr.bf16.gmra.mrb[84].mxu0 %v10742_v29  ;;  %4054 = vmatmul.mubr.bf16.gmra.mrb[84].mxu1 %v10742_v29  ;;  %v9345_v29 = vld [vmem:[#allocation8 + $0x7ac] ss:$16 sps:$4 sm:$0xff]  }
 0x2a8   : > { %3653 = vmatpush1.bf16.msra.mxu0 %v9322_v51  ;;  %4105 = vmatpush1.bf16.msra.mxu1 %v9325_v26  ;;  %v9394_v51 = vld [vmem:[#allocation10 + $0xc0] ss:$16 sps:$4 sm:$0xff]   ;;  %v9397_v26 = vld [vmem:[#allocation10 + $0xc8] ss:$16 sps:$4 sm:$0xff]  }
 0x2a9   : > { %3654 = vmatprep.subr.bf16.mxu0 %v9330_v53  ;;  %3611 = vmatprep.mubr.bf16.mxu0 %v10764_v56  ;;  %v9402_v53 = vld [vmem:[#allocation10 + $0xe4] ss:$16 sps:$4 sm:$0xff]  }
 0x2aa   : > { %4063 = vmatprep.mubr.bf16.mxu1 %v10764_v56  ;;  %4106 = vmatprep.subr.bf16.mxu1 %v9333_v24  ;;  %v9348_v56 = vld [vmem:[#allocation8 + $0x7c4] ss:$16 sps:$4 sm:$0xff]   ;;  %v9403_v24 = vld [vmem:[#allocation10 + $0xe8] ss:$16 sps:$4 sm:$0xff]  }
 0x2ac   : > { %3655 = vmatpush1.bf16.msra.mxu0 %v9328_v47  ;;  %4107 = vmatpush1.bf16.msra.mxu1 %v9331_v57  ;;  %v9408_v47 = vld [vmem:[#allocation10 + $0x104] ss:$16 sps:$4 sm:$0xff]   ;;  %v9411_v57 = vld [vmem:[#allocation10 + $0x10c] ss:$16 sps:$4 sm:$0xff]  }
 0x2ad   : > { %3656 = vmatprep.subr.bf16.mxu0 %v9336_v17  ;;  %4108 = vmatprep.subr.bf16.mxu1 %v9339_v20  ;;  %v9406_v17 = vld [vmem:[#allocation10 + $0x100] ss:$16 sps:$4 sm:$0xff]   ;;  %v9409_v20 = vld [vmem:[#allocation10 + $0x108] ss:$16 sps:$4 sm:$0xff]  }
 0x2af   : > { %3612 = vmatmul.mubr.bf16.gmra.mrb[88].mxu0 %v10762_v2  ;;  %4064 = vmatmul.mubr.bf16.gmra.mrb[88].mxu1 %v10762_v2  ;;  %v9357_v2 = vld [vmem:[#allocation8 + $0x7ec] ss:$16 sps:$4 sm:$0xff]  }
 0x2b0   : > { %3657 = vmatpush1.bf16.msra.mxu0 %v9334_v7  ;;  %4109 = vmatpush1.bf16.msra.mxu1 %v9337_v49  ;;  %v9414_v7 = vld [vmem:[#allocation10 + $0x124] ss:$16 sps:$4 sm:$0xff]   ;;  %v9415_v49 = vld [vmem:[#allocation10 + $0x128] ss:$16 sps:$4 sm:$0xff]  }
 0x2b1   : > { %3658 = vmatprep.subr.bf16.mxu0 %v9342_v48  ;;  %3621 = vmatprep.mubr.bf16.mxu0 %v10784_v4  ;;  %v9420_v48 = vld [vmem:[#allocation10 + $0x144] ss:$16 sps:$4 sm:$0xff]  }
 0x2b2   : > { %4073 = vmatprep.mubr.bf16.mxu1 %v10784_v4  ;;  %4110 = vmatprep.subr.bf16.mxu1 %v9345_v29  ;;  %v9360_v4 = vld [vmem:[#allocation10 + $0x4] ss:$16 sps:$4 sm:$0xff]   ;;  %v9423_v29 = vld [vmem:[#allocation10 + $0x14c] ss:$16 sps:$4 sm:$0xff]  }
 0x2b4   : > { %3659 = vmatpush1.bf16.msra.mxu0 %v9340_v5  ;;  %4111 = vmatpush1.bf16.msra.mxu1 %v9343_v18  ;;  %v9418_v5 = vld [vmem:[#allocation10 + $0x140] ss:$16 sps:$4 sm:$0xff]   ;;  %v9421_v18 = vld [vmem:[#allocation10 + $0x148] ss:$16 sps:$4 sm:$0xff]  }
 0x2b5   : > { %3660 = vmatprep.subr.bf16.mxu0 %v9348_v56  ;;  %4112 = vmatprep.subr.bf16.mxu1 %v9351_v9  ;;  %v9426_v56 = vld [vmem:[#allocation10 + $0x164] ss:$16 sps:$4 sm:$0xff]   ;;  %v9427_v9 = vld [vmem:[#allocation10 + $0x168] ss:$16 sps:$4 sm:$0xff]  }
 0x2b7   : > { %3622 = vmatmul.mubr.bf16.gmra.mrb[92].mxu0 %v10782_v58  ;;  %4074 = vmatmul.mubr.bf16.gmra.mrb[92].mxu1 %v10782_v58  ;;  %v9369_v58 = vld [vmem:[#allocation10 + $0x2c] ss:$16 sps:$4 sm:$0xff]  }
 0x2b8   : > { %3661 = vmatpush1.bf16.msra.mxu0 %v9346_v31  ;;  %4113 = vmatpush1.bf16.msra.mxu1 %v9349_v60  ;;  %v9432_v31 = vld [vmem:[#allocation10 + $0x184] ss:$16 sps:$4 sm:$0xff]   ;;  %v9435_v60 = vld [vmem:[#allocation10 + $0x18c] ss:$16 sps:$4 sm:$0xff]  }
 0x2b9   : > { %3662 = vmatprep.subr.bf16.mxu0 %v9354_v10  ;;  %3664 = vmatprep.mubr.bf16.mxu0 %v10669_v45  ;;  %v9430_v10 = vld [vmem:[#allocation10 + $0x180] ss:$16 sps:$4 sm:$0xff]  }
 0x2ba   : > { %4114 = vmatprep.subr.bf16.mxu1 %v9357_v2  ;;  %4116 = vmatprep.mubr.bf16.mxu1 %v10669_v45  ;;  %v9367_v45 = vld [vmem:[#allocation10 + $0x28] ss:$16 sps:$4 sm:$0xff]  }
 0x2bb   : > { %v9433_v2 = vld [vmem:[#allocation10 + $0x188] ss:$16 sps:$4 sm:$0xff]  }
 0x2bc   : > { %3663 = vmatpush1.bf16.msra.mxu0 %v9352_v41  ;;  %4115 = vmatpush1.bf16.msra.mxu1 %v9355_v11  ;;  %v9438_v41 = vld [vmem:[#allocation10 + $0x1a4] ss:$16 sps:$4 sm:$0xff]   ;;  %v9439_v11 = vld [vmem:[#allocation10 + $0x1a8] ss:$16 sps:$4 sm:$0xff]  }
 0x2bd   : > { %5083 = vmatprep.subr.bf16.mxu0 %v9360_v4  ;;  %5309 = vmatprep.subr.bf16.mxu1 %v9363_v14  ;;  %v9444_v4 = vld [vmem:[#allocation10 + $0x1c4] ss:$16 sps:$4 sm:$0xff]   ;;  %v9447_v14 = vld [vmem:[#allocation10 + $0x1cc] ss:$16 sps:$4 sm:$0xff]  }
 0x2bf   : > { %3665 = vmatmul.mubr.bf16.vlgmr.msra.gmra.mrb[64].mxu0 %v10666_v44  ;;  %4117 = vmatmul.mubr.bf16.vlgmr.msra.gmra.mrb[64].mxu1 %v10666_v44  ;;  %v9381_v44 = vld [vmem:[#allocation10 + $0x6c] ss:$16 sps:$4 sm:$0xff]  }
 0x2c0   : > { %3674 = vmatprep.mubr.bf16.mxu0 %v10689_v43  ;;  %4126 = vmatprep.mubr.bf16.mxu1 %v10689_v43  ;;  %v9376_v43 = vld [vmem:[#allocation10 + $0x60] ss:$16 sps:$4 sm:$0xff]  }
 0x2c1   : > { %5084 = vmatpush1.bf16.msra.mxu0 %v9358_v35  ;;  %5310 = vmatpush1.bf16.msra.mxu1 %v9361_v61  ;;  %v9442_v35 = vld [vmem:[#allocation10 + $0x1c0] ss:$16 sps:$4 sm:$0xff]   ;;  %v9453_v61 = vld [vmem:[#allocation10 + $0x1ec] ss:$16 sps:$4 sm:$0xff]  }
 0x2c2   : > { %5085 = vmatprep.subr.bf16.mxu0 %v9366_v63  ;;  %5311 = vmatprep.subr.bf16.mxu1 %v9369_v58  ;;  %v9448_v63 = vld [vmem:[#allocation10 + $0x1e0] ss:$16 sps:$4 sm:$0xff]   ;;  %v9451_v58 = vld [vmem:[#allocation10 + $0x1e8] ss:$16 sps:$4 sm:$0xff]  }
 0x2c5   : > { %5086 = vmatpush1.bf16.msra.mxu0 %v9364_v15  ;;  %5312 = vmatpush1.bf16.msra.mxu1 %v9367_v45  ;;  %v9456_v15 = vld [vmem:[#allocation10 + $0x204] ss:$16 sps:$4 sm:$0xff]   ;;  %v9459_v45 = vld [vmem:[#allocation10 + $0x20c] ss:$16 sps:$4 sm:$0xff]  }
 0x2c6   : > { %5087 = vmatprep.subr.bf16.mxu0 %v9372_v23  ;;  %5313 = vmatprep.subr.bf16.mxu1 %v9375_v12 }
 0x2c7   : > { %3675 = vmatmul.mubr.bf16.gmra.mrb[68].mxu0 %v10686_v16  ;;  %4127 = vmatmul.mubr.bf16.gmra.mrb[68].mxu1 %v10686_v16  ;;  %v9393_v16 = vld [vmem:[#allocation10 + $0xac] ss:$16 sps:$4 sm:$0xff]  }
 0x2c8   : > { %3684 = vmatprep.mubr.bf16.mxu0 %v10709_v42  ;;  %4136 = vmatprep.mubr.bf16.mxu1 %v10709_v42  ;;  %v9388_v42 = vld [vmem:[#allocation10 + $0xa0] ss:$16 sps:$4 sm:$0xff]  }
 0x2c9   : > { %5088 = vmatpush1.bf16.msra.mxu0 %v9370_v27  ;;  %5314 = vmatpush1.bf16.msra.mxu1 %v9373_v30 }
 0x2ca   : > { %5089 = vmatprep.subr.bf16.mxu0 %v9378_v33  ;;  %5315 = vmatprep.subr.bf16.mxu1 %v9381_v44 }
 0x2cd   : > { %5090 = vmatpush1.bf16.msra.mxu0 %v9376_v43  ;;  %5316 = vmatpush1.bf16.msra.mxu1 %v9379_v13 }
 0x2ce   : > { %5091 = vmatprep.subr.bf16.mxu0 %v9384_v52  ;;  %5317 = vmatprep.subr.bf16.mxu1 %v9387_v55 }
 0x2cf   : > { %3685 = vmatmul.mubr.bf16.gmra.mrb[72].mxu0 %v10706_v37  ;;  %4137 = vmatmul.mubr.bf16.gmra.mrb[72].mxu1 %v10706_v37  ;;  %v9405_v37 = vld [vmem:[#allocation10 + $0xec] ss:$16 sps:$4 sm:$0xff]  }
 0x2d0   : > { %3694 = vmatprep.mubr.bf16.mxu0 %v10729_v38  ;;  %4146 = vmatprep.mubr.bf16.mxu1 %v10729_v38  ;;  %v9400_v38 = vld [vmem:[#allocation10 + $0xe0] ss:$16 sps:$4 sm:$0xff]  }
 0x2d1   : > { %5092 = vmatpush1.bf16.msra.mxu0 %v9382_v50  ;;  %5318 = vmatpush1.bf16.msra.mxu1 %v9385_v25 }
 0x2d2   : > { %5093 = vmatprep.subr.bf16.mxu0 %v9390_v40  ;;  %5319 = vmatprep.subr.bf16.mxu1 %v9393_v16 }
 0x2d5   : > { %5094 = vmatpush1.bf16.msra.mxu0 %v9388_v42  ;;  %5320 = vmatpush1.bf16.msra.mxu1 %v9391_v22 }
 0x2d6   : > { %5095 = vmatprep.subr.bf16.mxu0 %v9396_v34  ;;  %5321 = vmatprep.subr.bf16.mxu1 %v9399_v39 }
 0x2d7   : > { %3695 = vmatmul.mubr.bf16.gmra.mrb[76].mxu0 %v10726_v36  ;;  %4147 = vmatmul.mubr.bf16.gmra.mrb[76].mxu1 %v10726_v36  ;;  %v9417_v36 = vld [vmem:[#allocation10 + $0x12c] ss:$16 sps:$4 sm:$0xff]  }
 0x2d8   : > { %3704 = vmatprep.mubr.bf16.mxu0 %v10749_v54  ;;  %4156 = vmatprep.mubr.bf16.mxu1 %v10749_v54  ;;  %v9412_v54 = vld [vmem:[#allocation10 + $0x120] ss:$16 sps:$4 sm:$0xff]  }
 0x2d9   : > { %5096 = vmatpush1.bf16.msra.mxu0 %v9394_v51  ;;  %5322 = vmatpush1.bf16.msra.mxu1 %v9397_v26 }
 0x2da   : > { %5097 = vmatprep.subr.bf16.mxu0 %v9402_v53  ;;  %5323 = vmatprep.subr.bf16.mxu1 %v9405_v37 }
 0x2dd   : > { %5098 = vmatpush1.bf16.msra.mxu0 %v9400_v38  ;;  %5324 = vmatpush1.bf16.msra.mxu1 %v9403_v24 }
 0x2de   : > { %5099 = vmatprep.subr.bf16.mxu0 %v9408_v47  ;;  %5325 = vmatprep.subr.bf16.mxu1 %v9411_v57 }
 0x2df   : > { %3705 = vmatmul.mubr.bf16.gmra.mrb[80].mxu0 %v10746_v46  ;;  %4157 = vmatmul.mubr.bf16.gmra.mrb[80].mxu1 %v10746_v46  ;;  %v9429_v46 = vld [vmem:[#allocation10 + $0x16c] ss:$16 sps:$4 sm:$0xff]  }
 0x2e0   : > { %3714 = vmatprep.mubr.bf16.mxu0 %v10769_v1  ;;  %4166 = vmatprep.mubr.bf16.mxu1 %v10769_v1  ;;  %v9424_v1 = vld [vmem:[#allocation10 + $0x160] ss:$16 sps:$4 sm:$0xff]  }
 0x2e1   : > { %5100 = vmatpush1.bf16.msra.mxu0 %v9406_v17  ;;  %5326 = vmatpush1.bf16.msra.mxu1 %v9409_v20 }
 0x2e2   : > { %5101 = vmatprep.subr.bf16.mxu0 %v9414_v7  ;;  %5327 = vmatprep.subr.bf16.mxu1 %v9417_v36 }
 0x2e5   : > { %5102 = vmatpush1.bf16.msra.mxu0 %v9412_v54  ;;  %5328 = vmatpush1.bf16.msra.mxu1 %v9415_v49 }
 0x2e6   : > { %5103 = vmatprep.subr.bf16.mxu0 %v9420_v48  ;;  %5329 = vmatprep.subr.bf16.mxu1 %v9423_v29 }
 0x2e7   : > { %3715 = vmatmul.mubr.bf16.gmra.mrb[84].mxu0 %v10766_v62  ;;  %4167 = vmatmul.mubr.bf16.gmra.mrb[84].mxu1 %v10766_v62  ;;  %v9441_v62 = vld [vmem:[#allocation10 + $0x1ac] ss:$16 sps:$4 sm:$0xff]  }
 0x2e8   : > { %3724 = vmatprep.mubr.bf16.mxu0 %v10788_v8  ;;  %4176 = vmatprep.mubr.bf16.mxu1 %v10788_v8  ;;  %v9436_v8 = vld [vmem:[#allocation10 + $0x1a0] ss:$16 sps:$4 sm:$0xff]  }
 0x2e9   : > { %5104 = vmatpush1.bf16.msra.mxu0 %v9418_v5  ;;  %5330 = vmatpush1.bf16.msra.mxu1 %v9421_v18  ;;  %v9454_v5 = vld [vmem:[#allocation10 + $0x200] ss:$16 sps:$4 sm:$0xff]   ;;  %v9457_v18 = vld [vmem:[#allocation10 + $0x208] ss:$16 sps:$4 sm:$0xff]  }
 0x2ea   : > { %5105 = vmatprep.subr.bf16.mxu0 %v9426_v56  ;;  %5331 = vmatprep.subr.bf16.mxu1 %v9429_v46 }
 0x2ed   : > { %5106 = vmatpush1.bf16.msra.mxu0 %v9424_v1  ;;  %5332 = vmatpush1.bf16.msra.mxu1 %v9427_v9 }
 0x2ee   : > { %5107 = vmatprep.subr.bf16.mxu0 %v9432_v31  ;;  %5333 = vmatprep.subr.bf16.mxu1 %v9435_v60  ;;  %v9462_v31 = vld [vmem:[#allocation10 + $0x224] ss:$16 sps:$4 sm:$0xff]   ;;  %v9465_v60 = vld [vmem:[#allocation10 + $0x22c] ss:$16 sps:$4 sm:$0xff]  }
 0x2ef   : > { %3725 = vmatmul.mubr.bf16.gmra.mrb[88].mxu0 %v10786_v3  ;;  %4177 = vmatmul.mubr.bf16.gmra.mrb[88].mxu1 %v10786_v3  ;;  %v9445_v3 = vld [vmem:[#allocation10 + $0x1c8] ss:$16 sps:$4 sm:$0xff]  }
 0x2f0   : > { %3734 = vmatprep.mubr.bf16.mxu0 %v10800_v59  ;;  %4186 = vmatprep.mubr.bf16.mxu1 %v10800_v59  ;;  %v9450_v59 = vld [vmem:[#allocation10 + $0x1e4] ss:$16 sps:$4 sm:$0xff]  }
 0x2f1   : > { %5108 = vmatpush1.bf16.msra.mxu0 %v9430_v10  ;;  %5334 = vmatpush1.bf16.msra.mxu1 %v9433_v2 }
 0x2f2   : > { %5109 = vmatprep.subr.bf16.mxu0 %v9438_v41  ;;  %5335 = vmatprep.subr.bf16.mxu1 %v9441_v62 }
 0x2f5   : > { %5110 = vmatpush1.bf16.msra.mxu0 %v9436_v8  ;;  %5336 = vmatpush1.bf16.msra.mxu1 %v9439_v11 }
 0x2f6   : > { %5111 = vmatprep.subr.bf16.mxu0 %v9444_v4  ;;  %5337 = vmatprep.subr.bf16.mxu1 %v9447_v14 }
 0x2f7   : > { %3735 = vmatmul.mubr.bf16.gmra.mrb[92].mxu0 %v10798_v6  ;;  %4187 = vmatmul.mubr.bf16.gmra.mrb[92].mxu1 %v10798_v6  ;;  %v1991_v6 = vld [vmem:[%s11342_s4] sm:$0xf] }
 0x2f8   : > { %v10868_v23 = vrot.slane %v1991_v6, %v10499_v19  ;;  %v10871_v12 = vrot.slane %v1991_v6, %v10517_v28  ;;  %v10874_v27 = vrot.slane %v1991_v6, %v10504_v21  ;;  %v10877_v30 = vrot.slane %v1991_v6, %v10521_v32 }
 0x2f9   : > { %5112 = vmatpush1.bf16.msra.mxu0 %v9442_v35  ;;  %5338 = vmatpush1.bf16.msra.mxu1 %v9445_v3 }
 0x2fa   : > { %5113 = vmatprep.subr.bf16.mxu0 %v9450_v59  ;;  %5339 = vmatprep.subr.bf16.mxu1 %v9453_v61  ;;  %v9460_v59 = vld [vmem:[#allocation10 + $0x220] ss:$16 sps:$4 sm:$0xff]   ;;  %v9463_v61 = vld [vmem:[#allocation10 + $0x228] ss:$16 sps:$4 sm:$0xff]  }
 0x2fd   : > { %5114 = vmatpush1.bf16.msra.mxu0 %v9448_v63  ;;  %5340 = vmatpush1.bf16.msra.mxu1 %v9451_v58  ;;  %v9468_v63 = vld [vmem:[#allocation10 + $0x244] ss:$16 sps:$4 sm:$0xff]  }
 0x2fe   : > { %5196 = vmatprep.subr.bf16.mxu0 %v9456_v15  ;;  %5422 = vmatprep.subr.bf16.mxu1 %v9459_v45 }
 0x392   : > { %v3666_v33 = vpop.f32.mrb[64].mxu0  ;;  %v4118_v44 = vpop.f32.mrb[64].mxu1 }
 0x393   : > { %v8451_v43 = vadd.f32 %v3666_v33, %v10868_v23  ;;  %v8483_v13 = vadd.f32 %v4118_v44, %v10871_v12  ;;  %v3668_v52 = vpop.f32.mrb[65].mxu0  ;;  %v4120_v55 = vpop.f32.mrb[65].mxu1  ;;  %v9471_v33 = vld [vmem:[#allocation10 + $0x24c] ss:$16 sps:$4 sm:$0xff]  }
 0x394   : > { %v8452_v50 = vadd.f32 %v3668_v52, %v10874_v27  ;;  %v8484_v25 = vadd.f32 %v4120_v55, %v10877_v30  ;;  %v3670_v40 = vpop.f32.mrb[66].mxu0  ;;  %v4122_v16 = vpop.f32.mrb[66].mxu1 }
 0x395   : > { %v8453_v42 = vadd.f32 %v3670_v40, %v10868_v23  ;;  %v8485_v22 = vadd.f32 %v4122_v16, %v10871_v12  ;;  %v3672_v34 = vpop.f32.mrb[67].mxu0  ;;  %v4124_v39 = vpop.f32.mrb[67].mxu1  ;;  %v4197_v53 = vmax.f32 %v8451_v43, 0.0  ;;  %v4199_v37 = vmax.f32 %v8483_v13, 0.0 }
 0x396   : > { %v8454_v51 = vadd.f32 %v3672_v34, %v10874_v27  ;;  %v8486_v26 = vadd.f32 %v4124_v39, %v10877_v30  ;;  %v4198_v47 = vmax.f32 %v8452_v50, 0.0  ;;  %v4200_v57 = vmax.f32 %v8484_v25, 0.0  ;;  %v9469_v34 = vld [vmem:[#allocation10 + $0x248] ss:$16 sps:$4 sm:$0xff]  }
 0x397   : > { %v4201_v38 = vmax.f32 %v8453_v42, 0.0  ;;  %v4203_v24 = vmax.f32 %v8485_v22, 0.0  ;;  %v9466_v22 = vld [vmem:[#allocation10 + $0x240] ss:$16 sps:$4 sm:$0xff]  }
 0x398   : > { %v4202_v17 = vmax.f32 %v8454_v51, 0.0  ;;  %v4204_v20 = vmax.f32 %v8486_v26, 0.0 }
 0x399   : > { %v4261_v7 = vpack.c.bf16 %v4201_v38, %v4197_v53  ;;  %v10887_v36 = vpack.c.bf16 %v4203_v24, %v4199_v37  ;;  %v9474_v37 = vld [vmem:[#allocation10 + $0x264] ss:$16 sps:$4 sm:$0xff]   ;;  %v9477_v38 = vld [vmem:[#allocation10 + $0x26c] ss:$16 sps:$4 sm:$0xff]  }
 0x39a   : > { %v4262_v54 = vpack.c.bf16 %v4202_v17, %v4198_v47  ;;  %v10889_v49 = vpack.c.bf16 %v4204_v20, %v4200_v57  ;;  %v3676_v48 = vpop.f32.mrb[68].mxu0  ;;  %v4128_v29 = vpop.f32.mrb[68].mxu1 }
 0x39b   : > { %v8455_v56 = vadd.f32 %v3676_v48, %v10868_v23  ;;  %v8487_v46 = vadd.f32 %v4128_v29, %v10871_v12  ;;  %v3678_v1 = vpop.f32.mrb[69].mxu0  ;;  %v4130_v9 = vpop.f32.mrb[69].mxu1 }
 0x39c   : > { %v8456_v10 = vadd.f32 %v3678_v1, %v10874_v27  ;;  %v8488_v2 = vadd.f32 %v4130_v9, %v10877_v30  ;;  %v3680_v41 = vpop.f32.mrb[70].mxu0  ;;  %v4132_v62 = vpop.f32.mrb[70].mxu1  ;;  %5115 = vmatprep.mubr.bf16.mxu0 %v4262_v54  ;;  %5341 = vmatprep.mubr.bf16.mxu1 %v4262_v54 }
 0x39d   : > { %v8457_v8 = vadd.f32 %v3680_v41, %v10868_v23  ;;  %v8489_v11 = vadd.f32 %v4132_v62, %v10871_v12  ;;  %v3682_v4 = vpop.f32.mrb[71].mxu0  ;;  %v4134_v14 = vpop.f32.mrb[71].mxu1  ;;  %5116 = vmatmul.mubr.bf16.vlgmr.msra.gmra.mrb[96].mxu0 %v4261_v7  ;;  %5342 = vmatmul.mubr.bf16.vlgmr.msra.gmra.mrb[96].mxu1 %v4261_v7  ;;  %v4205_v58 = vmax.f32 %v8455_v56, 0.0  ;;  %v4207_v15 = vmax.f32 %v8487_v46, 0.0  ;;  %v9475_v56 = vld [vmem:[#allocation10 + $0x268] ss:$16 sps:$4 sm:$0xff]  }
 0x39e   : > { %v8458_v35 = vadd.f32 %v3682_v4, %v10874_v27  ;;  %v8490_v3 = vadd.f32 %v4134_v14, %v10877_v30  ;;  %5197 = vmatpush1.bf16.msra.mxu0 %v9454_v5  ;;  %5423 = vmatpush1.bf16.msra.mxu1 %v9457_v18  ;;  %v4206_v44 = vmax.f32 %v8456_v10, 0.0  ;;  %v4208_v43 = vmax.f32 %v8488_v2, 0.0  ;;  %v9472_v18 = vld [vmem:[#allocation10 + $0x260] ss:$16 sps:$4 sm:$0xff]   ;;  %v9480_v46 = vld [vmem:[#allocation10 + $0x284] ss:$16 sps:$4 sm:$0xff]  }
 0x39f   : > { %v4209_v45 = vmax.f32 %v8457_v8, 0.0  ;;  %v4211_v6 = vmax.f32 %v8489_v11, 0.0  ;;  %5198 = vmatprep.subr.bf16.mxu0 %v9462_v31  ;;  %5424 = vmatprep.subr.bf16.mxu1 %v9465_v60  ;;  %v9483_v10 = vld [vmem:[#allocation10 + $0x28c] ss:$16 sps:$4 sm:$0xff]  }
 0x3a0   : > { %v4210_v13 = vmax.f32 %v8458_v35, 0.0  ;;  %v4212_v52 = vmax.f32 %v8490_v3, 0.0 }
 0x3a1   : > { %v4265_v55 = vpack.c.bf16 %v4209_v45, %v4205_v58  ;;  %v10899_v50 = vpack.c.bf16 %v4211_v6, %v4207_v15 }
 0x3a2   : > { %v4266_v25 = vpack.c.bf16 %v4210_v13, %v4206_v44  ;;  %v10901_v40 = vpack.c.bf16 %v4212_v52, %v4208_v43  ;;  %5199 = vmatpush1.bf16.msra.mxu0 %v9460_v59  ;;  %v3686_v16 = vpop.f32.mrb[72].mxu0  ;;  %v4138_v42 = vpop.f32.mrb[72].mxu1  ;;  %5425 = vmatpush1.bf16.msra.mxu1 %v9463_v61  ;;  %v9478_v61 = vld [vmem:[#allocation10 + $0x280] ss:$16 sps:$4 sm:$0xff]   ;;  %v9489_v44 = vld [vmem:[#allocation10 + $0x2ac] ss:$16 sps:$4 sm:$0xff]  }
 0x3a3   : > { %v8459_v39 = vadd.f32 %v3686_v16, %v10868_v23  ;;  %v8491_v51 = vadd.f32 %v4138_v42, %v10871_v12  ;;  %v3688_v26 = vpop.f32.mrb[73].mxu0  ;;  %v4140_v53 = vpop.f32.mrb[73].mxu1  ;;  %5200 = vmatprep.subr.bf16.mxu0 %v9468_v63  ;;  %5426 = vmatprep.subr.bf16.mxu1 %v9471_v33  ;;  %v9481_v63 = vld [vmem:[#allocation10 + $0x288] ss:$16 sps:$4 sm:$0xff]   ;;  %v9486_v33 = vld [vmem:[#allocation10 + $0x2a4] ss:$16 sps:$4 sm:$0xff]  }
 0x3a4   : > { %v8460_v24 = vadd.f32 %v3688_v26, %v10874_v27  ;;  %v8492_v47 = vadd.f32 %v4140_v53, %v10877_v30  ;;  %v3690_v57 = vpop.f32.mrb[74].mxu0  ;;  %v4142_v17 = vpop.f32.mrb[74].mxu1  ;;  %5125 = vmatprep.mubr.bf16.mxu0 %v4266_v25  ;;  %5351 = vmatprep.mubr.bf16.mxu1 %v4266_v25  ;;  %v9487_v26 = vld [vmem:[#allocation10 + $0x2a8] ss:$16 sps:$4 sm:$0xff]   ;;  %v9492_v53 = vld [vmem:[#allocation10 + $0x2c4] ss:$16 sps:$4 sm:$0xff]  }
 0x3a5   : > { %v8461_v20 = vadd.f32 %v3690_v57, %v10868_v23  ;;  %v8493_v7 = vadd.f32 %v4142_v17, %v10871_v12  ;;  %v3692_v54 = vpop.f32.mrb[75].mxu0  ;;  %v4144_v48 = vpop.f32.mrb[75].mxu1  ;;  %5126 = vmatmul.mubr.bf16.gmra.mrb[100].mxu0 %v4265_v55  ;;  %5352 = vmatmul.mubr.bf16.gmra.mrb[100].mxu1 %v4265_v55  ;;  %v4213_v1 = vmax.f32 %v8459_v39, 0.0  ;;  %v4215_v9 = vmax.f32 %v8491_v51, 0.0  ;;  %v9484_v51 = vld [vmem:[#allocation10 + $0x2a0] ss:$16 sps:$4 sm:$0xff]  }
 0x3a6   : > { %v8462_v29 = vadd.f32 %v3692_v54, %v10874_v27  ;;  %v8494_v5 = vadd.f32 %v4144_v48, %v10877_v30  ;;  %5201 = vmatpush1.bf16.msra.mxu0 %v9466_v22  ;;  %5427 = vmatpush1.bf16.msra.mxu1 %v9469_v34  ;;  %v4214_v2 = vmax.f32 %v8460_v24, 0.0  ;;  %v4216_v41 = vmax.f32 %v8492_v47, 0.0  ;;  %v9495_v57 = vld [vmem:[#allocation10 + $0x2cc] ss:$16 sps:$4 sm:$0xff]  }
 0x3a7   : > { %v4217_v31 = vmax.f32 %v8461_v20, 0.0  ;;  %v4219_v60 = vmax.f32 %v8493_v7, 0.0  ;;  %5202 = vmatprep.subr.bf16.mxu0 %v9474_v37  ;;  %5428 = vmatprep.subr.bf16.mxu1 %v9477_v38 }
 0x3a8   : > { %v4218_v62 = vmax.f32 %v8462_v29, 0.0  ;;  %v4220_v8 = vmax.f32 %v8494_v5, 0.0 }
 0x3a9   : > { %v4269_v11 = vpack.c.bf16 %v4217_v31, %v4213_v1  ;;  %v10911_v4 = vpack.c.bf16 %v4219_v60, %v4215_v9  ;;  %v9490_v1 = vld [vmem:[#allocation10 + $0x2c0] ss:$16 sps:$4 sm:$0xff]   ;;  %v9493_v9 = vld [vmem:[#allocation10 + $0x2c8] ss:$16 sps:$4 sm:$0xff]  }
 0x3aa   : > { %v4270_v14 = vpack.c.bf16 %v4218_v62, %v4214_v2  ;;  %v10913_v35 = vpack.c.bf16 %v4220_v8, %v4216_v41  ;;  %5203 = vmatpush1.bf16.msra.mxu0 %v9472_v18  ;;  %v3696_v3 = vpop.f32.mrb[76].mxu0  ;;  %v4148_v59 = vpop.f32.mrb[76].mxu1  ;;  %5429 = vmatpush1.bf16.msra.mxu1 %v9475_v56  ;;  %v9498_v41 = vld [vmem:[#allocation10 + $0x2e4] ss:$16 sps:$4 sm:$0xff]   ;;  %v9501_v62 = vld [vmem:[#allocation10 + $0x2ec] ss:$16 sps:$4 sm:$0xff]  }
 0x3ab   : > { %v8463_v58 = vadd.f32 %v3696_v3, %v10868_v23  ;;  %v8495_v15 = vadd.f32 %v4148_v59, %v10871_v12  ;;  %v3698_v45 = vpop.f32.mrb[77].mxu0  ;;  %v4150_v6 = vpop.f32.mrb[77].mxu1  ;;  %5204 = vmatprep.subr.bf16.mxu0 %v9480_v46  ;;  %5430 = vmatprep.subr.bf16.mxu1 %v9483_v10 }
 0x3ac   : > { %v8464_v43 = vadd.f32 %v3698_v45, %v10874_v27  ;;  %v8496_v13 = vadd.f32 %v4150_v6, %v10877_v30  ;;  %v3700_v52 = vpop.f32.mrb[78].mxu0  ;;  %v4152_v55 = vpop.f32.mrb[78].mxu1  ;;  %5135 = vmatprep.mubr.bf16.mxu0 %v4270_v14  ;;  %5361 = vmatprep.mubr.bf16.mxu1 %v4270_v14  ;;  %v9496_v6 = vld [vmem:[#allocation10 + $0x2e0] ss:$16 sps:$4 sm:$0xff]  }
 0x3ad   : > { %v8465_v25 = vadd.f32 %v3700_v52, %v10868_v23  ;;  %v8497_v16 = vadd.f32 %v4152_v55, %v10871_v12  ;;  %v3702_v42 = vpop.f32.mrb[79].mxu0  ;;  %v4154_v22 = vpop.f32.mrb[79].mxu1  ;;  %5136 = vmatmul.mubr.bf16.gmra.mrb[104].mxu0 %v4269_v11  ;;  %5362 = vmatmul.mubr.bf16.gmra.mrb[104].mxu1 %v4269_v11  ;;  %v4221_v37 = vmax.f32 %v8463_v58, 0.0  ;;  %v4223_v38 = vmax.f32 %v8495_v15, 0.0 }
 0x3ae   : > { %v8466_v34 = vadd.f32 %v3702_v42, %v10874_v27  ;;  %v8498_v39 = vadd.f32 %v4154_v22, %v10877_v30  ;;  %5205 = vmatpush1.bf16.msra.mxu0 %v9478_v61  ;;  %5431 = vmatpush1.bf16.msra.mxu1 %v9481_v63  ;;  %v4222_v17 = vmax.f32 %v8464_v43, 0.0  ;;  %v4224_v20 = vmax.f32 %v8496_v13, 0.0 }
 0x3af   : > { %v4225_v24 = vmax.f32 %v8465_v25, 0.0  ;;  %v4227_v47 = vmax.f32 %v8497_v16, 0.0  ;;  %5206 = vmatprep.subr.bf16.mxu0 %v9486_v33  ;;  %5432 = vmatprep.subr.bf16.mxu1 %v9489_v44  ;;  %v9499_v33 = vld [vmem:[#allocation10 + $0x2e8] ss:$16 sps:$4 sm:$0xff]   ;;  %v9504_v44 = vld [vmem:[#allocation10 + $0x304] ss:$16 sps:$4 sm:$0xff]  }
 0x3b0   : > { %v4226_v7 = vmax.f32 %v8466_v34, 0.0  ;;  %v4228_v54 = vmax.f32 %v8498_v39, 0.0  ;;  %v9507_v25 = vld [vmem:[#allocation10 + $0x30c] ss:$16 sps:$4 sm:$0xff]  }
 0x3b1   : > { %v4273_v48 = vpack.c.bf16 %v4225_v24, %v4221_v37  ;;  %v10923_v29 = vpack.c.bf16 %v4227_v47, %v4223_v38  ;;  %v9502_v24 = vld [vmem:[#allocation10 + $0x300] ss:$16 sps:$4 sm:$0xff]   ;;  %v9505_v47 = vld [vmem:[#allocation10 + $0x308] ss:$16 sps:$4 sm:$0xff]  }
 0x3b2   : > { %v4274_v5 = vpack.c.bf16 %v4226_v7, %v4222_v17  ;;  %v10925_v18 = vpack.c.bf16 %v4228_v54, %v4224_v20  ;;  %5207 = vmatpush1.bf16.msra.mxu0 %v9484_v51  ;;  %v3706_v56 = vpop.f32.mrb[80].mxu0  ;;  %v4158_v46 = vpop.f32.mrb[80].mxu1  ;;  %5433 = vmatpush1.bf16.msra.mxu1 %v9487_v26  ;;  %v9510_v54 = vld [vmem:[#allocation10 + $0x324] ss:$16 sps:$4 sm:$0xff]  }
 0x3b3   : > { %v8467_v31 = vadd.f32 %v3706_v56, %v10868_v23  ;;  %v8499_v60 = vadd.f32 %v4158_v46, %v10871_v12  ;;  %v3708_v10 = vpop.f32.mrb[81].mxu0  ;;  %v4160_v2 = vpop.f32.mrb[81].mxu1  ;;  %5208 = vmatprep.subr.bf16.mxu0 %v9492_v53  ;;  %5434 = vmatprep.subr.bf16.mxu1 %v9495_v57 }
 0x3b4   : > { %v8468_v8 = vadd.f32 %v3708_v10, %v10874_v27  ;;  %v8500_v11 = vadd.f32 %v4160_v2, %v10877_v30  ;;  %v3710_v14 = vpop.f32.mrb[82].mxu0  ;;  %v4162_v3 = vpop.f32.mrb[82].mxu1  ;;  %5145 = vmatprep.mubr.bf16.mxu0 %v4274_v5  ;;  %5371 = vmatprep.mubr.bf16.mxu1 %v4274_v5 }
 0x3b5   : > { %v8469_v59 = vadd.f32 %v3710_v14, %v10868_v23  ;;  %v8501_v61 = vadd.f32 %v4162_v3, %v10871_v12  ;;  %v3712_v63 = vpop.f32.mrb[83].mxu0  ;;  %v4164_v58 = vpop.f32.mrb[83].mxu1  ;;  %5146 = vmatmul.mubr.bf16.gmra.mrb[108].mxu0 %v4273_v48  ;;  %5372 = vmatmul.mubr.bf16.gmra.mrb[108].mxu1 %v4273_v48  ;;  %v4229_v43 = vmax.f32 %v8467_v31, 0.0  ;;  %v4231_v13 = vmax.f32 %v8499_v60, 0.0  ;;  %v9513_v48 = vld [vmem:[#allocation10 + $0x32c] ss:$16 sps:$4 sm:$0xff]  }
 0x3b6   : > { %v8470_v15 = vadd.f32 %v3712_v63, %v10874_v27  ;;  %v8502_v45 = vadd.f32 %v4164_v58, %v10877_v30  ;;  %5209 = vmatpush1.bf16.msra.mxu0 %v9490_v1  ;;  %5435 = vmatpush1.bf16.msra.mxu1 %v9493_v9  ;;  %v4230_v16 = vmax.f32 %v8468_v8, 0.0  ;;  %v4232_v42 = vmax.f32 %v8500_v11, 0.0  ;;  %v9511_v8 = vld [vmem:[#allocation10 + $0x328] ss:$16 sps:$4 sm:$0xff]   ;;  %v9516_v11 = vld [vmem:[#allocation10 + $0x344] ss:$16 sps:$4 sm:$0xff]  }
 0x3b7   : > { %v4233_v52 = vmax.f32 %v8469_v59, 0.0  ;;  %v4235_v55 = vmax.f32 %v8501_v61, 0.0  ;;  %5210 = vmatprep.subr.bf16.mxu0 %v9498_v41  ;;  %5436 = vmatprep.subr.bf16.mxu1 %v9501_v62  ;;  %v9508_v62 = vld [vmem:[#allocation10 + $0x320] ss:$16 sps:$4 sm:$0xff]   ;;  %v9519_v63 = vld [vmem:[#allocation10 + $0x34c] ss:$16 sps:$4 sm:$0xff]  }
 0x3b8   : > { %v4234_v22 = vmax.f32 %v8470_v15, 0.0  ;;  %v4236_v34 = vmax.f32 %v8502_v45, 0.0 }
 0x3b9   : > { %v4277_v39 = vpack.c.bf16 %v4233_v52, %v4229_v43  ;;  %v10935_v51 = vpack.c.bf16 %v4235_v55, %v4231_v13 }
 0x3ba   : > { %v4278_v26 = vpack.c.bf16 %v4234_v22, %v4230_v16  ;;  %v10937_v53 = vpack.c.bf16 %v4236_v34, %v4232_v42  ;;  %5211 = vmatpush1.bf16.msra.mxu0 %v9496_v6  ;;  %v3716_v37 = vpop.f32.mrb[84].mxu0  ;;  %v4168_v38 = vpop.f32.mrb[84].mxu1  ;;  %5437 = vmatpush1.bf16.msra.mxu1 %v9499_v33  ;;  %v9517_v16 = vld [vmem:[#allocation10 + $0x348] ss:$16 sps:$4 sm:$0xff]  }
 0x3bb   : > { %v8471_v57 = vadd.f32 %v3716_v37, %v10868_v23  ;;  %v8503_v17 = vadd.f32 %v4168_v38, %v10871_v12  ;;  %v3718_v20 = vpop.f32.mrb[85].mxu0  ;;  %v4170_v7 = vpop.f32.mrb[85].mxu1  ;;  %5212 = vmatprep.subr.bf16.mxu0 %v9504_v44  ;;  %5438 = vmatprep.subr.bf16.mxu1 %v9507_v25  ;;  %v9514_v25 = vld [vmem:[#allocation10 + $0x340] ss:$16 sps:$4 sm:$0xff]   ;;  %v9525_v37 = vld [vmem:[#allocation10 + $0x36c] ss:$16 sps:$4 sm:$0xff]  }
 0x3bc   : > { %v8472_v5 = vadd.f32 %v3718_v20, %v10874_v27  ;;  %v8504_v56 = vadd.f32 %v4170_v7, %v10877_v30  ;;  %v3720_v46 = vpop.f32.mrb[86].mxu0  ;;  %v4172_v1 = vpop.f32.mrb[86].mxu1  ;;  %5155 = vmatprep.mubr.bf16.mxu0 %v4278_v26  ;;  %5381 = vmatprep.mubr.bf16.mxu1 %v4278_v26  ;;  %v9522_v26 = vld [vmem:[#allocation10 + $0x364] ss:$16 sps:$4 sm:$0xff]  }
 0x3bd   : > { %v8473_v9 = vadd.f32 %v3720_v46, %v10868_v23  ;;  %v8505_v31 = vadd.f32 %v4172_v1, %v10871_v12  ;;  %v3722_v60 = vpop.f32.mrb[87].mxu0  ;;  %v4174_v10 = vpop.f32.mrb[87].mxu1  ;;  %5156 = vmatmul.mubr.bf16.gmra.mrb[112].mxu0 %v4277_v39  ;;  %5382 = vmatmul.mubr.bf16.gmra.mrb[112].mxu1 %v4277_v39  ;;  %v4237_v14 = vmax.f32 %v8471_v57, 0.0  ;;  %v4239_v3 = vmax.f32 %v8503_v17, 0.0  ;;  %v9523_v46 = vld [vmem:[#allocation10 + $0x368] ss:$16 sps:$4 sm:$0xff]  }
 0x3be   : > { %v8474_v2 = vadd.f32 %v3722_v60, %v10874_v27  ;;  %v8506_v41 = vadd.f32 %v4174_v10, %v10877_v30  ;;  %5213 = vmatpush1.bf16.msra.mxu0 %v9502_v24  ;;  %5439 = vmatpush1.bf16.msra.mxu1 %v9505_v47  ;;  %v4238_v58 = vmax.f32 %v8472_v5, 0.0  ;;  %v4240_v15 = vmax.f32 %v8504_v56, 0.0  ;;  %v9520_v56 = vld [vmem:[#allocation10 + $0x360] ss:$16 sps:$4 sm:$0xff]   ;;  %v9528_v1 = vld [vmem:[#allocation10 + $0x384] ss:$16 sps:$4 sm:$0xff]  }
 0x3bf   : > { %v4241_v59 = vmax.f32 %v8473_v9, 0.0  ;;  %v4243_v61 = vmax.f32 %v8505_v31, 0.0  ;;  %5214 = vmatprep.subr.bf16.mxu0 %v9510_v54  ;;  %5440 = vmatprep.subr.bf16.mxu1 %v9513_v48 }
 0x3c0   : > { %v4242_v45 = vmax.f32 %v8474_v2, 0.0  ;;  %v4244_v6 = vmax.f32 %v8506_v41, 0.0  ;;  %v9531_v2 = vld [vmem:[#allocation10 + $0x38c] ss:$16 sps:$4 sm:$0xff]  }
 0x3c1   : > { %v4281_v33 = vpack.c.bf16 %v4241_v59, %v4237_v14  ;;  %v10947_v44 = vpack.c.bf16 %v4243_v61, %v4239_v3 }
 0x3c2   : > { %v4282_v43 = vpack.c.bf16 %v4242_v45, %v4238_v58  ;;  %v10949_v13 = vpack.c.bf16 %v4244_v6, %v4240_v15  ;;  %5215 = vmatpush1.bf16.msra.mxu0 %v9508_v62  ;;  %v3726_v52 = vpop.f32.mrb[88].mxu0  ;;  %v4178_v55 = vpop.f32.mrb[88].mxu1  ;;  %5441 = vmatpush1.bf16.msra.mxu1 %v9511_v8  ;;  %v9526_v15 = vld [vmem:[#allocation10 + $0x380] ss:$16 sps:$4 sm:$0xff]   ;;  %v9529_v45 = vld [vmem:[#allocation10 + $0x388] ss:$16 sps:$4 sm:$0xff]  }
 0x3c3   : > { %v8475_v42 = vadd.f32 %v3726_v52, %v10868_v23  ;;  %v8507_v22 = vadd.f32 %v4178_v55, %v10871_v12  ;;  %v3728_v34 = vpop.f32.mrb[89].mxu0  ;;  %v4180_v39 = vpop.f32.mrb[89].mxu1  ;;  %5216 = vmatprep.subr.bf16.mxu0 %v9516_v11  ;;  %5442 = vmatprep.subr.bf16.mxu1 %v9519_v63  ;;  %v9534_v55 = vld [vmem:[#allocation10 + $0x3a4] ss:$16 sps:$4 sm:$0xff]  }
 0x3c4   : > { %v8476_v38 = vadd.f32 %v3728_v34, %v10874_v27  ;;  %v8508_v24 = vadd.f32 %v4180_v39, %v10877_v30  ;;  %v3730_v47 = vpop.f32.mrb[90].mxu0  ;;  %v4182_v57 = vpop.f32.mrb[90].mxu1  ;;  %5165 = vmatprep.mubr.bf16.mxu0 %v4282_v43  ;;  %5391 = vmatprep.mubr.bf16.mxu1 %v4282_v43 }
 0x3c5   : > { %v8477_v17 = vadd.f32 %v3730_v47, %v10868_v23  ;;  %v8509_v20 = vadd.f32 %v4182_v57, %v10871_v12  ;;  %v3732_v7 = vpop.f32.mrb[91].mxu0  ;;  %v4184_v54 = vpop.f32.mrb[91].mxu1  ;;  %5166 = vmatmul.mubr.bf16.gmra.mrb[116].mxu0 %v4281_v33  ;;  %5392 = vmatmul.mubr.bf16.gmra.mrb[116].mxu1 %v4281_v33  ;;  %v4245_v9 = vmax.f32 %v8475_v42, 0.0  ;;  %v4247_v31 = vmax.f32 %v8507_v22, 0.0  ;;  %v9532_v57 = vld [vmem:[#allocation10 + $0x3a0] ss:$16 sps:$4 sm:$0xff]  }
 0x3c6   : > { %v8478_v48 = vadd.f32 %v3732_v7, %v10874_v27  ;;  %v8510_v5 = vadd.f32 %v4184_v54, %v10877_v30  ;;  %5217 = vmatpush1.bf16.msra.mxu0 %v9514_v25  ;;  %5443 = vmatpush1.bf16.msra.mxu1 %v9517_v16  ;;  %v4246_v41 = vmax.f32 %v8476_v38, 0.0  ;;  %v4248_v62 = vmax.f32 %v8508_v24, 0.0  ;;  %v9537_v25 = vld [vmem:[#allocation10 + $0x3ac] ss:$16 sps:$4 sm:$0xff]  }
 0x3c7   : > { %v4249_v60 = vmax.f32 %v8477_v17, 0.0  ;;  %v4251_v10 = vmax.f32 %v8509_v20, 0.0  ;;  %5218 = vmatprep.subr.bf16.mxu0 %v9522_v26  ;;  %5444 = vmatprep.subr.bf16.mxu1 %v9525_v37  ;;  %v9535_v17 = vld [vmem:[#allocation10 + $0x3a8] ss:$16 sps:$4 sm:$0xff]   ;;  %v9540_v20 = vld [vmem:[#allocation10 + $0x3c4] ss:$16 sps:$4 sm:$0xff]  }
 0x3c8   : > { %v4250_v8 = vmax.f32 %v8478_v48, 0.0  ;;  %v4252_v11 = vmax.f32 %v8510_v5, 0.0 }
 0x3c9   : > { %v4285_v14 = vpack.c.bf16 %v4249_v60, %v4245_v9  ;;  %v10959_v3 = vpack.c.bf16 %v4251_v10, %v4247_v31  ;;  %v9538_v60 = vld [vmem:[#allocation10 + $0x3c0] ss:$16 sps:$4 sm:$0xff]   ;;  %v9541_v10 = vld [vmem:[#allocation10 + $0x3c8] ss:$16 sps:$4 sm:$0xff]  }
 0x3ca   : > { %v4286_v59 = vpack.c.bf16 %v4250_v8, %v4246_v41  ;;  %v10961_v61 = vpack.c.bf16 %v4252_v11, %v4248_v62  ;;  %5219 = vmatpush1.bf16.msra.mxu0 %v9520_v56  ;;  %v3736_v63 = vpop.f32.mrb[92].mxu0  ;;  %v4188_v58 = vpop.f32.mrb[92].mxu1  ;;  %5445 = vmatpush1.bf16.msra.mxu1 %v9523_v46  ;;  %v9549_v41 = vld [vmem:[#allocation10 + $0x3ec] ss:$16 sps:$4 sm:$0xff]   ;;  %v9544_v62 = vld [vmem:[#allocation10 + $0x3e0] ss:$16 sps:$4 sm:$0xff]  }
 0x3cb   : > { %v8479_v6 = vadd.f32 %v3736_v63, %v10868_v23  ;;  %v8511_v33 = vadd.f32 %v4188_v58, %v10871_v12  ;;  %v3738_v43 = vpop.f32.mrb[93].mxu0  ;;  %v4190_v52 = vpop.f32.mrb[93].mxu1  ;;  %5220 = vmatprep.subr.bf16.mxu0 %v9528_v1  ;;  %5446 = vmatprep.subr.bf16.mxu1 %v9531_v2  ;;  %v9546_v2 = vld [vmem:[#allocation10 + $0x3e4] ss:$16 sps:$4 sm:$0xff]   ;;  %v9547_v8 = vld [vmem:[#allocation10 + $0x3e8] ss:$16 sps:$4 sm:$0xff]  }
 0x3cc   : > { %v8480_v16 = vadd.f32 %v3738_v43, %v10874_v27  ;;  %v8512_v42 = vadd.f32 %v4190_v52, %v10877_v30  ;;  %v3740_v22 = vpop.f32.mrb[94].mxu0  ;;  %v4192_v34 = vpop.f32.mrb[94].mxu1  ;;  %5175 = vmatprep.mubr.bf16.mxu0 %v4286_v59  ;;  %5401 = vmatprep.mubr.bf16.mxu1 %v4286_v59  ;;  %v9550_v11 = vld [vmem:[#allocation11 + $0x40] sm:$0xff]   ;;  %v9554_v58 = vld [vmem:[#allocation11 + $0x48] sm:$0xff]   ;;  %v9559_v43 = vld [vmem:[#allocation11 + $0x10] sm:$0xff]  }
 0x3cd   : > { %v8481_v39 = vadd.f32 %v3740_v22, %v10868_v23  ;;  %v8513_v26 = vadd.f32 %v4192_v34, %v10871_v12  ;;  %v3742_v37 = vpop.f32.mrb[95].mxu0  ;;  %v4194_v38 = vpop.f32.mrb[95].mxu1  ;;  %5176 = vmatmul.mubr.bf16.gmra.mrb[120].mxu0 %v4285_v14  ;;  %5402 = vmatmul.mubr.bf16.gmra.mrb[120].mxu1 %v4285_v14  ;;  %v4253_v7 = vmax.f32 %v8479_v6, 0.0  ;;  %v4255_v54 = vmax.f32 %v8511_v33, 0.0  ;;  %v9543_v23 = vld [vmem:[#allocation10 + $0x3cc] ss:$16 sps:$4 sm:$0xff]  }
 0x3ce   : > { %v8482_v24 = vadd.f32 %v3742_v37, %v10874_v27  ;;  %v8514_v47 = vadd.f32 %v4194_v38, %v10877_v30  ;;  %5221 = vmatpush1.bf16.msra.mxu0 %v9526_v15  ;;  %5447 = vmatpush1.bf16.msra.mxu1 %v9529_v45  ;;  %v4254_v12 = vmax.f32 %v8480_v16, 0.0  ;;  %v4256_v56 = vmax.f32 %v8512_v42, 0.0  ;;  %v9552_v14 = vld [vmem:[#allocation11 + $0xc0] sm:$0xff]   ;;  %v9556_v15 = vld [vmem:[#allocation11 + $0xc8] sm:$0xff]   ;;  %v9558_v6 = vld [vmem:[#allocation11 + $0x50] sm:$0xff]  }
 0x3cf   : > { %v4257_v48 = vmax.f32 %v8481_v39, 0.0  ;;  %v4259_v5 = vmax.f32 %v8513_v26, 0.0  ;;  %5222 = vmatprep.subr.bf16.mxu0 %v9534_v55  ;;  %5448 = vmatprep.subr.bf16.mxu1 %v9537_v25  ;;  %v9551_v59 = vld [vmem:[#allocation11] sm:$0xff]   ;;  %v9557_v45 = vld [vmem:[#allocation11 + $0x88] sm:$0xff]   ;;  %v9560_v33 = vld [vmem:[#allocation11 + $0xd0] sm:$0xff]  }
 0x3d0   : > { %v4258_v46 = vmax.f32 %v8482_v24, 0.0  ;;  %v4260_v1 = vmax.f32 %v8514_v47, 0.0  ;;  %v9553_v63 = vld [vmem:[#allocation11 + $0x80] sm:$0xff]   ;;  %v9561_v52 = vld [vmem:[#allocation11 + $0x90] sm:$0xff]   ;;  %v9562_v55 = vld [vmem:[#allocation11 + $0x58] sm:$0xff]  }
 0x3d1   : > { %v4289_v9 = vpack.c.bf16 %v4257_v48, %v4253_v7  ;;  %v10971_v27 = vpack.c.bf16 %v4259_v5, %v4255_v54  ;;  %v9565_v25 = vld [vmem:[#allocation11 + $0x98] sm:$0xff]   ;;  %v9566_v16 = vld [vmem:[#allocation11 + $0x60] sm:$0xff]   ;;  %v9570_v39 = vld [vmem:[#allocation11 + $0x68] sm:$0xff]  }
 0x3d2   : > { %v4290_v30 = vpack.c.bf16 %v4258_v46, %v4254_v12  ;;  %v10973_v31 = vpack.c.bf16 %v4260_v1, %v4256_v56  ;;  %5223 = vmatpush1.bf16.msra.mxu0 %v9532_v57  ;;  %5449 = vmatpush1.bf16.msra.mxu1 %v9535_v17  ;;  %v9568_v42 = vld [vmem:[#allocation11 + $0xe0] sm:$0xff]   ;;  %v9573_v26 = vld [vmem:[#allocation11 + $0xa8] sm:$0xff]   ;;  %v9574_v37 = vld [vmem:[#allocation11 + $0x70] sm:$0xff]  }
 0x3d3   : > { %5224 = vmatprep.subr.bf16.mxu0 %v9540_v20  ;;  %5450 = vmatprep.subr.bf16.mxu1 %v9543_v23  ;;  %v9567_v22 = vld [vmem:[#allocation11 + $0x20] sm:$0xff]   ;;  %v9576_v38 = vld [vmem:[#allocation11 + $0xf0] sm:$0xff]  }
 0x3d4   : > { %5185 = vmatprep.mubr.bf16.mxu0 %v4290_v30  ;;  %5411 = vmatprep.mubr.bf16.mxu1 %v4290_v30  ;;  %v9569_v34 = vld [vmem:[#allocation11 + $0xa0] sm:$0xff]   ;;  %v9575_v24 = vld [vmem:[#allocation11 + $0x30] sm:$0xff]  }
 0x3d5   : > { %5186 = vmatmul.mubr.bf16.gmra.mrb[124].mxu0 %v4289_v9  ;;  %5412 = vmatmul.mubr.bf16.gmra.mrb[124].mxu1 %v4289_v9  ;;  %v9577_v47 = vld [vmem:[#allocation11 + $0xb0] sm:$0xff]  }
 0x3d6   : > { %5225 = vmatpush1.bf16.msra.mxu0 %v9538_v60  ;;  %5228 = vmatprep.mubr.bf16.mxu0 %v10889_v49 }
 0x3d7   : > { %5451 = vmatpush1.bf16.msra.mxu1 %v9541_v10  ;;  %5454 = vmatprep.mubr.bf16.mxu1 %v10889_v49  ;;  %v9555_v49 = vld [vmem:[#allocation11 + $0x8] sm:$0xff]  }
 0x3d8   : > { %5226 = vmatprep.subr.bf16.mxu0 %v9546_v2  ;;  %5452 = vmatprep.subr.bf16.mxu1 %v9549_v41 }
 0x3da   : > { %5227 = vmatpush1.bf16.msra.mxu0 %v9544_v62 }
 0x3db   : > { %5453 = vmatpush1.bf16.msra.mxu1 %v9547_v8  ;;  %8195 = vmatprep.subr.bf16.mxu0 %v9550_v11 }
 0x3dc   : > { %8259 = vmatprep.subr.bf16.mxu1 %v9552_v14 }
 0x3dd   : > { %5229 = vmatmul.mubr.bf16.vlgmr.msra.gmra.mrb[96].mxu0 %v10887_v36 }
 0x3de   : > { %5455 = vmatmul.mubr.bf16.vlgmr.msra.gmra.mrb[96].mxu1 %v10887_v36  ;;  %5238 = vmatprep.mubr.bf16.mxu0 %v10901_v40  ;;  %v9564_v36 = vld [vmem:[#allocation11 + $0xd8] sm:$0xff]  }
 0x3df   : > { %5464 = vmatprep.mubr.bf16.mxu1 %v10901_v40  ;;  %8196 = vmatpush3.bf16.msra.mxu0 %v9551_v59  ;;  %v9563_v40 = vld [vmem:[#allocation11 + $0x18] sm:$0xff]  }
 0x3e0   : > { %8260 = vmatpush3.bf16.msra.mxu1 %v9553_v63  ;;  %8197 = vmatprep.subr.bf16.mxu0 %v9554_v58 }
 0x3e1   : > { %8261 = vmatprep.subr.bf16.mxu1 %v9556_v15 }
 0x3e3   : > { %8198 = vmatpush3.bf16.msra.mxu0 %v9555_v49 }
 0x3e4   : > { %8262 = vmatpush3.bf16.msra.mxu1 %v9557_v45  ;;  %8199 = vmatprep.subr.bf16.mxu0 %v9558_v6  ;;  %v9582_v6 = vld [vmem:[#allocation13] ss:$16 sps:$4 sm:$0xff]  }
 0x3e5   : > { %5239 = vmatmul.mubr.bf16.gmra.mrb[100].mxu0 %v10899_v50  ;;  %8263 = vmatprep.subr.bf16.mxu1 %v9560_v33 }
 0x3e6   : > { %5465 = vmatmul.mubr.bf16.gmra.mrb[100].mxu1 %v10899_v50  ;;  %5248 = vmatprep.mubr.bf16.mxu0 %v10913_v35  ;;  %v9572_v50 = vld [vmem:[#allocation11 + $0xe8] sm:$0xff]  }
 0x3e7   : > { %5474 = vmatprep.mubr.bf16.mxu1 %v10913_v35  ;;  %8200 = vmatpush3.bf16.msra.mxu0 %v9559_v43  ;;  %v9571_v35 = vld [vmem:[#allocation11 + $0x28] sm:$0xff]  }
 0x3e8   : > { %8264 = vmatpush3.bf16.msra.mxu1 %v9561_v52  ;;  %8201 = vmatprep.subr.bf16.mxu0 %v9562_v55 }
 0x3e9   : > { %8265 = vmatprep.subr.bf16.mxu1 %v9564_v36  ;;  %v9585_v36 = vld [vmem:[#allocation13 + $0x8] ss:$16 sps:$4 sm:$0xff]  }
 0x3eb   : > { %8202 = vmatpush3.bf16.msra.mxu0 %v9563_v40  ;;  %v9590_v40 = vld [vmem:[#allocation13 + $0x24] ss:$16 sps:$4 sm:$0xff]  }
 0x3ec   : > { %8266 = vmatpush3.bf16.msra.mxu1 %v9565_v25  ;;  %8203 = vmatprep.subr.bf16.mxu0 %v9566_v16 }
 0x3ed   : > { %5249 = vmatmul.mubr.bf16.gmra.mrb[104].mxu0 %v10911_v4  ;;  %8267 = vmatprep.subr.bf16.mxu1 %v9568_v42 }
 0x3ee   : > { %5475 = vmatmul.mubr.bf16.gmra.mrb[104].mxu1 %v10911_v4  ;;  %5258 = vmatprep.mubr.bf16.mxu0 %v10925_v18  ;;  %v9578_v4 = vld [vmem:[#allocation11 + $0x78] sm:$0xff]  }
 0x3ef   : > { %5484 = vmatprep.mubr.bf16.mxu1 %v10925_v18  ;;  %8204 = vmatpush3.bf16.msra.mxu0 %v9567_v22  ;;  %v9579_v18 = vld [vmem:[#allocation11 + $0x38] sm:$0xff]  }
 0x3f0   : > { %8268 = vmatpush3.bf16.msra.mxu1 %v9569_v34  ;;  %8205 = vmatprep.subr.bf16.mxu0 %v9570_v39  ;;  %v9593_v34 = vld [vmem:[#allocation13 + $0x2c] ss:$16 sps:$4 sm:$0xff]  }
 0x3f1   : > { %8269 = vmatprep.subr.bf16.mxu1 %v9572_v50 }
 0x3f3   : > { %8206 = vmatpush3.bf16.msra.mxu0 %v9571_v35 }
 0x3f4   : > { %8270 = vmatpush3.bf16.msra.mxu1 %v9573_v26  ;;  %8207 = vmatprep.subr.bf16.mxu0 %v9574_v37 }
 0x3f5   : > { %5259 = vmatmul.mubr.bf16.gmra.mrb[108].mxu0 %v10923_v29  ;;  %8271 = vmatprep.subr.bf16.mxu1 %v9576_v38 }
 0x3f6   : > { %5485 = vmatmul.mubr.bf16.gmra.mrb[108].mxu1 %v10923_v29  ;;  %5268 = vmatprep.mubr.bf16.mxu0 %v10937_v53  ;;  %v9580_v29 = vld [vmem:[#allocation11 + $0xf8] sm:$0xff]  }
 0x3f7   : > { %5494 = vmatprep.mubr.bf16.mxu1 %v10937_v53  ;;  %8208 = vmatpush3.bf16.msra.mxu0 %v9575_v24  ;;  %v9584_v53 = vld [vmem:[#allocation13 + $0x4] ss:$16 sps:$4 sm:$0xff]  }
 0x3f8   : > { %8272 = vmatpush3.bf16.msra.mxu1 %v9577_v47  ;;  %8209 = vmatprep.subr.bf16.mxu0 %v9578_v4  ;;  %v9588_v47 = vld [vmem:[#allocation13 + $0x20] ss:$16 sps:$4 sm:$0xff]  }
 0x3f9   : > { %8273 = vmatprep.subr.bf16.mxu1 %v9580_v29 }
 0x3fb   : > { %8210 = vmatpush3.bf16.msra.mxu0 %v9579_v18 }
 0x3fc   : > { %6382 = vmatprep.subr.bf16.mxu0 %v9584_v53  ;;  %v9596_v53 = vld [vmem:[#allocation13 + $0x44] ss:$16 sps:$4 sm:$0xff]  }
 0x3fd   : > { %5269 = vmatmul.mubr.bf16.gmra.mrb[112].mxu0 %v10935_v51 }
 0x3fe   : > { %5495 = vmatmul.mubr.bf16.gmra.mrb[112].mxu1 %v10935_v51  ;;  %5278 = vmatprep.mubr.bf16.mxu0 %v10949_v13  ;;  %v9581_v51 = vld [vmem:[#allocation11 + $0xb8] sm:$0xff]  }
 0x3ff   : > { %5504 = vmatprep.mubr.bf16.mxu1 %v10949_v13  ;;  %8274 = vmatpush3.bf16.msra.mxu1 %v9581_v51  ;;  %v4421_v13 = vld [vmem:[%s11394_s25] sm:$0xf]  ;;  %s7260_s25 = sshll.u32 %s11096_s12, 4  ;;  %s11222_s25 = int_to_ptr.vmem [resolvable:$true] %s7260_s25 }
 0x400   : > { %v11017_v57 = vrot.slane %v4421_v13, %v10504_v21  ;;  %v11020_v17 = vrot.slane %v4421_v13, %v10521_v32  ;;  %v9591_v51 = vld [vmem:[#allocation13 + $0x28] ss:$16 sps:$4 sm:$0xff]   ;;  %s9888_s17 = scalar_lea.vmem %s11222_s25, 1024 }
 0x401   : > { %p9889_p10 = scmp.ne.s32.totalorder %s11222_s25, %s9888_s17 }
 0x403   : > { %p9890_p11 = pnand %p9889_p10, %p11398_p1 }
 0x405   : > { %5279 = vmatmul.mubr.bf16.gmra.mrb[116].mxu0 %v10947_v44  ;;  %p9891_p12 = pneg %p9890_p11 }
 0x406   : > { %5505 = vmatmul.mubr.bf16.gmra.mrb[116].mxu1 %v10947_v44  ;;  %5288 = vmatprep.mubr.bf16.mxu0 %v10961_v61  ;;  %v9587_v44 = vld [vmem:[#allocation13 + $0xc] ss:$16 sps:$4 sm:$0xff]  }
 0x407   : > { %5514 = vmatprep.mubr.bf16.mxu1 %v10961_v61  ;;  %6495 = vmatprep.subr.bf16.mxu1 %v9587_v44  ;;  %v11014_v61 = vrot.slane %v4421_v13, %v10517_v28 }
 0x40d   : > { %5289 = vmatmul.mubr.bf16.gmra.mrb[120].mxu0 %v10959_v3 }
 0x40e   : > { %5515 = vmatmul.mubr.bf16.gmra.mrb[120].mxu1 %v10959_v3  ;;  %5298 = vmatprep.mubr.bf16.mxu0 %v10973_v31  ;;  %v11011_v3 = vrot.slane %v4421_v13, %v10499_v19 }
 0x40f   : > { %5524 = vmatprep.mubr.bf16.mxu1 %v10973_v31 }
 0x415   : > { %5299 = vmatmul.mubr.bf16.gmra.mrb[124].mxu0 %v10971_v27 }
 0x416   : > { %5525 = vmatmul.mubr.bf16.gmra.mrb[124].mxu1 %v10971_v27 }
 0x4b0   : > { %v5230_v20 = vpop.f32.mrb[96].mxu0 }
 0x4b1   : > { %v8515_v7 = vadd.f32 %v5230_v20, %v11011_v3  ;;  %v5456_v54 = vpop.f32.mrb[96].mxu1  ;;  %v5232_v48 = vpop.f32.mrb[97].mxu0 }
 0x4b2   : > { %v8547_v5 = vadd.f32 %v5456_v54, %v11014_v61  ;;  %v8516_v23 = vadd.f32 %v5232_v48, %v11017_v57  ;;  %v5458_v12 = vpop.f32.mrb[97].mxu1  ;;  %v5234_v56 = vpop.f32.mrb[98].mxu0  ;;  %v9599_v54 = vld [vmem:[#allocation13 + $0x4c] ss:$16 sps:$4 sm:$0xff]  }
 0x4b3   : > { %v8548_v46 = vadd.f32 %v5458_v12, %v11020_v17  ;;  %v8517_v1 = vadd.f32 %v5234_v56, %v11011_v3  ;;  %v5460_v9 = vpop.f32.mrb[98].mxu1  ;;  %v5236_v27 = vpop.f32.mrb[99].mxu0  ;;  %v5535_v10 = vmax.f32 %v8515_v7, 0.0 }
 0x4b4   : > { %v8549_v30 = vadd.f32 %v5460_v9, %v11014_v61  ;;  %v8518_v31 = vadd.f32 %v5236_v27, %v11017_v57  ;;  %v5462_v60 = vpop.f32.mrb[99].mxu1  ;;  %v5537_v62 = vmax.f32 %v8547_v5, 0.0  ;;  %v5536_v8 = vmax.f32 %v8516_v23, 0.0 }
 0x4b5   : > { %v5539_v2 = vmax.f32 %v8517_v1, 0.0  ;;  %v8550_v41 = vadd.f32 %v5462_v60, %v11020_v17  ;;  %v5538_v59 = vmax.f32 %v8548_v46, 0.0  ;;  %v9594_v1 = vld [vmem:[#allocation13 + $0x40] ss:$16 sps:$4 sm:$0xff]   ;;  %v9597_v60 = vld [vmem:[#allocation13 + $0x48] ss:$16 sps:$4 sm:$0xff]  }
 0x4b6   : > { %v5541_v11 = vmax.f32 %v8549_v30, 0.0  ;;  %v5540_v14 = vmax.f32 %v8518_v31, 0.0 }
 0x4b7   : > { %v5599_v63 = vpack.c.bf16 %v5539_v2, %v5535_v10  ;;  %v5542_v58 = vmax.f32 %v8550_v41, 0.0  ;;  %v9602_v10 = vld [vmem:[#allocation13 + $0x64] ss:$16 sps:$4 sm:$0xff]  }
 0x4b8   : > { %v5601_v15 = vpack.c.bf16 %v5541_v11, %v5537_v62  ;;  %v5600_v49 = vpack.c.bf16 %v5540_v14, %v5536_v8  ;;  %v5240_v45 = vpop.f32.mrb[100].mxu0  ;;  %v9605_v11 = vld [vmem:[#allocation13 + $0x6c] ss:$16 sps:$4 sm:$0xff]  }
 0x4b9   : > { %v5602_v33 = vpack.c.bf16 %v5542_v58, %v5538_v59  ;;  %v8519_v43 = vadd.f32 %v5240_v45, %v11011_v3  ;;  %v5466_v52 = vpop.f32.mrb[100].mxu1  ;;  %v5242_v55 = vpop.f32.mrb[101].mxu0 }
 0x4ba   : > { %v8551_v25 = vadd.f32 %v5466_v52, %v11014_v61  ;;  %v8520_v16 = vadd.f32 %v5242_v55, %v11017_v57  ;;  %v5468_v42 = vpop.f32.mrb[101].mxu1  ;;  %v5244_v22 = vpop.f32.mrb[102].mxu0  ;;  %5926 = vmatprep.mubr.bf16.mxu0 %v5600_v49  ;;  %v9603_v55 = vld [vmem:[#allocation13 + $0x68] ss:$16 sps:$4 sm:$0xff]  }
 0x4bb   : > { %v8552_v39 = vadd.f32 %v5468_v42, %v11020_v17  ;;  %v8521_v50 = vadd.f32 %v5244_v22, %v11011_v3  ;;  %v5470_v35 = vpop.f32.mrb[102].mxu1  ;;  %6023 = vmatprep.mubr.bf16.mxu1 %v5602_v33  ;;  %v5246_v26 = vpop.f32.mrb[103].mxu0  ;;  %5927 = vmatmul.mubr.bf16.vlgmr.msra.gmra.mrb[128].mxu0 %v5599_v63  ;;  %v5543_v4 = vmax.f32 %v8519_v43, 0.0  ;;  %v9611_v22 = vld [vmem:[#allocation13 + $0x8c] ss:$16 sps:$4 sm:$0xff]  }
 0x4bc   : > { %v8553_v37 = vadd.f32 %v5470_v35, %v11014_v61  ;;  %v8522_v38 = vadd.f32 %v5246_v26, %v11017_v57  ;;  %v5472_v24 = vpop.f32.mrb[103].mxu1  ;;  %6024 = vmatmul.mubr.bf16.vlgmr.msra.gmra.mrb[128].mxu1 %v5601_v15  ;;  %6383 = vmatpush1.bf16.msra.mxu0 %v9582_v6  ;;  %v5545_v44 = vmax.f32 %v8551_v25, 0.0  ;;  %v5544_v13 = vmax.f32 %v8520_v16, 0.0  ;;  %v9600_v6 = vld [vmem:[#allocation13 + $0x60] ss:$16 sps:$4 sm:$0xff]  }
 0x4bd   : > { %v5547_v29 = vmax.f32 %v8521_v50, 0.0  ;;  %v8554_v18 = vadd.f32 %v5472_v24, %v11020_v17  ;;  %6496 = vmatpush1.bf16.msra.mxu1 %v9585_v36  ;;  %6384 = vmatprep.subr.bf16.mxu0 %v9590_v40  ;;  %v5546_v48 = vmax.f32 %v8552_v39, 0.0  ;;  %v9608_v36 = vld [vmem:[#allocation13 + $0x84] ss:$16 sps:$4 sm:$0xff]  }
 0x4be   : > { %v5549_v20 = vmax.f32 %v8553_v37, 0.0  ;;  %v5548_v7 = vmax.f32 %v8522_v38, 0.0  ;;  %6497 = vmatprep.subr.bf16.mxu1 %v9593_v34  ;;  %v9606_v38 = vld [vmem:[#allocation13 + $0x80] ss:$16 sps:$4 sm:$0xff]  }
 0x4bf   : > { %v5603_v5 = vpack.c.bf16 %v5547_v29, %v5543_v4  ;;  %v5550_v23 = vmax.f32 %v8554_v18, 0.0  ;;  %v9609_v18 = vld [vmem:[#allocation13 + $0x88] ss:$16 sps:$4 sm:$0xff]  }
 0x4c0   : > { %v5605_v12 = vpack.c.bf16 %v5549_v20, %v5545_v44  ;;  %v5604_v56 = vpack.c.bf16 %v5548_v7, %v5544_v13  ;;  %v5250_v46 = vpop.f32.mrb[104].mxu0  ;;  %6385 = vmatpush1.bf16.msra.mxu0 %v9588_v47  ;;  %v9617_v7 = vld [vmem:[#allocation13 + $0xac] ss:$16 sps:$4 sm:$0xff]  }
 0x4c1   : > { %v5606_v9 = vpack.c.bf16 %v5550_v23, %v5546_v48  ;;  %v8523_v27 = vadd.f32 %v5250_v46, %v11011_v3  ;;  %v5476_v30 = vpop.f32.mrb[104].mxu1  ;;  %v5252_v31 = vpop.f32.mrb[105].mxu0  ;;  %6498 = vmatpush1.bf16.msra.mxu1 %v9591_v51  ;;  %6386 = vmatprep.subr.bf16.mxu0 %v9596_v53  ;;  %v9614_v51 = vld [vmem:[#allocation13 + $0xa4] ss:$16 sps:$4 sm:$0xff]  }
 0x4c2   : > { %v8555_v2 = vadd.f32 %v5476_v30, %v11014_v61  ;;  %v8524_v41 = vadd.f32 %v5252_v31, %v11017_v57  ;;  %v5478_v62 = vpop.f32.mrb[105].mxu1  ;;  %v5254_v8 = vpop.f32.mrb[106].mxu0  ;;  %5934 = vmatprep.mubr.bf16.mxu0 %v5604_v56  ;;  %6499 = vmatprep.subr.bf16.mxu1 %v9599_v54  ;;  %v9615_v31 = vld [vmem:[#allocation13 + $0xa8] ss:$16 sps:$4 sm:$0xff]  }
 0x4c3   : > { %v8556_v14 = vadd.f32 %v5478_v62, %v11020_v17  ;;  %v8525_v59 = vadd.f32 %v5254_v8, %v11011_v3  ;;  %v5480_v63 = vpop.f32.mrb[106].mxu1  ;;  %6031 = vmatprep.mubr.bf16.mxu1 %v5606_v9  ;;  %v5256_v58 = vpop.f32.mrb[107].mxu0  ;;  %5935 = vmatmul.mubr.bf16.gmra.mrb[132].mxu0 %v5603_v5  ;;  %v5551_v33 = vmax.f32 %v8523_v27, 0.0  ;;  %v9623_v8 = vld [vmem:[#allocation13 + $0xcc] ss:$16 sps:$4 sm:$0xff]  }
 0x4c4   : > { %v8557_v15 = vadd.f32 %v5480_v63, %v11014_v61  ;;  %v8526_v49 = vadd.f32 %v5256_v58, %v11017_v57  ;;  %v5482_v45 = vpop.f32.mrb[107].mxu1  ;;  %6032 = vmatmul.mubr.bf16.gmra.mrb[132].mxu1 %v5605_v12  ;;  %6387 = vmatpush1.bf16.msra.mxu0 %v9594_v1  ;;  %v5553_v40 = vmax.f32 %v8555_v2, 0.0  ;;  %v5552_v25 = vmax.f32 %v8524_v41, 0.0  ;;  %v9612_v1 = vld [vmem:[#allocation13 + $0xa0] ss:$16 sps:$4 sm:$0xff]  }
 0x4c5   : > { %v5555_v43 = vmax.f32 %v8525_v59, 0.0  ;;  %v8558_v52 = vadd.f32 %v5482_v45, %v11020_v17  ;;  %6500 = vmatpush1.bf16.msra.mxu1 %v9597_v60  ;;  %6388 = vmatprep.subr.bf16.mxu0 %v9602_v10  ;;  %v5554_v34 = vmax.f32 %v8556_v14, 0.0  ;;  %v9620_v60 = vld [vmem:[#allocation13 + $0xc4] ss:$16 sps:$4 sm:$0xff]  }
 0x4c6   : > { %v5557_v16 = vmax.f32 %v8557_v15, 0.0  ;;  %v5556_v42 = vmax.f32 %v8526_v49, 0.0  ;;  %6501 = vmatprep.subr.bf16.mxu1 %v9605_v11  ;;  %v9618_v49 = vld [vmem:[#allocation13 + $0xc0] ss:$16 sps:$4 sm:$0xff]  }
 0x4c7   : > { %v5607_v39 = vpack.c.bf16 %v5555_v43, %v5551_v33  ;;  %v5558_v50 = vmax.f32 %v8558_v52, 0.0  ;;  %v9621_v52 = vld [vmem:[#allocation13 + $0xc8] ss:$16 sps:$4 sm:$0xff]  }
 0x4c8   : > { %v5609_v35 = vpack.c.bf16 %v5557_v16, %v5553_v40  ;;  %v5608_v26 = vpack.c.bf16 %v5556_v42, %v5552_v25  ;;  %v5260_v37 = vpop.f32.mrb[108].mxu0  ;;  %6389 = vmatpush1.bf16.msra.mxu0 %v9600_v6 }
 0x4c9   : > { %v5610_v24 = vpack.c.bf16 %v5558_v50, %v5554_v34  ;;  %v8527_v47 = vadd.f32 %v5260_v37, %v11011_v3  ;;  %v5486_v4 = vpop.f32.mrb[108].mxu1  ;;  %v5262_v29 = vpop.f32.mrb[109].mxu0  ;;  %6502 = vmatpush1.bf16.msra.mxu1 %v9603_v55  ;;  %6390 = vmatprep.subr.bf16.mxu0 %v9608_v36 }
 0x4ca   : > { %v8559_v53 = vadd.f32 %v5486_v4, %v11014_v61  ;;  %v8528_v44 = vadd.f32 %v5262_v29, %v11017_v57  ;;  %v5488_v13 = vpop.f32.mrb[109].mxu1  ;;  %v5264_v20 = vpop.f32.mrb[110].mxu0  ;;  %5942 = vmatprep.mubr.bf16.mxu0 %v5608_v26  ;;  %6503 = vmatprep.subr.bf16.mxu1 %v9611_v22 }
 0x4cb   : > { %v8560_v54 = vadd.f32 %v5488_v13, %v11020_v17  ;;  %v8529_v48 = vadd.f32 %v5264_v20, %v11011_v3  ;;  %v5490_v5 = vpop.f32.mrb[110].mxu1  ;;  %6039 = vmatprep.mubr.bf16.mxu1 %v5610_v24  ;;  %v5266_v23 = vpop.f32.mrb[111].mxu0  ;;  %5943 = vmatmul.mubr.bf16.gmra.mrb[136].mxu0 %v5607_v39  ;;  %v5559_v9 = vmax.f32 %v8527_v47, 0.0 }
 0x4cc   : > { %v8561_v12 = vadd.f32 %v5490_v5, %v11014_v61  ;;  %v8530_v56 = vadd.f32 %v5266_v23, %v11017_v57  ;;  %v5492_v46 = vpop.f32.mrb[111].mxu1  ;;  %6040 = vmatmul.mubr.bf16.gmra.mrb[136].mxu1 %v5609_v35  ;;  %6391 = vmatpush1.bf16.msra.mxu0 %v9606_v38  ;;  %v5561_v10 = vmax.f32 %v8559_v53, 0.0  ;;  %v5560_v2 = vmax.f32 %v8528_v44, 0.0 }
 0x4cd   : > { %v5563_v27 = vmax.f32 %v8529_v48, 0.0  ;;  %v8562_v30 = vadd.f32 %v5492_v46, %v11020_v17  ;;  %6504 = vmatpush1.bf16.msra.mxu1 %v9609_v18  ;;  %6392 = vmatprep.subr.bf16.mxu0 %v9614_v51  ;;  %v5562_v11 = vmax.f32 %v8560_v54, 0.0 }
 0x4ce   : > { %v5565_v41 = vmax.f32 %v8561_v12, 0.0  ;;  %v5564_v62 = vmax.f32 %v8530_v56, 0.0  ;;  %6505 = vmatprep.subr.bf16.mxu1 %v9617_v7 }
 0x4cf   : > { %v5611_v14 = vpack.c.bf16 %v5563_v27, %v5559_v9  ;;  %v5566_v59 = vmax.f32 %v8562_v30, 0.0 }
 0x4d0   : > { %v5613_v63 = vpack.c.bf16 %v5565_v41, %v5561_v10  ;;  %v5612_v58 = vpack.c.bf16 %v5564_v62, %v5560_v2  ;;  %v5270_v15 = vpop.f32.mrb[112].mxu0  ;;  %6393 = vmatpush1.bf16.msra.mxu0 %v9612_v1 }
 0x4d1   : > { %v5614_v45 = vpack.c.bf16 %v5566_v59, %v5562_v11  ;;  %v8531_v6 = vadd.f32 %v5270_v15, %v11011_v3  ;;  %v5496_v33 = vpop.f32.mrb[112].mxu1  ;;  %v5272_v43 = vpop.f32.mrb[113].mxu0  ;;  %6506 = vmatpush1.bf16.msra.mxu1 %v9615_v31  ;;  %6394 = vmatprep.subr.bf16.mxu0 %v9620_v60 }
 0x4d2   : > { %v8563_v55 = vadd.f32 %v5496_v33, %v11014_v61  ;;  %v8532_v36 = vadd.f32 %v5272_v43, %v11017_v57  ;;  %v5498_v40 = vpop.f32.mrb[113].mxu1  ;;  %v5274_v25 = vpop.f32.mrb[114].mxu0  ;;  %5950 = vmatprep.mubr.bf16.mxu0 %v5612_v58  ;;  %6507 = vmatprep.subr.bf16.mxu1 %v9623_v8 }
 0x4d3   : > { %v8564_v16 = vadd.f32 %v5498_v40, %v11020_v17  ;;  %v8533_v42 = vadd.f32 %v5274_v25, %v11011_v3  ;;  %v5500_v22 = vpop.f32.mrb[114].mxu1  ;;  %6047 = vmatprep.mubr.bf16.mxu1 %v5614_v45  ;;  %v5276_v34 = vpop.f32.mrb[115].mxu0  ;;  %5951 = vmatmul.mubr.bf16.gmra.mrb[140].mxu0 %v5611_v14  ;;  %v5567_v26 = vmax.f32 %v8531_v6, 0.0 }
 0x4d4   : > { %v8565_v39 = vadd.f32 %v5500_v22, %v11014_v61  ;;  %v8534_v50 = vadd.f32 %v5276_v34, %v11017_v57  ;;  %v5502_v35 = vpop.f32.mrb[115].mxu1  ;;  %6048 = vmatmul.mubr.bf16.gmra.mrb[140].mxu1 %v5613_v63  ;;  %6395 = vmatpush1.bf16.msra.mxu0 %v9618_v49  ;;  %v5569_v24 = vmax.f32 %v8563_v55, 0.0  ;;  %v5568_v47 = vmax.f32 %v8532_v36, 0.0 }
 0x4d5   : > { %v5571_v37 = vmax.f32 %v8533_v42, 0.0  ;;  %v8566_v38 = vadd.f32 %v5502_v35, %v11020_v17  ;;  %6508 = vmatpush1.bf16.msra.mxu1 %v9621_v52  ;;  %v5570_v18 = vmax.f32 %v8564_v16, 0.0 }
 0x4d6   : > { %v5573_v4 = vmax.f32 %v8565_v39, 0.0  ;;  %v5572_v29 = vmax.f32 %v8534_v50, 0.0 }
 0x4d7   : > { %v5615_v51 = vpack.c.bf16 %v5571_v37, %v5567_v26  ;;  %v5574_v53 = vmax.f32 %v8566_v38, 0.0 }
 0x4d8   : > { %v5617_v44 = vpack.c.bf16 %v5573_v4, %v5569_v24  ;;  %v5616_v13 = vpack.c.bf16 %v5572_v29, %v5568_v47  ;;  %v5280_v20 = vpop.f32.mrb[116].mxu0 }
 0x4d9   : > { %v5618_v7 = vpack.c.bf16 %v5574_v53, %v5570_v18  ;;  %v8535_v54 = vadd.f32 %v5280_v20, %v11011_v3  ;;  %v5506_v48 = vpop.f32.mrb[116].mxu1  ;;  %v5282_v5 = vpop.f32.mrb[117].mxu0 }
 0x4da   : > { %v8567_v23 = vadd.f32 %v5506_v48, %v11014_v61  ;;  %v8536_v12 = vadd.f32 %v5282_v5, %v11017_v57  ;;  %v5508_v56 = vpop.f32.mrb[117].mxu1  ;;  %v5284_v46 = vpop.f32.mrb[118].mxu0  ;;  %5958 = vmatprep.mubr.bf16.mxu0 %v5616_v13 }
 0x4db   : > { %v8568_v1 = vadd.f32 %v5508_v56, %v11020_v17  ;;  %v8537_v9 = vadd.f32 %v5284_v46, %v11011_v3  ;;  %v5510_v27 = vpop.f32.mrb[118].mxu1  ;;  %6055 = vmatprep.mubr.bf16.mxu1 %v5618_v7  ;;  %v5286_v30 = vpop.f32.mrb[119].mxu0  ;;  %5959 = vmatmul.mubr.bf16.gmra.mrb[144].mxu0 %v5615_v51  ;;  %v5575_v2 = vmax.f32 %v8535_v54, 0.0 }
 0x4dc   : > { %v8569_v31 = vadd.f32 %v5510_v27, %v11014_v61  ;;  %v8538_v60 = vadd.f32 %v5286_v30, %v11017_v57  ;;  %v5512_v10 = vpop.f32.mrb[119].mxu1  ;;  %6056 = vmatmul.mubr.bf16.gmra.mrb[144].mxu1 %v5617_v44  ;;  %v5577_v8 = vmax.f32 %v8567_v23, 0.0  ;;  %v5576_v11 = vmax.f32 %v8536_v12, 0.0 }
 0x4dd   : > { %v5579_v41 = vmax.f32 %v8537_v9, 0.0  ;;  %v8570_v62 = vadd.f32 %v5512_v10, %v11020_v17  ;;  %v5578_v63 = vmax.f32 %v8568_v1, 0.0 }
 0x4de   : > { %v5581_v14 = vmax.f32 %v8569_v31, 0.0  ;;  %v5580_v59 = vmax.f32 %v8538_v60, 0.0 }
 0x4df   : > { %v5619_v58 = vpack.c.bf16 %v5579_v41, %v5575_v2  ;;  %v5582_v15 = vmax.f32 %v8570_v62, 0.0 }
 0x4e0   : > { %v5621_v49 = vpack.c.bf16 %v5581_v14, %v5577_v8  ;;  %v5620_v45 = vpack.c.bf16 %v5580_v59, %v5576_v11  ;;  %v5290_v6 = vpop.f32.mrb[120].mxu0 }
 0x4e1   : > { %v5622_v33 = vpack.c.bf16 %v5582_v15, %v5578_v63  ;;  %v8539_v43 = vadd.f32 %v5290_v6, %v11011_v3  ;;  %v5516_v52 = vpop.f32.mrb[120].mxu1  ;;  %v5292_v55 = vpop.f32.mrb[121].mxu0 }
 0x4e2   : > { %v8571_v36 = vadd.f32 %v5516_v52, %v11014_v61  ;;  %v8540_v40 = vadd.f32 %v5292_v55, %v11017_v57  ;;  %v5518_v25 = vpop.f32.mrb[121].mxu1  ;;  %v5294_v16 = vpop.f32.mrb[122].mxu0  ;;  %5966 = vmatprep.mubr.bf16.mxu0 %v5620_v45  ;;  %v9632_v52 = vld [vmem:[#allocation14 + $0xc0] sm:$0xff]  }
 0x4e3   : > { %v8572_v42 = vadd.f32 %v5518_v25, %v11020_v17  ;;  %v8541_v22 = vadd.f32 %v5294_v16, %v11011_v3  ;;  %v5520_v34 = vpop.f32.mrb[122].mxu1  ;;  %6063 = vmatprep.mubr.bf16.mxu1 %v5622_v33  ;;  %v5296_v39 = vpop.f32.mrb[123].mxu0  ;;  %5967 = vmatmul.mubr.bf16.gmra.mrb[148].mxu0 %v5619_v58  ;;  %v5583_v37 = vmax.f32 %v8539_v43, 0.0  ;;  %v9627_v33 = vld [vmem:[#allocation13 + $0xe8] ss:$16 sps:$4 sm:$0xff]   ;;  %v9630_v43 = vld [vmem:[#allocation14 + $0x40] sm:$0xff]  }
 0x4e4   : > { %v8573_v50 = vadd.f32 %v5520_v34, %v11014_v61  ;;  %v8542_v35 = vadd.f32 %v5296_v39, %v11017_v57  ;;  %v5522_v26 = vpop.f32.mrb[123].mxu1  ;;  %6064 = vmatmul.mubr.bf16.gmra.mrb[148].mxu1 %v5621_v49  ;;  %v5585_v47 = vmax.f32 %v8571_v36, 0.0  ;;  %v5584_v4 = vmax.f32 %v8540_v40, 0.0  ;;  %v11091_v40 = vld [vmem:[%s11395_s3] ss:$0 sm:$0xff]  ;;  %s10019_s3 = smov [#allocation16]  }
 0x4e5   : > { %v5587_v38 = vmax.f32 %v8541_v22, 0.0  ;;  %v8574_v24 = vadd.f32 %v5522_v26, %v11020_v17  ;;  %v5586_v51 = vmax.f32 %v8572_v42, 0.0  ;;  %s9892_s28 = sshll.u32 %s10019_s3, 4  ;;  %s9893_s28 = int_to_ptr.vmem [resolvable:$false] %s9892_s28 }
 0x4e6   : > { %v5589_v29 = vmax.f32 %v8573_v50, 0.0  ;;  %v5588_v18 = vmax.f32 %v8542_v35, 0.0  ;;  %s9894_s14 = scalar_lea.vmem %s9893_s28, 2048  ;;  %p9895_p13 = scmp.lt.s32.totalorder %s11222_s25, %s9893_s28 }
 0x4e7   : > { %v5623_v53 = vpack.c.bf16 %v5587_v38, %v5583_v37  ;;  %v5590_v44 = vmax.f32 %v8574_v24, 0.0  ;;  %p9896_p8 = scmp.lt.s32.totalorder %s9894_s14, %s9888_s17 }
 0x4e8   : > { %v5625_v13 = vpack.c.bf16 %v5589_v29, %v5585_v47  ;;  %v5624_v20 = vpack.c.bf16 %v5588_v18, %v5584_v4  ;;  %v5300_v7 = vpop.f32.mrb[124].mxu0 }
 0x4e9   : > { %v5626_v54 = vpack.c.bf16 %v5590_v44, %v5586_v51  ;;  %v8543_v48 = vadd.f32 %v5300_v7, %v11011_v3  ;;  %v5526_v5 = vpop.f32.mrb[124].mxu1  ;;  %v5302_v23 = vpop.f32.mrb[125].mxu0  ;;  %v9631_v7 = vld [vmem:[#allocation14] sm:$0xff]   ;;  %p9897_p6 = por %p9896_p8, %p9895_p13 }
 0x4ea   : > { %v8575_v12 = vadd.f32 %v5526_v5, %v11014_v61  ;;  %v8544_v56 = vadd.f32 %v5302_v23, %v11017_v57  ;;  %v5528_v46 = vpop.f32.mrb[125].mxu1  ;;  %v5304_v1 = vpop.f32.mrb[126].mxu0  ;;  %5974 = vmatprep.mubr.bf16.mxu0 %v5624_v20 }
 0x4eb   : > { %v8576_v9 = vadd.f32 %v5528_v46, %v11020_v17  ;;  %v8545_v27 = vadd.f32 %v5304_v1, %v11011_v3  ;;  %v5530_v30 = vpop.f32.mrb[126].mxu1  ;;  %6071 = vmatprep.mubr.bf16.mxu1 %v5626_v54  ;;  %v5306_v31 = vpop.f32.mrb[127].mxu0  ;;  %5975 = vmatmul.mubr.bf16.gmra.mrb[152].mxu0 %v5623_v53  ;;  %v5591_v41 = vmax.f32 %v8543_v48, 0.0  ;;  %v9633_v54 = vld [vmem:[#allocation14 + $0x80] sm:$0xff]   ;;  %p9898_p9 = pnand %p9897_p6, %p9891_p12 }
 0x4ec   : > { %v8577_v60 = vadd.f32 %v5530_v30, %v11014_v61  ;;  %v8546_v10 = vadd.f32 %v5306_v31, %v11017_v57  ;;  %v5532_v2 = vpop.f32.mrb[127].mxu1  ;;  %6072 = vmatmul.mubr.bf16.gmra.mrb[152].mxu1 %v5625_v13  ;;  %v5593_v11 = vmax.f32 %v8575_v12, 0.0  ;;  %v5592_v14 = vmax.f32 %v8544_v56, 0.0  ;;  %v9626_v61 = vld [vmem:[#allocation13 + $0xe4] ss:$16 sps:$4 sm:$0xff]   ;;  %v9634_v12 = vld [vmem:[#allocation14 + $0x48] sm:$0xff]  }
 0x4ed   : > { %v5595_v62 = vmax.f32 %v8545_v27, 0.0  ;;  %v8578_v8 = vadd.f32 %v5532_v2, %v11020_v17  ;;  %v5594_v58 = vmax.f32 %v8576_v9, 0.0  ;;  %v9629_v57 = vld [vmem:[#allocation13 + $0xec] ss:$16 sps:$4 sm:$0xff]   ;;  %v9624_v17 = vld [vmem:[#allocation13 + $0xe0] ss:$16 sps:$4 sm:$0xff]   ;;  %6396 = vmatprep.subr.bf16.mxu0 %v9626_v61 }
 0x4ee   : > { %v5597_v59 = vmax.f32 %v8577_v60, 0.0  ;;  %v5596_v63 = vmax.f32 %v8546_v10, 0.0  ;;  %6509 = vmatprep.subr.bf16.mxu1 %v9629_v57  ;;  %6397 = vmatpush1.bf16.msra.mxu0 %v9624_v17  ;;  %v9636_v56 = vld [vmem:[#allocation14 + $0xc8] sm:$0xff]   ;;  %v9638_v2 = vld [vmem:[#allocation14 + $0x50] sm:$0xff]   ;;  %v9642_v57 = vld [vmem:[#allocation14 + $0x58] sm:$0xff]  }
 0x4ef   : > { %v5627_v3 = vpack.c.bf16 %v5595_v62, %v5591_v41  ;;  %v5598_v15 = vmax.f32 %v8578_v8, 0.0  ;;  %6510 = vmatpush1.bf16.msra.mxu1 %v9627_v33  ;;  %8323 = vmatprep.subr.bf16.mxu0 %v9630_v43  ;;  %v9635_v60 = vld [vmem:[#allocation14 + $0x8] sm:$0xff]   ;;  %v9640_v41 = vld [vmem:[#allocation14 + $0xd0] sm:$0xff]   ;;  %v9644_v17 = vld [vmem:[#allocation14 + $0xd8] sm:$0xff]  }
 0x4f0   : > { %v5629_v49 = vpack.c.bf16 %v5597_v59, %v5593_v11  ;;  %v5628_v45 = vpack.c.bf16 %v5596_v63, %v5592_v14  ;;  %8387 = vmatprep.subr.bf16.mxu1 %v9632_v52  ;;  %v9637_v10 = vld [vmem:[#allocation14 + $0x88] sm:$0xff]  }
 0x4f1   : > { %v5630_v6 = vpack.c.bf16 %v5598_v15, %v5594_v58  ;;  %v9639_v15 = vld [vmem:[#allocation14 + $0x10] sm:$0xff]  }
 0x4f2   : > { %5982 = vmatprep.mubr.bf16.mxu0 %v5628_v45 }
 0x4f3   : > { %6079 = vmatprep.mubr.bf16.mxu1 %v5630_v6  ;;  %5983 = vmatmul.mubr.bf16.gmra.mrb[156].mxu0 %v5627_v3 }
 0x4f4   : > { %6080 = vmatmul.mubr.bf16.gmra.mrb[156].mxu1 %v5629_v49  ;;  %6414 = vmatprep.mubr.bf16.mxu0 %v10018_v0  ;;  %v9641_v49 = vld [vmem:[#allocation14 + $0x90] sm:$0xff]  }
 0x4f5   : > { %6527 = vmatprep.mubr.bf16.mxu1 %v10018_v0 }
 0x58e   : > { %v8211_v55 = vpop.f32.mrb[128].mxu0 }
 0x58f   : > { %v8275_v36 = vpop.f32.mrb[128].mxu1  ;;  %v8212_v25 = vpop.f32.mrb[129].mxu0 }
 0x590   : > { %v8213_v16 = vadd.f32 %v8212_v25, %v8211_v55  ;;  %v8276_v42 = vpop.f32.mrb[129].mxu1  ;;  %v8214_v22 = vpop.f32.mrb[130].mxu0 }
 0x591   : > { %v8277_v34 = vadd.f32 %v8276_v42, %v8275_v36  ;;  %v8278_v39 = vpop.f32.mrb[130].mxu1  ;;  %v8215_v50 = vpop.f32.mrb[131].mxu0  ;;  %v9645_v42 = vld [vmem:[#allocation14 + $0x98] sm:$0xff]  }
 0x592   : > { %v5929_v35 = vadd.f32 %v8213_v16, %v11091_v40  ;;  %v8216_v26 = vadd.f32 %v8215_v50, %v8214_v22  ;;  %v8279_v37 = vpop.f32.mrb[131].mxu1  ;;  %v9643_v16 = vld [vmem:[#allocation14 + $0x18] sm:$0xff]   ;;  %v9646_v22 = vld [vmem:[#allocation14 + $0x60] sm:$0xff]  }
 0x593   : > { %v8280_v38 = vadd.f32 %v8279_v37, %v8278_v39 }
 0x594   : > { %v6026_v24 = vadd.f32 %v8277_v34, %v5929_v35  ;;  %v5932_v47 = vadd.f32 %v8216_v26, %v11091_v40  ;;  %v9648_v34 = vld [vmem:[#allocation14 + $0xe0] sm:$0xff]  }
 0x596   : > { %v6029_v4 = vadd.f32 %v8280_v38, %v5932_v47  ;;  %v8217_v29 = vpop.f32.mrb[132].mxu0 }
 0x597   : > { %v8281_v18 = vpop.f32.mrb[132].mxu1  ;;  %v8218_v51 = vpop.f32.mrb[133].mxu0 }
 0x598   : > { %v6088_v53 = vpack.c.bf16 %v6029_v4, %v6026_v24  ;;  %v8219_v44 = vadd.f32 %v8218_v51, %v8217_v29  ;;  %v8282_v13 = vpop.f32.mrb[133].mxu1  ;;  %v8220_v20 = vpop.f32.mrb[134].mxu0  ;;  %v9647_v4 = vld [vmem:[#allocation14 + $0x20] sm:$0xff]  }
 0x599   : > { %v8283_v48 = vadd.f32 %v8282_v13, %v8281_v18  ;;  %v8284_v5 = vpop.f32.mrb[134].mxu1  ;;  %v8221_v23 = vpop.f32.mrb[135].mxu0  ;;  %v9649_v29 = vld [vmem:[#allocation14 + $0xa0] sm:$0xff]   ;;  %v9652_v13 = vld [vmem:[#allocation14 + $0xe8] sm:$0xff]  }
 0x59a   : > { %8105 = vst [vmem:[%s11096_s12] sm:$0xff] %v6088_v53   ;;  %v5937_v46 = vadd.f32 %v8219_v44, %v11091_v40  ;;  %v8222_v1 = vadd.f32 %v8221_v23, %v8220_v20  ;;  %v8285_v9 = vpop.f32.mrb[135].mxu1  ;;  %6415 = vmatmul.mubr.bf16.vlgmr.msra.gmra.mrb[160].mxu0 %v6088_v53  ;;  %6528 = vmatmul.mubr.bf16.vlgmr.msra.gmra.mrb[160].mxu1 %v6088_v53  ;;  %v9650_v44 = vld [vmem:[#allocation14 + $0x68] sm:$0xff]  }
 0x59b   : > { %v8286_v27 = vadd.f32 %v8285_v9, %v8284_v5  ;;  %6424 = vmatprep.mubr.bf16.mxu0 %v10018_v0  ;;  %6537 = vmatprep.mubr.bf16.mxu1 %v10018_v0 }
 0x59c   : > { %v6034_v30 = vadd.f32 %v8283_v48, %v5937_v46  ;;  %v5940_v31 = vadd.f32 %v8222_v1, %v11091_v40  ;;  %8324 = vmatpush3.bf16.msra.mxu0 %v9631_v7  ;;  %8388 = vmatpush3.bf16.msra.mxu1 %v9633_v54  ;;  %v9654_v46 = vld [vmem:[#allocation14 + $0x70] sm:$0xff]  }
 0x59d   : > { %8325 = vmatprep.subr.bf16.mxu0 %v9634_v12  ;;  %8389 = vmatprep.subr.bf16.mxu1 %v9636_v56  ;;  %v9651_v12 = vld [vmem:[#allocation14 + $0x28] sm:$0xff]   ;;  %v9656_v1 = vld [vmem:[#allocation14 + $0xf0] sm:$0xff]  }
 0x59e   : > { %v6037_v62 = vadd.f32 %v8286_v27, %v5940_v31  ;;  %v8223_v8 = vpop.f32.mrb[136].mxu0  ;;  %v9653_v56 = vld [vmem:[#allocation14 + $0xa8] sm:$0xff]  }
 0x59f   : > { %v8287_v11 = vpop.f32.mrb[136].mxu1  ;;  %v8224_v14 = vpop.f32.mrb[137].mxu0 }
 0x5a0   : > { %v8225_v59 = vadd.f32 %v8224_v14, %v8223_v8  ;;  %v8288_v63 = vpop.f32.mrb[137].mxu1  ;;  %v8226_v58 = vpop.f32.mrb[138].mxu0  ;;  %v6089_v3 = vpack.c.bf16 %v6037_v62, %v6034_v30  ;;  %8326 = vmatpush3.bf16.msra.mxu0 %v9635_v60  ;;  %8390 = vmatpush3.bf16.msra.mxu1 %v9637_v10  ;;  %v9655_v62 = vld [vmem:[#allocation14 + $0x30] sm:$0xff]  }
 0x5a1   : > { %v8289_v45 = vadd.f32 %v8288_v63, %v8287_v11  ;;  %v8290_v6 = vpop.f32.mrb[138].mxu1  ;;  %v8227_v61 = vpop.f32.mrb[139].mxu0  ;;  %8327 = vmatprep.subr.bf16.mxu0 %v9638_v2  ;;  %8391 = vmatprep.subr.bf16.mxu1 %v9640_v41  ;;  %v9657_v8 = vld [vmem:[#allocation14 + $0xb0] sm:$0xff]  }
 0x5a2   : > { %v5945_v33 = vadd.f32 %v8225_v59, %v11091_v40  ;;  %v8228_v43 = vadd.f32 %v8227_v61, %v8226_v58  ;;  %v8291_v52 = vpop.f32.mrb[139].mxu1  ;;  %8181 = vst [vmem:[%s11096_s12 + $0x8] sm:$0xff] %v6089_v3   ;;  %6425 = vmatmul.mubr.bf16.gmra.mrb[164].mxu0 %v6089_v3  ;;  %6538 = vmatmul.mubr.bf16.gmra.mrb[164].mxu1 %v6089_v3 }
 0x5a3   : > { %v8292_v55 = vadd.f32 %v8291_v52, %v8290_v6  ;;  %6434 = vmatprep.mubr.bf16.mxu0 %v10018_v0  ;;  %6547 = vmatprep.mubr.bf16.mxu1 %v10018_v0 }
 0x5a4   : > { %v6042_v36 = vadd.f32 %v8289_v45, %v5945_v33  ;;  %v5948_v25 = vadd.f32 %v8228_v43, %v11091_v40  ;;  %8328 = vmatpush3.bf16.msra.mxu0 %v9639_v15  ;;  %8392 = vmatpush3.bf16.msra.mxu1 %v9641_v49 }
 0x5a5   : > { %8329 = vmatprep.subr.bf16.mxu0 %v9642_v57  ;;  %8393 = vmatprep.subr.bf16.mxu1 %v9644_v17 }
 0x5a6   : > { %v6045_v39 = vadd.f32 %v8292_v55, %v5948_v25  ;;  %v8229_v50 = vpop.f32.mrb[140].mxu0 }
 0x5a7   : > { %v8293_v35 = vpop.f32.mrb[140].mxu1  ;;  %v8230_v26 = vpop.f32.mrb[141].mxu0 }
 0x5a8   : > { %v8231_v37 = vadd.f32 %v8230_v26, %v8229_v50  ;;  %v8294_v38 = vpop.f32.mrb[141].mxu1  ;;  %v8232_v24 = vpop.f32.mrb[142].mxu0  ;;  %v6090_v47 = vpack.c.bf16 %v6045_v39, %v6042_v36  ;;  %8330 = vmatpush3.bf16.msra.mxu0 %v9643_v16  ;;  %8394 = vmatpush3.bf16.msra.mxu1 %v9645_v42 }
 0x5a9   : > { %v8295_v18 = vadd.f32 %v8294_v38, %v8293_v35  ;;  %v8296_v51 = vpop.f32.mrb[142].mxu1  ;;  %v8233_v53 = vpop.f32.mrb[143].mxu0  ;;  %8331 = vmatprep.subr.bf16.mxu0 %v9646_v22  ;;  %8395 = vmatprep.subr.bf16.mxu1 %v9648_v34 }
 0x5aa   : > { %v5953_v20 = vadd.f32 %v8231_v37, %v11091_v40  ;;  %v8234_v7 = vadd.f32 %v8233_v53, %v8232_v24  ;;  %v8297_v54 = vpop.f32.mrb[143].mxu1  ;;  %8182 = vst [vmem:[%s11096_s12 + $0x10] sm:$0xff] %v6090_v47   ;;  %6435 = vmatmul.mubr.bf16.gmra.mrb[168].mxu0 %v6090_v47  ;;  %6548 = vmatmul.mubr.bf16.gmra.mrb[168].mxu1 %v6090_v47 }
 0x5ab   : > { %v8298_v48 = vadd.f32 %v8297_v54, %v8296_v51  ;;  %6444 = vmatprep.mubr.bf16.mxu0 %v10018_v0  ;;  %6557 = vmatprep.mubr.bf16.mxu1 %v10018_v0 }
 0x5ac   : > { %v6050_v5 = vadd.f32 %v8295_v18, %v5953_v20  ;;  %v5956_v23 = vadd.f32 %v8234_v7, %v11091_v40  ;;  %8332 = vmatpush3.bf16.msra.mxu0 %v9647_v4  ;;  %8396 = vmatpush3.bf16.msra.mxu1 %v9649_v29 }
 0x5ad   : > { %8333 = vmatprep.subr.bf16.mxu0 %v9650_v44  ;;  %8397 = vmatprep.subr.bf16.mxu1 %v9652_v13 }
 0x5ae   : > { %v6053_v9 = vadd.f32 %v8298_v48, %v5956_v23  ;;  %v8235_v27 = vpop.f32.mrb[144].mxu0 }
 0x5af   : > { %v8299_v30 = vpop.f32.mrb[144].mxu1  ;;  %v8236_v31 = vpop.f32.mrb[145].mxu0 }
 0x5b0   : > { %v8237_v60 = vadd.f32 %v8236_v31, %v8235_v27  ;;  %v8300_v10 = vpop.f32.mrb[145].mxu1  ;;  %v8238_v2 = vpop.f32.mrb[146].mxu0  ;;  %v6091_v41 = vpack.c.bf16 %v6053_v9, %v6050_v5  ;;  %8334 = vmatpush3.bf16.msra.mxu0 %v9651_v12  ;;  %8398 = vmatpush3.bf16.msra.mxu1 %v9653_v56 }
 0x5b1   : > { %v8301_v11 = vadd.f32 %v8300_v10, %v8299_v30  ;;  %v8302_v14 = vpop.f32.mrb[146].mxu1  ;;  %v8239_v59 = vpop.f32.mrb[147].mxu0  ;;  %8335 = vmatprep.subr.bf16.mxu0 %v9654_v46  ;;  %8399 = vmatprep.subr.bf16.mxu1 %v9656_v1 }
 0x5b2   : > { %v5961_v63 = vadd.f32 %v8237_v60, %v11091_v40  ;;  %v8240_v58 = vadd.f32 %v8239_v59, %v8238_v2  ;;  %v8303_v3 = vpop.f32.mrb[147].mxu1  ;;  %8183 = vst [vmem:[%s11096_s12 + $0x18] sm:$0xff] %v6091_v41   ;;  %6445 = vmatmul.mubr.bf16.gmra.mrb[172].mxu0 %v6091_v41  ;;  %6558 = vmatmul.mubr.bf16.gmra.mrb[172].mxu1 %v6091_v41 }
 0x5b3   : > { %v8304_v15 = vadd.f32 %v8303_v3, %v8302_v14  ;;  %6454 = vmatprep.mubr.bf16.mxu0 %v10018_v0  ;;  %6567 = vmatprep.mubr.bf16.mxu1 %v10018_v0  ;;  %v9660_v3 = vld [vmem:[#allocation14 + $0xf8] sm:$0xff]  }
 0x5b4   : > { %v6058_v49 = vadd.f32 %v8301_v11, %v5961_v63  ;;  %v5964_v45 = vadd.f32 %v8240_v58, %v11091_v40  ;;  %8336 = vmatpush3.bf16.msra.mxu0 %v9655_v62  ;;  %8400 = vmatpush3.bf16.msra.mxu1 %v9657_v8  ;;  %v9658_v58 = vld [vmem:[#allocation14 + $0x78] sm:$0xff]  }
 0x5b5   : > { %8337 = vmatprep.subr.bf16.mxu0 %v9658_v58  ;;  %8401 = vmatprep.subr.bf16.mxu1 %v9660_v3 }
 0x5b6   : > { %v6061_v6 = vadd.f32 %v8304_v15, %v5964_v45  ;;  %v8241_v61 = vpop.f32.mrb[148].mxu0  ;;  %v9659_v15 = vld [vmem:[#allocation14 + $0x38] sm:$0xff]  }
 0x5b7   : > { %v8305_v57 = vpop.f32.mrb[148].mxu1  ;;  %v8242_v17 = vpop.f32.mrb[149].mxu0 }
 0x5b8   : > { %v8243_v33 = vadd.f32 %v8242_v17, %v8241_v61  ;;  %v8306_v43 = vpop.f32.mrb[149].mxu1  ;;  %v8244_v52 = vpop.f32.mrb[150].mxu0  ;;  %v6092_v55 = vpack.c.bf16 %v6061_v6, %v6058_v49  ;;  %v9661_v49 = vld [vmem:[#allocation14 + $0xb8] sm:$0xff]   ;;  %8338 = vmatpush3.bf16.msra.mxu0 %v9659_v15 }
 0x5b9   : > { %v8307_v36 = vadd.f32 %v8306_v43, %v8305_v57  ;;  %v8308_v25 = vpop.f32.mrb[150].mxu1  ;;  %v8245_v16 = vpop.f32.mrb[151].mxu0  ;;  %8402 = vmatpush3.bf16.msra.mxu1 %v9661_v49 }
 0x5ba   : > { %v5969_v42 = vadd.f32 %v8243_v33, %v11091_v40  ;;  %v8246_v22 = vadd.f32 %v8245_v16, %v8244_v52  ;;  %v8309_v34 = vpop.f32.mrb[151].mxu1  ;;  %8184 = vst [vmem:[%s11096_s12 + $0x20] sm:$0xff] %v6092_v55   ;;  %6455 = vmatmul.mubr.bf16.gmra.mrb[176].mxu0 %v6092_v55  ;;  %6568 = vmatmul.mubr.bf16.gmra.mrb[176].mxu1 %v6092_v55 }
 0x5bb   : > { %v8310_v39 = vadd.f32 %v8309_v34, %v8308_v25  ;;  %6464 = vmatprep.mubr.bf16.mxu0 %v10018_v0  ;;  %6577 = vmatprep.mubr.bf16.mxu1 %v10018_v0 }
 0x5bc   : > { %v6066_v50 = vadd.f32 %v8307_v36, %v5969_v42  ;;  %v5972_v35 = vadd.f32 %v8246_v22, %v11091_v40 }
 0x5be   : > { %v6069_v26 = vadd.f32 %v8310_v39, %v5972_v35  ;;  %v8247_v37 = vpop.f32.mrb[152].mxu0 }
 0x5bf   : > { %v8311_v38 = vpop.f32.mrb[152].mxu1  ;;  %v8248_v24 = vpop.f32.mrb[153].mxu0 }
 0x5c0   : > { %v8249_v47 = vadd.f32 %v8248_v24, %v8247_v37  ;;  %v8312_v4 = vpop.f32.mrb[153].mxu1  ;;  %v8250_v29 = vpop.f32.mrb[154].mxu0  ;;  %v6093_v18 = vpack.c.bf16 %v6069_v26, %v6066_v50 }
 0x5c1   : > { %v8313_v51 = vadd.f32 %v8312_v4, %v8311_v38  ;;  %v8314_v53 = vpop.f32.mrb[154].mxu1  ;;  %v8251_v44 = vpop.f32.mrb[155].mxu0 }
 0x5c2   : > { %v5977_v13 = vadd.f32 %v8249_v47, %v11091_v40  ;;  %v8252_v20 = vadd.f32 %v8251_v44, %v8250_v29  ;;  %v8315_v7 = vpop.f32.mrb[155].mxu1  ;;  %8185 = vst [vmem:[%s11096_s12 + $0x28] sm:$0xff] %v6093_v18   ;;  %6465 = vmatmul.mubr.bf16.gmra.mrb[180].mxu0 %v6093_v18  ;;  %6578 = vmatmul.mubr.bf16.gmra.mrb[180].mxu1 %v6093_v18 }
 0x5c3   : > { %v8316_v54 = vadd.f32 %v8315_v7, %v8314_v53  ;;  %6474 = vmatprep.mubr.bf16.mxu0 %v10018_v0  ;;  %6587 = vmatprep.mubr.bf16.mxu1 %v10018_v0 }
 0x5c4   : > { %v6074_v48 = vadd.f32 %v8313_v51, %v5977_v13  ;;  %v5980_v5 = vadd.f32 %v8252_v20, %v11091_v40 }
 0x5c6   : > { %v6077_v23 = vadd.f32 %v8316_v54, %v5980_v5  ;;  %v8253_v12 = vpop.f32.mrb[156].mxu0 }
 0x5c7   : > { %v8317_v56 = vpop.f32.mrb[156].mxu1  ;;  %v8254_v46 = vpop.f32.mrb[157].mxu0 }
 0x5c8   : > { %v8255_v1 = vadd.f32 %v8254_v46, %v8253_v12  ;;  %v8318_v9 = vpop.f32.mrb[157].mxu1  ;;  %v8256_v27 = vpop.f32.mrb[158].mxu0  ;;  %v6094_v30 = vpack.c.bf16 %v6077_v23, %v6074_v48 }
 0x5c9   : > { %v8319_v31 = vadd.f32 %v8318_v9, %v8317_v56  ;;  %v8320_v60 = vpop.f32.mrb[158].mxu1  ;;  %v8257_v10 = vpop.f32.mrb[159].mxu0 }
 0x5ca   : > { %v5985_v2 = vadd.f32 %v8255_v1, %v11091_v40  ;;  %v8258_v41 = vadd.f32 %v8257_v10, %v8256_v27  ;;  %v8321_v62 = vpop.f32.mrb[159].mxu1  ;;  %8186 = vst [vmem:[%s11096_s12 + $0x30] sm:$0xff] %v6094_v30   ;;  %6475 = vmatmul.mubr.bf16.gmra.mrb[184].mxu0 %v6094_v30  ;;  %6588 = vmatmul.mubr.bf16.gmra.mrb[184].mxu1 %v6094_v30 }
 0x5cb   : > { %v8322_v8 = vadd.f32 %v8321_v62, %v8320_v60  ;;  %6484 = vmatprep.mubr.bf16.mxu0 %v10018_v0  ;;  %6597 = vmatprep.mubr.bf16.mxu1 %v10018_v0  ;;  %v6200_v0 = vld [vmem:[%s11396_s23] sm:$0xf] }
 0x5cc   : > { %v6082_v11 = vadd.f32 %v8319_v31, %v5985_v2  ;;  %v5988_v14 = vadd.f32 %v8258_v41, %v11091_v40  ;;  %v11138_v45 = vrot.slane %v6200_v0, %v10499_v19  ;;  %v11141_v40 = vrot.slane %v6200_v0, %v10517_v28 }
 0x5cd   : > { %v11144_v6 = vrot.slane %v6200_v0, %v10504_v21  ;;  %v11147_v61 = vrot.slane %v6200_v0, %v10521_v32 }
 0x5ce   : > { %v6085_v59 = vadd.f32 %v8322_v8, %v5988_v14 }
 0x5d0   : > { %v6095_v63 = vpack.c.bf16 %v6085_v59, %v6082_v11 }
 0x5d2   : > { %8187 = vst [vmem:[%s11096_s12 + $0x38] sm:$0xff] %v6095_v63   ;;  %6485 = vmatmul.mubr.bf16.gmra.mrb[188].mxu0 %v6095_v63  ;;  %6598 = vmatmul.mubr.bf16.gmra.mrb[188].mxu1 %v6095_v63 }
 0x66d   : > { %v6416_v57 = vpop.f32.mrb[160].mxu0  ;;  %v6529_v17 = vpop.f32.mrb[160].mxu1 }
 0x66e   : > { %v6417_v33 = vadd.f32 %v6416_v57, %v11138_v45  ;;  %v6530_v43 = vadd.f32 %v6529_v17, %v11141_v40  ;;  %v6418_v52 = vpop.f32.mrb[161].mxu0  ;;  %v6531_v55 = vpop.f32.mrb[161].mxu1 }
 0x66f   : > { %v6419_v19 = vadd.f32 %v6418_v52, %v11144_v6  ;;  %v6532_v36 = vadd.f32 %v6531_v55, %v11147_v61  ;;  %v6420_v28 = vpop.f32.mrb[162].mxu0  ;;  %v6533_v25 = vpop.f32.mrb[162].mxu1 }
 0x670   : > { %v6421_v21 = vadd.f32 %v6420_v28, %v11138_v45  ;;  %v6534_v16 = vadd.f32 %v6533_v25, %v11141_v40  ;;  %v6422_v32 = vpop.f32.mrb[163].mxu0  ;;  %v6535_v42 = vpop.f32.mrb[163].mxu1  ;;  %v6608_v39 = vmax.f32 %v6417_v33, 0.0  ;;  %v6610_v50 = vmax.f32 %v6530_v43, 0.0 }
 0x671   : > { %v6423_v22 = vadd.f32 %v6422_v32, %v11144_v6  ;;  %v6536_v34 = vadd.f32 %v6535_v42, %v11147_v61  ;;  %v6609_v37 = vmax.f32 %v6419_v19, 0.0  ;;  %v6611_v38 = vmax.f32 %v6532_v36, 0.0 }
 0x672   : > { %v6612_v35 = vmax.f32 %v6421_v21, 0.0  ;;  %v6614_v26 = vmax.f32 %v6534_v16, 0.0 }
 0x673   : > { %v6613_v24 = vmax.f32 %v6423_v22, 0.0  ;;  %v6615_v47 = vmax.f32 %v6536_v34, 0.0 }
 0x674   : > { %v6672_v4 = vpack.c.bf16 %v6612_v35, %v6608_v39  ;;  %v6674_v29 = vpack.c.bf16 %v6614_v26, %v6610_v50 }
 0x675   : > { %v6673_v18 = vpack.c.bf16 %v6613_v24, %v6609_v37  ;;  %v6675_v51 = vpack.c.bf16 %v6615_v47, %v6611_v38  ;;  %v6426_v53 = vpop.f32.mrb[164].mxu0  ;;  %v6539_v44 = vpop.f32.mrb[164].mxu1 }
 0x676   : > { %v6427_v13 = vadd.f32 %v6426_v53, %v11138_v45  ;;  %v6540_v20 = vadd.f32 %v6539_v44, %v11141_v40  ;;  %v6428_v7 = vpop.f32.mrb[165].mxu0  ;;  %v6541_v54 = vpop.f32.mrb[165].mxu1 }
 0x677   : > { %v6429_v48 = vadd.f32 %v6428_v7, %v11144_v6  ;;  %v6542_v5 = vadd.f32 %v6541_v54, %v11147_v61  ;;  %v6430_v23 = vpop.f32.mrb[166].mxu0  ;;  %v6543_v12 = vpop.f32.mrb[166].mxu1  ;;  %6999 = vmatprep.mubr.bf16.mxu0 %v6673_v18  ;;  %7096 = vmatprep.mubr.bf16.mxu1 %v6675_v51 }
 0x678   : > { %v6431_v56 = vadd.f32 %v6430_v23, %v11138_v45  ;;  %v6544_v46 = vadd.f32 %v6543_v12, %v11141_v40  ;;  %v6432_v1 = vpop.f32.mrb[167].mxu0  ;;  %v6545_v9 = vpop.f32.mrb[167].mxu1  ;;  %7000 = vmatmul.mubr.bf16.vlgmr.msra.gmra.mrb[192].mxu0 %v6672_v4  ;;  %7097 = vmatmul.mubr.bf16.vlgmr.msra.gmra.mrb[192].mxu1 %v6674_v29  ;;  %v6616_v31 = vmax.f32 %v6427_v13, 0.0  ;;  %v6618_v60 = vmax.f32 %v6540_v20, 0.0 }
 0x679   : > { %v6433_v27 = vadd.f32 %v6432_v1, %v11144_v6  ;;  %v6546_v30 = vadd.f32 %v6545_v9, %v11147_v61  ;;  %v6617_v41 = vmax.f32 %v6429_v48, 0.0  ;;  %v6619_v62 = vmax.f32 %v6542_v5, 0.0 }
 0x67a   : > { %v6620_v10 = vmax.f32 %v6431_v56, 0.0  ;;  %v6622_v2 = vmax.f32 %v6544_v46, 0.0 }
 0x67b   : > { %v6621_v8 = vmax.f32 %v6433_v27, 0.0  ;;  %v6623_v11 = vmax.f32 %v6546_v30, 0.0 }
 0x67c   : > { %v6676_v14 = vpack.c.bf16 %v6620_v10, %v6616_v31  ;;  %v6678_v59 = vpack.c.bf16 %v6622_v2, %v6618_v60 }
 0x67d   : > { %v6677_v63 = vpack.c.bf16 %v6621_v8, %v6617_v41  ;;  %v6679_v58 = vpack.c.bf16 %v6623_v11, %v6619_v62  ;;  %v6436_v3 = vpop.f32.mrb[168].mxu0  ;;  %v6549_v15 = vpop.f32.mrb[168].mxu1 }
 0x67e   : > { %v6437_v49 = vadd.f32 %v6436_v3, %v11138_v45  ;;  %v6550_v0 = vadd.f32 %v6549_v15, %v11141_v40  ;;  %v6438_v57 = vpop.f32.mrb[169].mxu0  ;;  %v6551_v17 = vpop.f32.mrb[169].mxu1 }
 0x67f   : > { %v6439_v33 = vadd.f32 %v6438_v57, %v11144_v6  ;;  %v6552_v43 = vadd.f32 %v6551_v17, %v11147_v61  ;;  %v6440_v52 = vpop.f32.mrb[170].mxu0  ;;  %v6553_v55 = vpop.f32.mrb[170].mxu1  ;;  %7007 = vmatprep.mubr.bf16.mxu0 %v6677_v63  ;;  %7104 = vmatprep.mubr.bf16.mxu1 %v6679_v58 }
 0x680   : > { %v6441_v19 = vadd.f32 %v6440_v52, %v11138_v45  ;;  %v6554_v36 = vadd.f32 %v6553_v55, %v11141_v40  ;;  %v6442_v28 = vpop.f32.mrb[171].mxu0  ;;  %v6555_v25 = vpop.f32.mrb[171].mxu1  ;;  %7008 = vmatmul.mubr.bf16.gmra.mrb[196].mxu0 %v6676_v14  ;;  %7105 = vmatmul.mubr.bf16.gmra.mrb[196].mxu1 %v6678_v59  ;;  %v6624_v32 = vmax.f32 %v6437_v49, 0.0  ;;  %v6626_v42 = vmax.f32 %v6550_v0, 0.0 }
 0x681   : > { %v6443_v21 = vadd.f32 %v6442_v28, %v11144_v6  ;;  %v6556_v16 = vadd.f32 %v6555_v25, %v11147_v61  ;;  %v6625_v39 = vmax.f32 %v6439_v33, 0.0  ;;  %v6627_v50 = vmax.f32 %v6552_v43, 0.0 }
 0x682   : > { %v6628_v22 = vmax.f32 %v6441_v19, 0.0  ;;  %v6630_v34 = vmax.f32 %v6554_v36, 0.0 }
 0x683   : > { %v6629_v35 = vmax.f32 %v6443_v21, 0.0  ;;  %v6631_v26 = vmax.f32 %v6556_v16, 0.0 }
 0x684   : > { %v6680_v37 = vpack.c.bf16 %v6628_v22, %v6624_v32  ;;  %v6682_v38 = vpack.c.bf16 %v6630_v34, %v6626_v42 }
 0x685   : > { %v6681_v24 = vpack.c.bf16 %v6629_v35, %v6625_v39  ;;  %v6683_v47 = vpack.c.bf16 %v6631_v26, %v6627_v50  ;;  %v6446_v4 = vpop.f32.mrb[172].mxu0  ;;  %v6559_v29 = vpop.f32.mrb[172].mxu1 }
 0x686   : > { %v6447_v18 = vadd.f32 %v6446_v4, %v11138_v45  ;;  %v6560_v51 = vadd.f32 %v6559_v29, %v11141_v40  ;;  %v6448_v53 = vpop.f32.mrb[173].mxu0  ;;  %v6561_v44 = vpop.f32.mrb[173].mxu1 }
 0x687   : > { %v6449_v13 = vadd.f32 %v6448_v53, %v11144_v6  ;;  %v6562_v20 = vadd.f32 %v6561_v44, %v11147_v61  ;;  %v6450_v7 = vpop.f32.mrb[174].mxu0  ;;  %v6563_v54 = vpop.f32.mrb[174].mxu1  ;;  %7015 = vmatprep.mubr.bf16.mxu0 %v6681_v24  ;;  %7112 = vmatprep.mubr.bf16.mxu1 %v6683_v47 }
 0x688   : > { %v6451_v48 = vadd.f32 %v6450_v7, %v11138_v45  ;;  %v6564_v5 = vadd.f32 %v6563_v54, %v11141_v40  ;;  %v6452_v23 = vpop.f32.mrb[175].mxu0  ;;  %v6565_v12 = vpop.f32.mrb[175].mxu1  ;;  %7016 = vmatmul.mubr.bf16.gmra.mrb[200].mxu0 %v6680_v37  ;;  %7113 = vmatmul.mubr.bf16.gmra.mrb[200].mxu1 %v6682_v38  ;;  %v6632_v1 = vmax.f32 %v6447_v18, 0.0  ;;  %v6634_v9 = vmax.f32 %v6560_v51, 0.0 }
 0x689   : > { %v6453_v56 = vadd.f32 %v6452_v23, %v11144_v6  ;;  %v6566_v46 = vadd.f32 %v6565_v12, %v11147_v61  ;;  %v6633_v31 = vmax.f32 %v6449_v13, 0.0  ;;  %v6635_v60 = vmax.f32 %v6562_v20, 0.0 }
 0x68a   : > { %v6636_v27 = vmax.f32 %v6451_v48, 0.0  ;;  %v6638_v30 = vmax.f32 %v6564_v5, 0.0 }
 0x68b   : > { %v6637_v10 = vmax.f32 %v6453_v56, 0.0  ;;  %v6639_v2 = vmax.f32 %v6566_v46, 0.0 }
 0x68c   : > { %v6684_v41 = vpack.c.bf16 %v6636_v27, %v6632_v1  ;;  %v6686_v62 = vpack.c.bf16 %v6638_v30, %v6634_v9 }
 0x68d   : > { %v6685_v8 = vpack.c.bf16 %v6637_v10, %v6633_v31  ;;  %v6687_v11 = vpack.c.bf16 %v6639_v2, %v6635_v60  ;;  %v6456_v14 = vpop.f32.mrb[176].mxu0  ;;  %v6569_v59 = vpop.f32.mrb[176].mxu1 }
 0x68e   : > { %v6457_v63 = vadd.f32 %v6456_v14, %v11138_v45  ;;  %v6570_v58 = vadd.f32 %v6569_v59, %v11141_v40  ;;  %v6458_v3 = vpop.f32.mrb[177].mxu0  ;;  %v6571_v15 = vpop.f32.mrb[177].mxu1 }
 0x68f   : > { %v6459_v49 = vadd.f32 %v6458_v3, %v11144_v6  ;;  %v6572_v0 = vadd.f32 %v6571_v15, %v11147_v61  ;;  %v6460_v57 = vpop.f32.mrb[178].mxu0  ;;  %v6573_v17 = vpop.f32.mrb[178].mxu1  ;;  %7023 = vmatprep.mubr.bf16.mxu0 %v6685_v8  ;;  %7120 = vmatprep.mubr.bf16.mxu1 %v6687_v11 }
 0x690   : > { %v6461_v33 = vadd.f32 %v6460_v57, %v11138_v45  ;;  %v6574_v43 = vadd.f32 %v6573_v17, %v11141_v40  ;;  %v6462_v52 = vpop.f32.mrb[179].mxu0  ;;  %v6575_v55 = vpop.f32.mrb[179].mxu1  ;;  %7024 = vmatmul.mubr.bf16.gmra.mrb[204].mxu0 %v6684_v41  ;;  %7121 = vmatmul.mubr.bf16.gmra.mrb[204].mxu1 %v6686_v62  ;;  %v6640_v28 = vmax.f32 %v6457_v63, 0.0  ;;  %v6642_v25 = vmax.f32 %v6570_v58, 0.0 }
 0x691   : > { %v6463_v19 = vadd.f32 %v6462_v52, %v11144_v6  ;;  %v6576_v36 = vadd.f32 %v6575_v55, %v11147_v61  ;;  %v6641_v32 = vmax.f32 %v6459_v49, 0.0  ;;  %v6643_v42 = vmax.f32 %v6572_v0, 0.0 }
 0x692   : > { %v6644_v21 = vmax.f32 %v6461_v33, 0.0  ;;  %v6646_v16 = vmax.f32 %v6574_v43, 0.0 }
 0x693   : > { %v6645_v22 = vmax.f32 %v6463_v19, 0.0  ;;  %v6647_v34 = vmax.f32 %v6576_v36, 0.0 }
 0x694   : > { %v6688_v39 = vpack.c.bf16 %v6644_v21, %v6640_v28  ;;  %v6690_v50 = vpack.c.bf16 %v6646_v16, %v6642_v25 }
 0x695   : > { %v6689_v35 = vpack.c.bf16 %v6645_v22, %v6641_v32  ;;  %v6691_v26 = vpack.c.bf16 %v6647_v34, %v6643_v42  ;;  %v6466_v37 = vpop.f32.mrb[180].mxu0  ;;  %v6579_v38 = vpop.f32.mrb[180].mxu1 }
 0x696   : > { %v6467_v24 = vadd.f32 %v6466_v37, %v11138_v45  ;;  %v6580_v47 = vadd.f32 %v6579_v38, %v11141_v40  ;;  %v6468_v4 = vpop.f32.mrb[181].mxu0  ;;  %v6581_v29 = vpop.f32.mrb[181].mxu1 }
 0x697   : > { %v6469_v18 = vadd.f32 %v6468_v4, %v11144_v6  ;;  %v6582_v51 = vadd.f32 %v6581_v29, %v11147_v61  ;;  %v6470_v53 = vpop.f32.mrb[182].mxu0  ;;  %v6583_v44 = vpop.f32.mrb[182].mxu1  ;;  %7031 = vmatprep.mubr.bf16.mxu0 %v6689_v35  ;;  %7128 = vmatprep.mubr.bf16.mxu1 %v6691_v26 }
 0x698   : > { %v6471_v13 = vadd.f32 %v6470_v53, %v11138_v45  ;;  %v6584_v20 = vadd.f32 %v6583_v44, %v11141_v40  ;;  %v6472_v7 = vpop.f32.mrb[183].mxu0  ;;  %v6585_v54 = vpop.f32.mrb[183].mxu1  ;;  %7032 = vmatmul.mubr.bf16.gmra.mrb[208].mxu0 %v6688_v39  ;;  %7129 = vmatmul.mubr.bf16.gmra.mrb[208].mxu1 %v6690_v50  ;;  %v6648_v23 = vmax.f32 %v6467_v24, 0.0  ;;  %v6650_v12 = vmax.f32 %v6580_v47, 0.0 }
 0x699   : > { %v6473_v48 = vadd.f32 %v6472_v7, %v11144_v6  ;;  %v6586_v5 = vadd.f32 %v6585_v54, %v11147_v61  ;;  %v6649_v1 = vmax.f32 %v6469_v18, 0.0  ;;  %v6651_v9 = vmax.f32 %v6582_v51, 0.0 }
 0x69a   : > { %v6652_v56 = vmax.f32 %v6471_v13, 0.0  ;;  %v6654_v46 = vmax.f32 %v6584_v20, 0.0 }
 0x69b   : > { %v6653_v27 = vmax.f32 %v6473_v48, 0.0  ;;  %v6655_v30 = vmax.f32 %v6586_v5, 0.0 }
 0x69c   : > { %v6692_v31 = vpack.c.bf16 %v6652_v56, %v6648_v23  ;;  %v6694_v60 = vpack.c.bf16 %v6654_v46, %v6650_v12 }
 0x69d   : > { %v6693_v10 = vpack.c.bf16 %v6653_v27, %v6649_v1  ;;  %v6695_v2 = vpack.c.bf16 %v6655_v30, %v6651_v9  ;;  %v6476_v41 = vpop.f32.mrb[184].mxu0  ;;  %v6589_v62 = vpop.f32.mrb[184].mxu1 }
 0x69e   : > { %v6477_v8 = vadd.f32 %v6476_v41, %v11138_v45  ;;  %v6590_v11 = vadd.f32 %v6589_v62, %v11141_v40  ;;  %v6478_v14 = vpop.f32.mrb[185].mxu0  ;;  %v6591_v59 = vpop.f32.mrb[185].mxu1 }
 0x69f   : > { %v6479_v63 = vadd.f32 %v6478_v14, %v11144_v6  ;;  %v6592_v58 = vadd.f32 %v6591_v59, %v11147_v61  ;;  %v6480_v3 = vpop.f32.mrb[186].mxu0  ;;  %v6593_v15 = vpop.f32.mrb[186].mxu1  ;;  %7039 = vmatprep.mubr.bf16.mxu0 %v6693_v10  ;;  %7136 = vmatprep.mubr.bf16.mxu1 %v6695_v2 }
 0x6a0   : > { %v6481_v49 = vadd.f32 %v6480_v3, %v11138_v45  ;;  %v6594_v0 = vadd.f32 %v6593_v15, %v11141_v40  ;;  %v6482_v57 = vpop.f32.mrb[187].mxu0  ;;  %v6595_v17 = vpop.f32.mrb[187].mxu1  ;;  %7040 = vmatmul.mubr.bf16.gmra.mrb[212].mxu0 %v6692_v31  ;;  %7137 = vmatmul.mubr.bf16.gmra.mrb[212].mxu1 %v6694_v60  ;;  %v6656_v52 = vmax.f32 %v6477_v8, 0.0  ;;  %v6658_v55 = vmax.f32 %v6590_v11, 0.0 }
 0x6a1   : > { %v6483_v33 = vadd.f32 %v6482_v57, %v11144_v6  ;;  %v6596_v43 = vadd.f32 %v6595_v17, %v11147_v61  ;;  %v6657_v28 = vmax.f32 %v6479_v63, 0.0  ;;  %v6659_v25 = vmax.f32 %v6592_v58, 0.0 }
 0x6a2   : > { %v6660_v19 = vmax.f32 %v6481_v49, 0.0  ;;  %v6662_v36 = vmax.f32 %v6594_v0, 0.0 }
 0x6a3   : > { %v6661_v21 = vmax.f32 %v6483_v33, 0.0  ;;  %v6663_v16 = vmax.f32 %v6596_v43, 0.0 }
 0x6a4   : > { %v6696_v32 = vpack.c.bf16 %v6660_v19, %v6656_v52  ;;  %v6698_v42 = vpack.c.bf16 %v6662_v36, %v6658_v55 }
 0x6a5   : > { %v6697_v22 = vpack.c.bf16 %v6661_v21, %v6657_v28  ;;  %v6699_v34 = vpack.c.bf16 %v6663_v16, %v6659_v25  ;;  %v6486_v39 = vpop.f32.mrb[188].mxu0  ;;  %v6599_v50 = vpop.f32.mrb[188].mxu1 }
 0x6a6   : > { %v6487_v35 = vadd.f32 %v6486_v39, %v11138_v45  ;;  %v6600_v26 = vadd.f32 %v6599_v50, %v11141_v40  ;;  %v6488_v37 = vpop.f32.mrb[189].mxu0  ;;  %v6601_v38 = vpop.f32.mrb[189].mxu1 }
 0x6a7   : > { %v6489_v24 = vadd.f32 %v6488_v37, %v11144_v6  ;;  %v6602_v47 = vadd.f32 %v6601_v38, %v11147_v61  ;;  %v6490_v4 = vpop.f32.mrb[190].mxu0  ;;  %v6603_v29 = vpop.f32.mrb[190].mxu1  ;;  %7047 = vmatprep.mubr.bf16.mxu0 %v6697_v22  ;;  %7144 = vmatprep.mubr.bf16.mxu1 %v6699_v34 }
 0x6a8   : > { %v6491_v18 = vadd.f32 %v6490_v4, %v11138_v45  ;;  %v6604_v51 = vadd.f32 %v6603_v29, %v11141_v40  ;;  %v6492_v53 = vpop.f32.mrb[191].mxu0  ;;  %v6605_v44 = vpop.f32.mrb[191].mxu1  ;;  %7048 = vmatmul.mubr.bf16.gmra.mrb[216].mxu0 %v6696_v32  ;;  %7145 = vmatmul.mubr.bf16.gmra.mrb[216].mxu1 %v6698_v42  ;;  %v6664_v7 = vmax.f32 %v6487_v35, 0.0  ;;  %v6666_v54 = vmax.f32 %v6600_v26, 0.0 }
 0x6a9   : > { %v6493_v13 = vadd.f32 %v6492_v53, %v11144_v6  ;;  %v6606_v20 = vadd.f32 %v6605_v44, %v11147_v61  ;;  %v6665_v23 = vmax.f32 %v6489_v24, 0.0  ;;  %v6667_v45 = vmax.f32 %v6602_v47, 0.0 }
 0x6aa   : > { %v6668_v48 = vmax.f32 %v6491_v18, 0.0  ;;  %v6670_v5 = vmax.f32 %v6604_v51, 0.0 }
 0x6ab   : > { %v6669_v12 = vmax.f32 %v6493_v13, 0.0  ;;  %v6671_v40 = vmax.f32 %v6606_v20, 0.0 }
 0x6ac   : > { %v6700_v56 = vpack.c.bf16 %v6668_v48, %v6664_v7  ;;  %v6702_v46 = vpack.c.bf16 %v6670_v5, %v6666_v54 }
 0x6ad   : > { %v6701_v1 = vpack.c.bf16 %v6669_v12, %v6665_v23  ;;  %v6703_v9 = vpack.c.bf16 %v6671_v40, %v6667_v45 }
 0x6af   : > { %7055 = vmatprep.mubr.bf16.mxu0 %v6701_v1  ;;  %7152 = vmatprep.mubr.bf16.mxu1 %v6703_v9 }
 0x6b0   : > { %7056 = vmatmul.mubr.bf16.gmra.mrb[220].mxu0 %v6700_v56  ;;  %7153 = vmatmul.mubr.bf16.gmra.mrb[220].mxu1 %v6702_v46 }
 0x6b1   : > { %9901 = shalt.err (!%p9898_p9)
}
 0x6b2   : > { %s9902_s12 = scalar_lea.hbm %s11219_s6, 1024  ;;  %s9906_s10 = scalar_lea.hbm %s11397_s27, 2048 }
 0x6b3   : > { %p9903_p4 = scmp.ne.s32.totalorder %s11219_s6, %s9902_s12  ;;  %p9907_p5 = scmp.lt.u32.totalorder %s11219_s6, %s11397_s27 }
 0x6b4   : > { %p9908_p2 = scmp.lt.u32.totalorder %s9906_s10, %s9902_s12  ;;  %p9910_p10 = scmp.lt.u32.totalorder %s9902_s12, %s11219_s6 }
 0x6b5   : > { %p9904_p3 = pnand %p9903_p4, %p11398_p1 }
 0x6b6   : > { %p9909_p7 = por %p9908_p2, %p9907_p5 }
 0x6b7   : > { %p9905_p0 = pneg %p9904_p3 }
 0x6b8   : > { %p9911_p11 = por %p9910_p10, %p9909_p7 }
 0x6ba   : > { %p9912_p12 = pnand %p9911_p11, %p9905_p0 }
 0x6bc   : > { %9915 = shalt.err (!%p9912_p12)
}
 0x6bd   : > { %s10020_s17 = smov 64   ;;  %s10021_s14 = smov 4  }
 0x6be   : > { %8865 = dma.vmem_to_hbm [thread:$0]  (%p11398_p1), %s11222_s25, 1024, %s11219_s6, %s7242_s1, %s10020_s17, %s10020_s17, %s10021_s14  }
 0x6bf   : > { %s11399_s12 = sld [smem:[#allocation31_spill]]  ;;  %s11259_s6 = scalar_lea.vmem [#allocation17], %s10382_s24 }
 0x6c0   : > { %s7276_s24 = sshll.u32 %s11259_s6, 4  ;;  %s11400_s10 = sld [smem:[#allocation33_spill]]  ;;  %s11290_s24 = int_to_ptr.vmem [resolvable:$true] %s7276_s24 }
 0x6c1   : > { %s7247_s28 = scalar_lea.sflag [#allocation18], %s10379_s22  ;;  %s9916_s23 = scalar_lea.vmem %s11290_s24, 1024 }
 0x6c2   : > { %p9917_p13 = scmp.ne.s32.totalorder %s11290_s24, %s9916_s23  ;;  %s10022_s20 = smov [#allocation17]  }
 0x6c4   : > { %p9918_p8 = pnand %p9917_p13, %p11398_p1 }
 0x6c5   : > { %v11254_v27 = vld [vmem:[%s11399_s12] ss:$0 sm:$0xff]  ;;  %s9920_s12 = sshll.u32 %s10022_s20, 4  ;;  %s9921_s12 = int_to_ptr.vmem [resolvable:$false] %s9920_s12 }
 0x6c6   : > { %s11288_s3 = scalar_lea.hbm %s11400_s10, %s8099_s18  ;;  %p9919_p6 = pneg %p9918_p8 }
 0x6c7   : > { %s9922_s19 = scalar_lea.vmem %s9921_s12, 2048  ;;  %p9923_p9 = scmp.lt.s32.totalorder %s11290_s24, %s9921_s12 }
 0x6c8   : > { %p9924_p4 = scmp.lt.s32.totalorder %s9922_s19, %s9916_s23 }
 0x6ca   : > { %p9925_p3 = por %p9924_p4, %p9923_p9 }
 0x6cc   : > { %p9926_p0 = pnand %p9925_p3, %p9919_p6 }
 0x74b   : > { %v8339_v6 = vpop.f32.mrb[192].mxu0  ;;  %v8403_v61 = vpop.f32.mrb[192].mxu1 }
 0x74c   : > { %v8340_v30 = vpop.f32.mrb[193].mxu0  ;;  %v8404_v31 = vpop.f32.mrb[193].mxu1 }
 0x74d   : > { %v8341_v60 = vadd.f32 %v8340_v30, %v8339_v6  ;;  %v8405_v10 = vadd.f32 %v8404_v31, %v8403_v61  ;;  %v8342_v2 = vpop.f32.mrb[194].mxu0  ;;  %v8406_v41 = vpop.f32.mrb[194].mxu1 }
 0x74e   : > { %v8343_v62 = vpop.f32.mrb[195].mxu0  ;;  %v8407_v8 = vpop.f32.mrb[195].mxu1 }
 0x74f   : > { %v7002_v11 = vadd.f32 %v8341_v60, %v11254_v27  ;;  %v8344_v14 = vadd.f32 %v8343_v62, %v8342_v2  ;;  %v8408_v59 = vadd.f32 %v8407_v8, %v8406_v41 }
 0x751   : > { %v7099_v63 = vadd.f32 %v8405_v10, %v7002_v11  ;;  %v7005_v58 = vadd.f32 %v8344_v14, %v11254_v27 }
 0x753   : > { %v7102_v3 = vadd.f32 %v8408_v59, %v7005_v58  ;;  %v8345_v15 = vpop.f32.mrb[196].mxu0  ;;  %v8409_v49 = vpop.f32.mrb[196].mxu1 }
 0x754   : > { %v8346_v0 = vpop.f32.mrb[197].mxu0  ;;  %v8410_v57 = vpop.f32.mrb[197].mxu1 }
 0x755   : > { %v8144_v17 = vpack.c.bf16 %v7102_v3, %v7099_v63  ;;  %v8347_v33 = vadd.f32 %v8346_v0, %v8345_v15  ;;  %v8411_v43 = vadd.f32 %v8410_v57, %v8409_v49  ;;  %v8348_v52 = vpop.f32.mrb[198].mxu0  ;;  %v8412_v55 = vpop.f32.mrb[198].mxu1 }
 0x756   : > { %v8349_v19 = vpop.f32.mrb[199].mxu0  ;;  %v8413_v36 = vpop.f32.mrb[199].mxu1 }
 0x757   : > { %8145 = vst [vmem:[%s11259_s6] sm:$0xff] %v8144_v17   ;;  %v7010_v28 = vadd.f32 %v8347_v33, %v11254_v27  ;;  %v8350_v25 = vadd.f32 %v8349_v19, %v8348_v52  ;;  %v8414_v21 = vadd.f32 %v8413_v36, %v8412_v55 }
 0x759   : > { %v7107_v16 = vadd.f32 %v8411_v43, %v7010_v28  ;;  %v7013_v32 = vadd.f32 %v8350_v25, %v11254_v27 }
 0x75b   : > { %v7110_v42 = vadd.f32 %v8414_v21, %v7013_v32  ;;  %v8351_v22 = vpop.f32.mrb[200].mxu0  ;;  %v8415_v34 = vpop.f32.mrb[200].mxu1 }
 0x75c   : > { %v8352_v39 = vpop.f32.mrb[201].mxu0  ;;  %v8416_v50 = vpop.f32.mrb[201].mxu1 }
 0x75d   : > { %v8149_v35 = vpack.c.bf16 %v7110_v42, %v7107_v16  ;;  %v8353_v26 = vadd.f32 %v8352_v39, %v8351_v22  ;;  %v8417_v37 = vadd.f32 %v8416_v50, %v8415_v34  ;;  %v8354_v38 = vpop.f32.mrb[202].mxu0  ;;  %v8418_v24 = vpop.f32.mrb[202].mxu1 }
 0x75e   : > { %v8355_v47 = vpop.f32.mrb[203].mxu0  ;;  %v8419_v4 = vpop.f32.mrb[203].mxu1 }
 0x75f   : > { %8188 = vst [vmem:[%s11259_s6 + $0x8] sm:$0xff] %v8149_v35   ;;  %v7018_v29 = vadd.f32 %v8353_v26, %v11254_v27  ;;  %v8356_v18 = vadd.f32 %v8355_v47, %v8354_v38  ;;  %v8420_v51 = vadd.f32 %v8419_v4, %v8418_v24 }
 0x761   : > { %v7115_v53 = vadd.f32 %v8417_v37, %v7018_v29  ;;  %v7021_v44 = vadd.f32 %v8356_v18, %v11254_v27 }
 0x763   : > { %v7118_v13 = vadd.f32 %v8420_v51, %v7021_v44  ;;  %v8357_v20 = vpop.f32.mrb[204].mxu0  ;;  %v8421_v7 = vpop.f32.mrb[204].mxu1 }
 0x764   : > { %v8358_v54 = vpop.f32.mrb[205].mxu0  ;;  %v8422_v48 = vpop.f32.mrb[205].mxu1 }
 0x765   : > { %v8154_v5 = vpack.c.bf16 %v7118_v13, %v7115_v53  ;;  %v8359_v23 = vadd.f32 %v8358_v54, %v8357_v20  ;;  %v8423_v45 = vadd.f32 %v8422_v48, %v8421_v7  ;;  %v8360_v12 = vpop.f32.mrb[206].mxu0  ;;  %v8424_v40 = vpop.f32.mrb[206].mxu1 }
 0x766   : > { %v8361_v56 = vpop.f32.mrb[207].mxu0  ;;  %v8425_v46 = vpop.f32.mrb[207].mxu1 }
 0x767   : > { %8189 = vst [vmem:[%s11259_s6 + $0x10] sm:$0xff] %v8154_v5   ;;  %v7026_v1 = vadd.f32 %v8359_v23, %v11254_v27  ;;  %v8362_v9 = vadd.f32 %v8361_v56, %v8360_v12  ;;  %v8426_v6 = vadd.f32 %v8425_v46, %v8424_v40 }
 0x769   : > { %v7123_v61 = vadd.f32 %v8423_v45, %v7026_v1  ;;  %v7029_v30 = vadd.f32 %v8362_v9, %v11254_v27 }
 0x76b   : > { %v7126_v31 = vadd.f32 %v8426_v6, %v7029_v30  ;;  %v8363_v60 = vpop.f32.mrb[208].mxu0  ;;  %v8427_v10 = vpop.f32.mrb[208].mxu1 }
 0x76c   : > { %v8364_v2 = vpop.f32.mrb[209].mxu0  ;;  %v8428_v41 = vpop.f32.mrb[209].mxu1 }
 0x76d   : > { %v8159_v62 = vpack.c.bf16 %v7126_v31, %v7123_v61  ;;  %v8365_v8 = vadd.f32 %v8364_v2, %v8363_v60  ;;  %v8429_v11 = vadd.f32 %v8428_v41, %v8427_v10  ;;  %v8366_v14 = vpop.f32.mrb[210].mxu0  ;;  %v8430_v59 = vpop.f32.mrb[210].mxu1 }
 0x76e   : > { %v8367_v63 = vpop.f32.mrb[211].mxu0  ;;  %v8431_v58 = vpop.f32.mrb[211].mxu1 }
 0x76f   : > { %8190 = vst [vmem:[%s11259_s6 + $0x18] sm:$0xff] %v8159_v62   ;;  %v7034_v3 = vadd.f32 %v8365_v8, %v11254_v27  ;;  %v8368_v15 = vadd.f32 %v8367_v63, %v8366_v14  ;;  %v8432_v49 = vadd.f32 %v8431_v58, %v8430_v59 }
 0x771   : > { %v7131_v0 = vadd.f32 %v8429_v11, %v7034_v3  ;;  %v7037_v57 = vadd.f32 %v8368_v15, %v11254_v27 }
 0x773   : > { %v7134_v17 = vadd.f32 %v8432_v49, %v7037_v57  ;;  %v8369_v33 = vpop.f32.mrb[212].mxu0  ;;  %v8433_v43 = vpop.f32.mrb[212].mxu1 }
 0x774   : > { %v8370_v52 = vpop.f32.mrb[213].mxu0  ;;  %v8434_v55 = vpop.f32.mrb[213].mxu1 }
 0x775   : > { %v8164_v19 = vpack.c.bf16 %v7134_v17, %v7131_v0  ;;  %v8371_v36 = vadd.f32 %v8370_v52, %v8369_v33  ;;  %v8435_v28 = vadd.f32 %v8434_v55, %v8433_v43  ;;  %v8372_v25 = vpop.f32.mrb[214].mxu0  ;;  %v8436_v21 = vpop.f32.mrb[214].mxu1 }
 0x776   : > { %v8373_v16 = vpop.f32.mrb[215].mxu0  ;;  %v8437_v32 = vpop.f32.mrb[215].mxu1 }
 0x777   : > { %8191 = vst [vmem:[%s11259_s6 + $0x20] sm:$0xff] %v8164_v19   ;;  %v7042_v42 = vadd.f32 %v8371_v36, %v11254_v27  ;;  %v8374_v22 = vadd.f32 %v8373_v16, %v8372_v25  ;;  %v8438_v34 = vadd.f32 %v8437_v32, %v8436_v21 }
 0x779   : > { %v7139_v39 = vadd.f32 %v8435_v28, %v7042_v42  ;;  %v7045_v50 = vadd.f32 %v8374_v22, %v11254_v27 }
 0x77b   : > { %v7142_v35 = vadd.f32 %v8438_v34, %v7045_v50  ;;  %v8375_v26 = vpop.f32.mrb[216].mxu0  ;;  %v8439_v37 = vpop.f32.mrb[216].mxu1 }
 0x77c   : > { %v8376_v38 = vpop.f32.mrb[217].mxu0  ;;  %v8440_v24 = vpop.f32.mrb[217].mxu1 }
 0x77d   : > { %v8169_v47 = vpack.c.bf16 %v7142_v35, %v7139_v39  ;;  %v8377_v4 = vadd.f32 %v8376_v38, %v8375_v26  ;;  %v8441_v29 = vadd.f32 %v8440_v24, %v8439_v37  ;;  %v8378_v18 = vpop.f32.mrb[218].mxu0  ;;  %v8442_v51 = vpop.f32.mrb[218].mxu1 }
 0x77e   : > { %v8379_v53 = vpop.f32.mrb[219].mxu0  ;;  %v8443_v44 = vpop.f32.mrb[219].mxu1 }
 0x77f   : > { %8192 = vst [vmem:[%s11259_s6 + $0x28] sm:$0xff] %v8169_v47   ;;  %v7050_v13 = vadd.f32 %v8377_v4, %v11254_v27  ;;  %v8380_v20 = vadd.f32 %v8379_v53, %v8378_v18  ;;  %v8444_v7 = vadd.f32 %v8443_v44, %v8442_v51 }
 0x781   : > { %v7147_v54 = vadd.f32 %v8441_v29, %v7050_v13  ;;  %v7053_v48 = vadd.f32 %v8380_v20, %v11254_v27 }
 0x783   : > { %v7150_v5 = vadd.f32 %v8444_v7, %v7053_v48  ;;  %v8381_v23 = vpop.f32.mrb[220].mxu0  ;;  %v8445_v45 = vpop.f32.mrb[220].mxu1 }
 0x784   : > { %v8382_v12 = vpop.f32.mrb[221].mxu0  ;;  %v8446_v40 = vpop.f32.mrb[221].mxu1 }
 0x785   : > { %v8174_v56 = vpack.c.bf16 %v7150_v5, %v7147_v54  ;;  %v8383_v46 = vadd.f32 %v8382_v12, %v8381_v23  ;;  %v8447_v1 = vadd.f32 %v8446_v40, %v8445_v45  ;;  %v8384_v9 = vpop.f32.mrb[222].mxu0  ;;  %v8448_v6 = vpop.f32.mrb[222].mxu1 }
 0x786   : > { %v8385_v61 = vpop.f32.mrb[223].mxu0  ;;  %v8449_v30 = vpop.f32.mrb[223].mxu1 }
 0x787   : > { %8193 = vst [vmem:[%s11259_s6 + $0x30] sm:$0xff] %v8174_v56   ;;  %v7058_v31 = vadd.f32 %v8383_v46, %v11254_v27  ;;  %v8386_v60 = vadd.f32 %v8385_v61, %v8384_v9  ;;  %v8450_v10 = vadd.f32 %v8449_v30, %v8448_v6 }
 0x789   : > { %v7155_v2 = vadd.f32 %v8447_v1, %v7058_v31  ;;  %v7061_v41 = vadd.f32 %v8386_v60, %v11254_v27 }
 0x78b   : > { %v7158_v62 = vadd.f32 %v8450_v10, %v7061_v41 }
 0x78d   : > { %v8179_v8 = vpack.c.bf16 %v7158_v62, %v7155_v2 }
 0x78f   : > { %8194 = vst [vmem:[%s11259_s6 + $0x38] sm:$0xff] %v8179_v8  }
 0x790   : > { %9929 = shalt.err (!%p9926_p0)
}
 0x791   : > { %s9930_s18 = scalar_lea.hbm %s11288_s3, 1024  ;;  %s9934_s1 = scalar_lea.hbm %s11400_s10, 2048 }
 0x792   : > { %p9931_p5 = scmp.ne.s32.totalorder %s11288_s3, %s9930_s18  ;;  %p9935_p10 = scmp.lt.u32.totalorder %s11288_s3, %s11400_s10 }
 0x793   : > { %p9936_p11 = scmp.lt.u32.totalorder %s9934_s1, %s9930_s18  ;;  %p9938_p13 = scmp.lt.u32.totalorder %s9930_s18, %s11288_s3 }
 0x794   : > { %p9932_p2 = pnand %p9931_p5, %p11398_p1 }
 0x795   : > { %p9937_p12 = por %p9936_p11, %p9935_p10 }
 0x796   : > { %p9933_p7 = pneg %p9932_p2 }
 0x797   : > { %p9939_p8 = por %p9938_p13, %p9937_p12 }
 0x799   : > { %p9940_p6 = pnand %p9939_p8, %p9933_p7 }
 0x79b   : > { %9943 = shalt.err (!%p9940_p6)
}
 0x79c   : > { %8866 = dma.vmem_to_hbm [thread:$0]  (%p11398_p1), %s11290_s24, 1024, %s11288_s3, %s7247_s28, %s10020_s17, %s10020_s17, %s10021_s14  }
 0x79d PF: > { %s7291_s23 = sand.u32 1, %s9990_s29   ;;  %p11401_p9 = scmp.ne.s32.totalorder %s11383_s26, 0 }
 0x79e   : > { %p11402_p4 = scmp.ge.s32.totalorder %s10002_s16, 2  ;;  %s7292_s19 = scalar_lea.sflag [#allocation4], %s7291_s23 }
 0x7a0   : > { %p8896_p3 = pnand %p11402_p4, %p11401_p9 }
 0x7a2   : > { %9981 = dma.done.wait (!%p8896_p3), %s7292_s19, 1024  }
 0x7a3   : > { %9983 = vsyncadd (!%p8896_p3), %s7292_s19, 4294966272  ;;  %s7301_s13 = scalar_lea.sflag [#allocation18], %s7291_s23 }
 0x7a4   : > { %9985 = dma.done.wait (!%p8896_p3), %s7301_s13, 1024  }
 0x7a5   : > { %9987 = vsyncadd (!%p8896_p3), %s7301_s13, 4294966272  ;;  %p35_p1 = scmp.ge.s32.totalorder %s10303_s21, 4   ;;  %s11403_s29 = smov %s9994_s30 }
 0x7a6   : > { %s11404_s30 = smov %s9998_s15  ;;  %s11405_s15 = smov %s10315_s8 }
 0x7a7   : > { %s11406_s16 = smov %s10303_s21  ;;  %37 = sbr.rel (!%p35_p1) target bundleno = 20 (0x14), region = 162 }
 0x7ae   :  { %7306 = vsyncpa [#allocation3], 1 }
 0x7af   :  { %7308 = vsyncpa [#allocation3 + $0x1], 1 }
 0x7b0   :  { %7309 = vsyncpa [#allocation6], 1 }
 0x7b1   :  { %7310 = vsyncpa [#allocation9], 1 }
 0x7b2   :  { %7311 = vsyncpa [#allocation12], 1 }
 0x7b3   :  { %7312 = vsyncpa [#allocation15], 1 }
 0x7b4   :  { %7313 = vsyncpa [#allocation4], 1 }
 0x7b5   :  { %7315 = vsyncpa [#allocation4 + $0x1], 1 }
 0x7b6   :  { %7316 = vsyncpa [#allocation18], 1 }
 0x7b7   :  { %7318 = vsyncpa [#allocation18 + $0x1], 1 }

</bundles_post_ra>
